<compile_context>
chip_gen: v7x
topology: tpu7x:2x2x1
jax: 0.10.0
libtpu: 0.0.40
codegen_flags: <defaults>
</compile_context>

<pallas_src>
import functools

import jax
import jax.numpy as jnp
from jax import lax
from jax.experimental import pallas as pl
from jax.experimental.pallas import tpu as pltpu


def _round_up(v, m):
    return (v + m - 1) // m * m


def _conv_bnstats_kernel(x_ref, w_ref, y_ref, stats_ref, xpad_scr, col_scr, *,
                         K, dilation, stride, padding, H, W, H_out, W_out):
    """ReLU + NCHW->NHWC + zero-pad + im2col + fused conv + partial BN stats.

    x_ref    : (1, C_in, H*W)           lane-dense NCHW input block (one image)
    w_ref    : (K*K*C_in, C_out)        fused weights w[t*C_in+c, o] = dw[c,t]*pw[c,o]
    y_ref    : (1, H_out*W_out, C_out)  bf16 intermediate, lane-dense
    stats_ref: (1, 2, C_out)            per-image [sum(y), sum((y - mu_img)^2)]
    xpad_scr : (H+2p, W_pad8, C_in)     bf16 scratch: relu(x) in NHWC, zero halo
    col_scr  : (H_out*W_out, K*K*C_in)  bf16 im2col scratch
    """
    C_in = x_ref.shape[1]
    M = H_out * W_out

    # ReLU + layout change + padding, fused.  The transpose runs on the XLU
    # (idle in this kernel) so no standalone XLA transpose pass is needed;
    # ReLU is done in f32 and the value is cast exactly once for the scratch.
    x_cm = x_ref[0].astype(jnp.float32)                       # (C_in, H*W)
    x_hwc = jnp.maximum(jnp.transpose(x_cm, (1, 0)), 0.0)     # (H*W, C_in) f32
    xpad_scr[pl.ds(padding, H), pl.ds(padding, W), :] = (
        x_hwc.astype(xpad_scr.dtype).reshape(H, W, C_in))

    # Zero only the padding halo; the interior was fully overwritten above and
    # the taps never read past column W + 2*padding, so the sublane round-up
    # tail of the scratch can stay untouched.
    if padding > 0:
        w_valid = W + 2 * padding
        zrows = jnp.zeros((padding, w_valid, C_in), xpad_scr.dtype)
        zcols = jnp.zeros((H, padding, C_in), xpad_scr.dtype)
        xpad_scr[pl.ds(0, padding), pl.ds(0, w_valid), :] = zrows
        xpad_scr[pl.ds(padding + H, padding), pl.ds(0, w_valid), :] = zrows
        xpad_scr[pl.ds(padding, H), pl.ds(0, padding), :] = zcols
        xpad_scr[pl.ds(padding, H), pl.ds(padding + W, padding), :] = zcols

    # im2col: each dilated tap becomes a lane-aligned (multiple-of-128) column
    # block of one (M, K*K*C_in) tile, so the whole conv is a single deep MXU
    # contraction (no f32 accumulator carried across taps).
    # TODO(synk): the W-offset tap slices (sublane offsets 0/2/4) are not
    #   8-aligned; pltpu.roll-generated W-shifted copies would align them, but
    #   this VMEM-local extraction is not the bottleneck at these sizes.
    for kh in range(K):
        for kw in range(K):
            t = kh * K + kw
            h0 = kh * dilation
            w0 = kw * dilation
            if stride == 1:
                patch = xpad_scr[pl.ds(h0, H_out), pl.ds(w0, W_out), :]
            else:
                patch = xpad_scr[pl.ds(h0, H_out, stride=stride),
                                 pl.ds(w0, W_out, stride=stride), :]
            col_scr[:, pl.ds(t * C_in, C_in)] = patch.reshape(M, C_in)

    # Single bf16 MXU pass, f32 accumulation.
    acc = jnp.dot(col_scr[...], w_ref[...], preferred_element_type=jnp.float32)
    y_ref[...] = acc.astype(y_ref.dtype).reshape(1, M, -1)

    # Per-image BN partials, centered around the per-image mean so the wrapper
    # can do a cancellation-safe pooled-variance combine.
    s = jnp.sum(acc, axis=0, keepdims=True)                   # (1, C_out)
    mu = s * (1.0 / M)
    d = acc - mu
    stats_ref[0, pl.ds(0, 1), :] = s
    stats_ref[0, pl.ds(1, 1), :] = jnp.sum(d * d, axis=0, keepdims=True)


def _bn_apply_nchw_kernel(y_ref, scale_ref, shift_ref, out_ref):
    """y*scale + shift, transposed in-kernel so the output block is NCHW."""
    y = y_ref[0].astype(jnp.float32)                          # (M, C_out)
    out = y * scale_ref[...] + shift_ref[...]                 # (M, C_out)
    c_out, m = out_ref.shape[1], out_ref.shape[2]
    out_ref[...] = jnp.transpose(out, (1, 0)).reshape(1, c_out, m)


def wsdilconv_forward(x_nchw, w_depthwise, w_pointwise, gamma, beta, *,
                      stride=1, padding=2, dilation=2, eps=1e-5):
    """Pallas implementation of WSDilConv.forward for a given x_id's params.

    x_nchw      : (N, C_in, H, W)       float32 (bf16 also accepted)
    w_depthwise : (C_in, 1, K, K)       float32 (PyTorch depthwise layout)
    w_pointwise : (C_out, C_in, 1, 1)   float32 (PyTorch pointwise layout)
    gamma, beta : (C_out,)              float32 (WSBN affine params)
    returns     : (N, C_out, H_out, W_out) float32
    """
    N, C_in, H, W = x_nchw.shape
    C_out = w_pointwise.shape[0]
    # WSBN is built with num_features == C_in, so the module is only consistent
    # when C_out == C_in (as in the original NAS cell usage).
    assert C_out == C_in, "WSDilConv's WSBN(C_in) requires C_out == C_in"
    K = w_depthwise.shape[-1]

    H_out = (H + 2 * padding - dilation * (K - 1) - 1) // stride + 1
    W_out = (W + 2 * padding - dilation * (K - 1) - 1) // stride + 1
    M = H_out * W_out
    H_pad = H + 2 * padding
    W_pad8 = _round_up(W + 2 * padding, 8)    # sublane-aligned scratch width

    # Merge contiguous spatial dims only (no HBM transpose pass).  x is read in
    # its incoming dtype: if the surrounding graph already produces bf16
    # activations, the x DMA halves for free (the in-kernel ReLU/cast handles
    # either dtype).  We deliberately do NOT insert a standalone wrapper-side
    # cast of x here, as that would add a full extra HBM pass in isolation.
    x_flat = x_nchw.reshape(N, C_in, H * W)

    # Fold depthwise into pointwise, laid out to match the im2col columns:
    #   w_full[t*C_in + c, o] = dw[c, t] * pw[c, o]
    dw = jnp.transpose(w_depthwise[:, 0, :, :].reshape(C_in, K * K))    # (K*K, C_in)
    pw = jnp.transpose(w_pointwise[:, :, 0, 0])                         # (C_in, C_out)
    w_full = (dw[:, :, None] * pw[None, :, :]).reshape(K * K * C_in, C_out)
    w_full = w_full.astype(jnp.bfloat16)

    gamma = gamma.astype(jnp.float32)
    beta = beta.astype(jnp.float32)

    conv_kernel = functools.partial(
        _conv_bnstats_kernel, K=K, dilation=dilation, stride=stride,
        padding=padding, H=H, W=W, H_out=H_out, W_out=W_out)

    x_bytes = x_flat.dtype.itemsize
    flops = 2 * N * M * K * K * C_in * C_out
    bytes_accessed = (N * C_in * H * W * x_bytes + K * K * C_in * C_out * 2
                      + N * M * C_out * 2 + N * 2 * C_out * 4)

    # VMEM budget derived from actual block/scratch sizes (inputs/outputs
    # double-buffered) instead of hard-coded; clamped under v7x's 64 MiB.
    vmem_blocks = (2 * C_in * H * W * x_bytes          # x block
                   + 2 * K * K * C_in * C_out * 2      # fused weights (bf16)
                   + 2 * M * C_out * 2                 # y block (bf16)
                   + 2 * 2 * C_out * 4                 # stats block
                   + H_pad * W_pad8 * C_in * 2         # padded-input scratch
                   + M * K * K * C_in * 2)             # im2col scratch
    vmem_limit = int(min(64 << 20, max(24 << 20, 2 * vmem_blocks)))

    # TODO(synk): for large feature maps / small N, add a second "parallel"
    #   grid axis tiling H_out into row blocks to deepen the DMA pipeline and
    #   stay under v7x's 64 MiB VMEM; one image per step is tiny at 16x16x128.
    y, stats = pl.pallas_call(
        conv_kernel,
        grid=(N,),
        in_specs=[
            pl.BlockSpec((1, C_in, H * W), lambda n: (n, 0, 0)),
            pl.BlockSpec((K * K * C_in, C_out), lambda n: (0, 0)),
        ],
        out_specs=[
            pl.BlockSpec((1, M, C_out), lambda n: (n, 0, 0)),
            pl.BlockSpec((1, 2, C_out), lambda n: (n, 0, 0)),
        ],
        out_shape=[
            jax.ShapeDtypeStruct((N, M, C_out), jnp.bfloat16),
            jax.ShapeDtypeStruct((N, 2, C_out), jnp.float32),
        ],
        scratch_shapes=[
            pltpu.VMEM((H_pad, W_pad8, C_in), jnp.bfloat16),
            pltpu.VMEM((M, K * K * C_in), jnp.bfloat16),
        ],
        compiler_params=pltpu.CompilerParams(
            dimension_semantics=("parallel",),
            vmem_limit_bytes=vmem_limit),
        cost_estimate=pl.CostEstimate(
            flops=flops, transcendentals=0, bytes_accessed=bytes_accessed),
    )(x_flat, w_full)

    # Pooled (Chan-style) combine of per-image centered partials: matches
    # F.batch_norm's biased batch variance without E[x^2]-E[x]^2 cancellation.
    count = jnp.float32(N * M)
    sums = stats[:, 0, :]                              # (N, C_out)
    css = stats[:, 1, :]                               # (N, C_out)
    mean = jnp.sum(sums, axis=0) / count
    mu_img = sums / jnp.float32(M)
    var = (jnp.sum(css, axis=0)
           + jnp.float32(M) * jnp.sum(jnp.square(mu_img - mean[None, :]), axis=0)
           ) / count
    var = jnp.maximum(var, 0.0)
    rstd = lax.rsqrt(var + eps)
    scale = (gamma * rstd).reshape(1, C_out)
    shift = (beta - mean * gamma * rstd).reshape(1, C_out)

    y_ncm = pl.pallas_call(
        _bn_apply_nchw_kernel,
        grid=(N,),
        in_specs=[
            pl.BlockSpec((1, M, C_out), lambda n: (n, 0, 0)),
            pl.BlockSpec((1, C_out), lambda n: (0, 0)),
            pl.BlockSpec((1, C_out), lambda n: (0, 0)),
        ],
        out_specs=pl.BlockSpec((1, C_out, M), lambda n: (n, 0, 0)),
        out_shape=jax.ShapeDtypeStruct((N, C_out, M), jnp.float32),
        compiler_params=pltpu.CompilerParams(
            dimension_semantics=("parallel",)),
    )(y, scale, shift)

    # Contiguous split of the trailing dim only (no transpose / HBM pass).
    return y_ncm.reshape(N, C_out, H_out, W_out)


def reference_forward(x_nchw, w_depthwise, w_pointwise, gamma, beta, *,
                      stride=1, padding=2, dilation=2, eps=1e-5):
    """Pure-JAX (XLA, f32 HIGHEST) reference matching F.conv2d / F.batch_norm."""
    x = jnp.maximum(x_nchw, 0.0)
    dn = lax.conv_dimension_numbers(x.shape, w_depthwise.shape,
                                    ('NCHW', 'OIHW', 'NCHW'))
    y = lax.conv_general_dilated(
        x, w_depthwise, window_strides=(stride, stride),
        padding=[(padding, padding), (padding, padding)],
        rhs_dilation=(dilation, dilation), dimension_numbers=dn,
        feature_group_count=x.shape[1], precision=lax.Precision.HIGHEST)
    y = lax.conv_general_dilated(
        y, w_pointwise, window_strides=(1, 1), padding=[(0, 0), (0, 0)],
        dimension_numbers=dn, precision=lax.Precision.HIGHEST)
    mean = jnp.mean(y, axis=(0, 2, 3), keepdims=True)
    var = jnp.mean(jnp.square(y - mean), axis=(0, 2, 3), keepdims=True)
    y_hat = (y - mean) / jnp.sqrt(var + eps)
    return y_hat * gamma.reshape(1, -1, 1, 1) + beta.reshape(1, -1, 1, 1)


if __name__ == "__main__":
    # Module hyperparameters (DARTS-style dil_conv_3x3): k=3, pad=2, dil=2.
    num_possible_inputs = 2
    C_in = C_out = 128       # C maps to the 128-lane dim; WSBN needs C_out==C_in
    kernel_size = 3
    stride = 1               # forward() default
    padding = 2
    dilation = 2
    N, H, W = 2, 16, 16
    x_id = 1

    key = jax.random.PRNGKey(0)
    keys = jax.random.split(key, 1 + 2 * num_possible_inputs)
    x = jax.random.normal(keys[0], (N, C_in, H, W), jnp.float32)

    # Deterministic synthetic parameters (PyTorch leaves these uninitialized).
    W1_depthwise = [0.1 * jax.random.normal(keys[1 + 2 * i],
                                            (C_in, 1, kernel_size, kernel_size),
                                            jnp.float32)
                    for i in range(num_possible_inputs)]
    W1_pointwise = [0.1 * jax.random.normal(keys[2 + 2 * i],
                                            (C_out, C_in, 1, 1), jnp.float32)
                    for i in range(num_possible_inputs)]
    # WSBN.reset_parameters(): weight[i] = 1, bias[i] = 0
    bn_weight = [jnp.ones((C_in,), jnp.float32)] * num_possible_inputs
    bn_bias = [jnp.zeros((C_in,), jnp.float32)] * num_possible_inputs

    fwd = jax.jit(functools.partial(
        wsdilconv_forward, stride=stride, padding=padding, dilation=dilation))
    out = fwd(x, W1_depthwise[x_id], W1_pointwise[x_id],
              bn_weight[x_id], bn_bias[x_id])
    out = jax.block_until_ready(out)

    ref = reference_forward(
        x, W1_depthwise[x_id], W1_pointwise[x_id],
        bn_weight[x_id], bn_bias[x_id],
        stride=stride, padding=padding, dilation=dilation)
    ref = jax.block_until_ready(ref)

    assert out.shape == (N, C_out, H, W), out.shape
    # Conv runs as a single bf16 MXU pass with f32 accumulation and the
    # intermediate y is stored bf16; the reference is full f32 (HIGHEST), so
    # tolerance is set for bf16-level numerics of a 1152-term contraction on
    # a variance-normalized (unit-scale) output.
    max_err = float(jnp.max(jnp.abs(out - ref)))
    assert jnp.allclose(out, ref, atol=4e-2, rtol=4e-2), max_err
    print("KERNEL_OK")
</pallas_src>

<mosaic_0001>
module attributes {stable_mosaic.version = 11 : i64} {
  func.func @_conv_bnstats_kernel(%arg0: i32, %arg1: memref<1x128x256xf32, #tpu.memory_space<vmem>>, %arg2: memref<1152x128xbf16, #tpu.memory_space<vmem>>, %arg3: memref<1x256x128xbf16, #tpu.memory_space<vmem>>, %arg4: memref<1x2x128xf32, #tpu.memory_space<vmem>>, %arg5: memref<20x24x128xbf16, #tpu.memory_space<vmem>>, %arg6: memref<256x1152xbf16, #tpu.memory_space<vmem>>) attributes {dimension_semantics = [#tpu.dimension_semantics<parallel>], iteration_bounds = array<i64: 2>, scalar_prefetch = 0 : i64, scratch_operands = 2 : i64, tpu.core_type = #tpu.core_type<tc>, window_params = [{transform_indices = @transform_0, window_bounds = array<i64: 1, 128, 256>}, {pipeline_mode = #tpu.pipeline_mode<synchronous>, transform_indices = @transform_1, window_bounds = array<i64: 1152, 128>}, {transform_indices = @transform_2, window_bounds = array<i64: 1, 256, 128>}, {transform_indices = @transform_3, window_bounds = array<i64: 1, 2, 128>}]} {
    %c0 = arith.constant 0 : index
    %c0_0 = arith.constant 0 : index
    %c0_1 = arith.constant 0 : index
    %0 = vector.load %arg1[%c0, %c0_0, %c0_1] : memref<1x128x256xf32, #tpu.memory_space<vmem>>, vector<1x128x256xf32>
    %1 = vector.shape_cast %0 : vector<1x128x256xf32> to vector<128x256xf32>
    %2 = tpu.transpose %1, [1, 0] : vector<128x256xf32> -> vector<256x128xf32>
    %cst = arith.constant 0.000000e+00 : f32
    %3 = vector.broadcast %cst : f32 to vector<256x128xf32>
    %4 = arith.maximumf %2, %3 : vector<256x128xf32>
    %5 = arith.truncf %4 : vector<256x128xf32> to vector<256x128xbf16>
    %6 = vector.shape_cast %5 : vector<256x128xbf16> to vector<16x16x128xbf16>
    %c2 = arith.constant 2 : index
    %c2_2 = arith.constant 2 : index
    %c0_3 = arith.constant 0 : index
    %7 = vector.load %arg5[%c2, %c2_2, %c0_3] : memref<20x24x128xbf16, #tpu.memory_space<vmem>>, vector<16x16x128xbf16>
    tpu.vector_store %arg5[%c2, %c2_2, %c0_3], %6 {strides = array<i32>} : memref<20x24x128xbf16, #tpu.memory_space<vmem>>, vector<16x16x128xbf16>,
    %cst_4 = arith.constant 0.000000e+00 : bf16
    %8 = vector.broadcast %cst_4 : bf16 to vector<2x20x128xbf16>
    %cst_5 = arith.constant 0.000000e+00 : bf16
    %9 = vector.broadcast %cst_5 : bf16 to vector<16x2x128xbf16>
    %c0_6 = arith.constant 0 : index
    %c0_7 = arith.constant 0 : index
    %c0_8 = arith.constant 0 : index
    %10 = vector.load %arg5[%c0_6, %c0_7, %c0_8] : memref<20x24x128xbf16, #tpu.memory_space<vmem>>, vector<2x20x128xbf16>
    tpu.vector_store %arg5[%c0_6, %c0_7, %c0_8], %8 {strides = array<i32>} : memref<20x24x128xbf16, #tpu.memory_space<vmem>>, vector<2x20x128xbf16>,
    %c18 = arith.constant 18 : index
    %c0_9 = arith.constant 0 : index
    %c0_10 = arith.constant 0 : index
    %11 = vector.load %arg5[%c18, %c0_9, %c0_10] : memref<20x24x128xbf16, #tpu.memory_space<vmem>>, vector<2x20x128xbf16>
    tpu.vector_store %arg5[%c18, %c0_9, %c0_10], %8 {strides = array<i32>} : memref<20x24x128xbf16, #tpu.memory_space<vmem>>, vector<2x20x128xbf16>,
    %c2_11 = arith.constant 2 : index
    %c0_12 = arith.constant 0 : index
    %c0_13 = arith.constant 0 : index
    %12 = vector.load %arg5[%c2_11, %c0_12, %c0_13] : memref<20x24x128xbf16, #tpu.memory_space<vmem>>, vector<16x2x128xbf16>
    tpu.vector_store %arg5[%c2_11, %c0_12, %c0_13], %9 {strides = array<i32>} : memref<20x24x128xbf16, #tpu.memory_space<vmem>>, vector<16x2x128xbf16>,
    %c2_14 = arith.constant 2 : index
    %c18_15 = arith.constant 18 : index
    %c0_16 = arith.constant 0 : index
    %13 = vector.load %arg5[%c2_14, %c18_15, %c0_16] : memref<20x24x128xbf16, #tpu.memory_space<vmem>>, vector<16x2x128xbf16>
    tpu.vector_store %arg5[%c2_14, %c18_15, %c0_16], %9 {strides = array<i32>} : memref<20x24x128xbf16, #tpu.memory_space<vmem>>, vector<16x2x128xbf16>,
    %c0_17 = arith.constant 0 : index
    %c0_18 = arith.constant 0 : index
    %c0_19 = arith.constant 0 : index
    %14 = vector.load %arg5[%c0_17, %c0_18, %c0_19] : memref<20x24x128xbf16, #tpu.memory_space<vmem>>, vector<16x16x128xbf16>
    %15 = vector.shape_cast %14 : vector<16x16x128xbf16> to vector<256x128xbf16>
    %c0_20 = arith.constant 0 : index
    %c0_21 = arith.constant 0 : index
    %16 = vector.load %arg6[%c0_20, %c0_21] : memref<256x1152xbf16, #tpu.memory_space<vmem>>, vector<256x128xbf16>
    tpu.vector_store %arg6[%c0_20, %c0_21], %15 {strides = array<i32>} : memref<256x1152xbf16, #tpu.memory_space<vmem>>, vector<256x128xbf16>,
    %c0_22 = arith.constant 0 : index
    %c2_23 = arith.constant 2 : index
    %c0_24 = arith.constant 0 : index
    %17 = vector.load %arg5[%c0_22, %c2_23, %c0_24] : memref<20x24x128xbf16, #tpu.memory_space<vmem>>, vector<16x16x128xbf16>
    %18 = vector.shape_cast %17 : vector<16x16x128xbf16> to vector<256x128xbf16>
    %c0_25 = arith.constant 0 : index
    %c128 = arith.constant 128 : index
    %19 = vector.load %arg6[%c0_25, %c128] : memref<256x1152xbf16, #tpu.memory_space<vmem>>, vector<256x128xbf16>
    tpu.vector_store %arg6[%c0_25, %c128], %18 {strides = array<i32>} : memref<256x1152xbf16, #tpu.memory_space<vmem>>, vector<256x128xbf16>,
    %c0_26 = arith.constant 0 : index
    %c4 = arith.constant 4 : index
    %c0_27 = arith.constant 0 : index
    %20 = vector.load %arg5[%c0_26, %c4, %c0_27] : memref<20x24x128xbf16, #tpu.memory_space<vmem>>, vector<16x16x128xbf16>
    %21 = vector.shape_cast %20 : vector<16x16x128xbf16> to vector<256x128xbf16>
    %c0_28 = arith.constant 0 : index
    %c256 = arith.constant 256 : index
    %22 = vector.load %arg6[%c0_28, %c256] : memref<256x1152xbf16, #tpu.memory_space<vmem>>, vector<256x128xbf16>
    tpu.vector_store %arg6[%c0_28, %c256], %21 {strides = array<i32>} : memref<256x1152xbf16, #tpu.memory_space<vmem>>, vector<256x128xbf16>,
    %c2_29 = arith.constant 2 : index
    %c0_30 = arith.constant 0 : index
    %c0_31 = arith.constant 0 : index
    %23 = vector.load %arg5[%c2_29, %c0_30, %c0_31] : memref<20x24x128xbf16, #tpu.memory_space<vmem>>, vector<16x16x128xbf16>
    %24 = vector.shape_cast %23 : vector<16x16x128xbf16> to vector<256x128xbf16>
    %c0_32 = arith.constant 0 : index
    %c384 = arith.constant 384 : index
    %25 = vector.load %arg6[%c0_32, %c384] : memref<256x1152xbf16, #tpu.memory_space<vmem>>, vector<256x128xbf16>
    tpu.vector_store %arg6[%c0_32, %c384], %24 {strides = array<i32>} : memref<256x1152xbf16, #tpu.memory_space<vmem>>, vector<256x128xbf16>,
    %c2_33 = arith.constant 2 : index
    %c2_34 = arith.constant 2 : index
    %c0_35 = arith.constant 0 : index
    %26 = vector.load %arg5[%c2_33, %c2_34, %c0_35] : memref<20x24x128xbf16, #tpu.memory_space<vmem>>, vector<16x16x128xbf16>
    %27 = vector.shape_cast %26 : vector<16x16x128xbf16> to vector<256x128xbf16>
    %c0_36 = arith.constant 0 : index
    %c512 = arith.constant 512 : index
    %28 = vector.load %arg6[%c0_36, %c512] : memref<256x1152xbf16, #tpu.memory_space<vmem>>, vector<256x128xbf16>
    tpu.vector_store %arg6[%c0_36, %c512], %27 {strides = array<i32>} : memref<256x1152xbf16, #tpu.memory_space<vmem>>, vector<256x128xbf16>,
    %c2_37 = arith.constant 2 : index
    %c4_38 = arith.constant 4 : index
    %c0_39 = arith.constant 0 : index
    %29 = vector.load %arg5[%c2_37, %c4_38, %c0_39] : memref<20x24x128xbf16, #tpu.memory_space<vmem>>, vector<16x16x128xbf16>
    %30 = vector.shape_cast %29 : vector<16x16x128xbf16> to vector<256x128xbf16>
    %c0_40 = arith.constant 0 : index
    %c640 = arith.constant 640 : index
    %31 = vector.load %arg6[%c0_40, %c640] : memref<256x1152xbf16, #tpu.memory_space<vmem>>, vector<256x128xbf16>
    tpu.vector_store %arg6[%c0_40, %c640], %30 {strides = array<i32>} : memref<256x1152xbf16, #tpu.memory_space<vmem>>, vector<256x128xbf16>,
    %c4_41 = arith.constant 4 : index
    %c0_42 = arith.constant 0 : index
    %c0_43 = arith.constant 0 : index
    %32 = vector.load %arg5[%c4_41, %c0_42, %c0_43] : memref<20x24x128xbf16, #tpu.memory_space<vmem>>, vector<16x16x128xbf16>
    %33 = vector.shape_cast %32 : vector<16x16x128xbf16> to vector<256x128xbf16>
    %c0_44 = arith.constant 0 : index
    %c768 = arith.constant 768 : index
    %34 = vector.load %arg6[%c0_44, %c768] : memref<256x1152xbf16, #tpu.memory_space<vmem>>, vector<256x128xbf16>
    tpu.vector_store %arg6[%c0_44, %c768], %33 {strides = array<i32>} : memref<256x1152xbf16, #tpu.memory_space<vmem>>, vector<256x128xbf16>,
    %c4_45 = arith.constant 4 : index
    %c2_46 = arith.constant 2 : index
    %c0_47 = arith.constant 0 : index
    %35 = vector.load %arg5[%c4_45, %c2_46, %c0_47] : memref<20x24x128xbf16, #tpu.memory_space<vmem>>, vector<16x16x128xbf16>
    %36 = vector.shape_cast %35 : vector<16x16x128xbf16> to vector<256x128xbf16>
    %c0_48 = arith.constant 0 : index
    %c896 = arith.constant 896 : index
    %37 = vector.load %arg6[%c0_48, %c896] : memref<256x1152xbf16, #tpu.memory_space<vmem>>, vector<256x128xbf16>
    tpu.vector_store %arg6[%c0_48, %c896], %36 {strides = array<i32>} : memref<256x1152xbf16, #tpu.memory_space<vmem>>, vector<256x128xbf16>,
    %c4_49 = arith.constant 4 : index
    %c4_50 = arith.constant 4 : index
    %c0_51 = arith.constant 0 : index
    %38 = vector.load %arg5[%c4_49, %c4_50, %c0_51] : memref<20x24x128xbf16, #tpu.memory_space<vmem>>, vector<16x16x128xbf16>
    %39 = vector.shape_cast %38 : vector<16x16x128xbf16> to vector<256x128xbf16>
    %c0_52 = arith.constant 0 : index
    %c1024 = arith.constant 1024 : index
    %40 = vector.load %arg6[%c0_52, %c1024] : memref<256x1152xbf16, #tpu.memory_space<vmem>>, vector<256x128xbf16>
    tpu.vector_store %arg6[%c0_52, %c1024], %39 {strides = array<i32>} : memref<256x1152xbf16, #tpu.memory_space<vmem>>, vector<256x128xbf16>,
    %c0_53 = arith.constant 0 : index
    %c0_54 = arith.constant 0 : index
    %41 = vector.load %arg6[%c0_53, %c0_54] : memref<256x1152xbf16, #tpu.memory_space<vmem>>, vector<256x1152xbf16>
    %c0_55 = arith.constant 0 : index
    %c0_56 = arith.constant 0 : index
    %42 = vector.load %arg2[%c0_55, %c0_56] : memref<1152x128xbf16, #tpu.memory_space<vmem>>, vector<1152x128xbf16>
    %cst_57 = arith.constant dense<0.000000e+00> : vector<256x128xf32>
    %43 = tpu.matmul %41, %42, %cst_57 {dimension_numbers = #tpu.dot_dimension_numbers<[1], [0], [0], [1], [0, 0, 1, 1], [], []>} : vector<256x1152xbf16>, vector<1152x128xbf16>, vector<256x128xf32> -> vector<256x128xf32>
    %44 = arith.truncf %43 : vector<256x128xf32> to vector<256x128xbf16>
    %45 = vector.shape_cast %44 : vector<256x128xbf16> to vector<1x256x128xbf16>
    %c0_58 = arith.constant 0 : index
    %c0_59 = arith.constant 0 : index
    %c0_60 = arith.constant 0 : index
    %46 = vector.load %arg3[%c0_58, %c0_59, %c0_60] : memref<1x256x128xbf16, #tpu.memory_space<vmem>>, vector<1x256x128xbf16>
    tpu.vector_store %arg3[%c0_58, %c0_59, %c0_60], %45 {strides = array<i32>} : memref<1x256x128xbf16, #tpu.memory_space<vmem>>, vector<1x256x128xbf16>,
    %cst_61 = arith.constant dense<0.000000e+00> : vector<128xf32>
    %47 = vector.multi_reduction <add>, %43, %cst_61 [0] : vector<256x128xf32> to vector<128xf32>
    %48 = vector.shape_cast %47 : vector<128xf32> to vector<1x128xf32>
    %cst_62 = arith.constant 3.906250e-03 : f32
    %49 = vector.broadcast %cst_62 : f32 to vector<1x128xf32>
    %50 = arith.mulf %48, %49 : vector<1x128xf32>
    %51 = vector.broadcast %50 : vector<1x128xf32> to vector<256x128xf32>
    %52 = arith.subf %43, %51 : vector<256x128xf32>
    %c0_63 = arith.constant 0 : index
    %c0_64 = arith.constant 0 : index
    %c0_65 = arith.constant 0 : index
    %53 = vector.load %arg4[%c0_63, %c0_64, %c0_65] : memref<1x2x128xf32, #tpu.memory_space<vmem>>, vector<1x1x128xf32>
    %54 = vector.shape_cast %53 : vector<1x1x128xf32> to vector<1x128xf32>
    %55 = vector.shape_cast %48 : vector<1x128xf32> to vector<1x1x128xf32>
    tpu.vector_store %arg4[%c0_63, %c0_64, %c0_65], %55 {strides = array<i32>} : memref<1x2x128xf32, #tpu.memory_space<vmem>>, vector<1x1x128xf32>,
    %56 = arith.mulf %52, %52 : vector<256x128xf32>
    %cst_66 = arith.constant dense<0.000000e+00> : vector<128xf32>
    %57 = vector.multi_reduction <add>, %56, %cst_66 [0] : vector<256x128xf32> to vector<128xf32>
    %58 = vector.shape_cast %57 : vector<128xf32> to vector<1x128xf32>
    %c0_67 = arith.constant 0 : index
    %c1 = arith.constant 1 : index
    %c0_68 = arith.constant 0 : index
    %59 = vector.load %arg4[%c0_67, %c1, %c0_68] : memref<1x2x128xf32, #tpu.memory_space<vmem>>, vector<1x1x128xf32>
    %60 = vector.shape_cast %59 : vector<1x1x128xf32> to vector<1x128xf32>
    %61 = vector.shape_cast %58 : vector<1x128xf32> to vector<1x1x128xf32>
    tpu.vector_store %arg4[%c0_67, %c1, %c0_68], %61 {strides = array<i32>} : memref<1x2x128xf32, #tpu.memory_space<vmem>>, vector<1x1x128xf32>,
    return
  }
  func.func @transform_0(%arg0: i32) -> (i32, i32, i32) {
    %c0_i32 = arith.constant 0 : i32
    %c0_i32_0 = arith.constant 0 : i32
    %c0_i32_1 = arith.constant 0 : i32
    return %arg0, %c0_i32, %c0_i32_0 : i32, i32, i32
  }
  func.func @transform_1(%arg0: i32) -> (i32, i32) {
    %c0_i32 = arith.constant 0 : i32
    %c0_i32_0 = arith.constant 0 : i32
    %c0_i32_1 = arith.constant 0 : i32
    return %c0_i32, %c0_i32_0 : i32, i32
  }
  func.func @transform_2(%arg0: i32) -> (i32, i32, i32) {
    %c0_i32 = arith.constant 0 : i32
    %c0_i32_0 = arith.constant 0 : i32
    %c0_i32_1 = arith.constant 0 : i32
    return %arg0, %c0_i32, %c0_i32_0 : i32, i32, i32
  }
  func.func @transform_3(%arg0: i32) -> (i32, i32, i32) {
    %c0_i32 = arith.constant 0 : i32
    %c0_i32_0 = arith.constant 0 : i32
    %c0_i32_1 = arith.constant 0 : i32
    return %arg0, %c0_i32, %c0_i32_0 : i32, i32, i32
  }
}

module attributes {stable_mosaic.version = 11 : i64} {
  func.func @_bn_apply_nchw_kernel(%arg0: i32, %arg1: memref<1x256x128xbf16, #tpu.memory_space<vmem>>, %arg2: memref<1x128xf32, #tpu.memory_space<vmem>>, %arg3: memref<1x128xf32, #tpu.memory_space<vmem>>, %arg4: memref<1x128x256xf32, #tpu.memory_space<vmem>>) attributes {dimension_semantics = [#tpu.dimension_semantics<parallel>], iteration_bounds = array<i64: 2>, scalar_prefetch = 0 : i64, scratch_operands = 0 : i64, tpu.core_type = #tpu.core_type<tc>, window_params = [{transform_indices = @transform_0, window_bounds = array<i64: 1, 256, 128>}, {pipeline_mode = #tpu.pipeline_mode<synchronous>, transform_indices = @transform_1, window_bounds = array<i64: 1, 128>}, {pipeline_mode = #tpu.pipeline_mode<synchronous>, transform_indices = @transform_2, window_bounds = array<i64: 1, 128>}, {transform_indices = @transform_3, window_bounds = array<i64: 1, 128, 256>}]} {
    %c0 = arith.constant 0 : index
    %c0_0 = arith.constant 0 : index
    %c0_1 = arith.constant 0 : index
    %0 = vector.load %arg1[%c0, %c0_0, %c0_1] : memref<1x256x128xbf16, #tpu.memory_space<vmem>>, vector<1x256x128xbf16>
    %1 = vector.shape_cast %0 : vector<1x256x128xbf16> to vector<256x128xbf16>
    %2 = arith.extf %1 : vector<256x128xbf16> to vector<256x128xf32>
    %c0_2 = arith.constant 0 : index
    %c0_3 = arith.constant 0 : index
    %3 = vector.load %arg2[%c0_2, %c0_3] : memref<1x128xf32, #tpu.memory_space<vmem>>, vector<1x128xf32>
    %4 = vector.broadcast %3 : vector<1x128xf32> to vector<256x128xf32>
    %5 = arith.mulf %2, %4 : vector<256x128xf32>
    %c0_4 = arith.constant 0 : index
    %c0_5 = arith.constant 0 : index
    %6 = vector.load %arg3[%c0_4, %c0_5] : memref<1x128xf32, #tpu.memory_space<vmem>>, vector<1x128xf32>
    %7 = vector.broadcast %6 : vector<1x128xf32> to vector<256x128xf32>
    %8 = arith.addf %5, %7 : vector<256x128xf32>
    %9 = tpu.transpose %8, [1, 0] : vector<256x128xf32> -> vector<128x256xf32>
    %10 = vector.shape_cast %9 : vector<128x256xf32> to vector<1x128x256xf32>
    %c0_6 = arith.constant 0 : index
    %c0_7 = arith.constant 0 : index
    %c0_8 = arith.constant 0 : index
    %11 = vector.load %arg4[%c0_6, %c0_7, %c0_8] : memref<1x128x256xf32, #tpu.memory_space<vmem>>, vector<1x128x256xf32>
    tpu.vector_store %arg4[%c0_6, %c0_7, %c0_8], %10 {strides = array<i32>} : memref<1x128x256xf32, #tpu.memory_space<vmem>>, vector<1x128x256xf32>,
    return
  }
  func.func @transform_0(%arg0: i32) -> (i32, i32, i32) {
    %c0_i32 = arith.constant 0 : i32
    %c0_i32_0 = arith.constant 0 : i32
    %c0_i32_1 = arith.constant 0 : i32
    return %arg0, %c0_i32, %c0_i32_0 : i32, i32, i32
  }
  func.func @transform_1(%arg0: i32) -> (i32, i32) {
    %c0_i32 = arith.constant 0 : i32
    %c0_i32_0 = arith.constant 0 : i32
    %c0_i32_1 = arith.constant 0 : i32
    return %c0_i32, %c0_i32_0 : i32, i32
  }
  func.func @transform_2(%arg0: i32) -> (i32, i32) {
    %c0_i32 = arith.constant 0 : i32
    %c0_i32_0 = arith.constant 0 : i32
    %c0_i32_1 = arith.constant 0 : i32
    return %c0_i32, %c0_i32_0 : i32, i32
  }
  func.func @transform_3(%arg0: i32) -> (i32, i32, i32) {
    %c0_i32 = arith.constant 0 : i32
    %c0_i32_0 = arith.constant 0 : i32
    %c0_i32_1 = arith.constant 0 : i32
    return %arg0, %c0_i32, %c0_i32_0 : i32, i32, i32
  }
}

</mosaic_0001>

<bundles_post_ra>
// kernel: squeeze.4
= control target key start
LH: loop header
LB: loop body
LE: loop exit
PB: predicated region body
PF: predicated region fallthrough
CT: control target
= control target key end

     0   :  { %s58_s0 = inlined_call_operand.vmem [shape: f32[128,3,3], index: 0, kind: input, shape index: {}]   ;;  %s59_s1 = inlined_call_operand.vmem [shape: f32[128,9], index: 1, kind: output, shape index: {}]  }
   0x1   :  { %v26_v0 = vld [vmem:[%s58_s0 + $0x8] sm:$0xf]  ;;  %v27_v1 = vld [vmem:[%s58_s0 + $0x4] sm:$0xf]  ;;  %v13_v2 = vld [vmem:[%s58_s0] sm:$0xf] }
   0x2   :  { %8 = vst [vmem:[#allocation0 + $0x10] sm:$0xf] %v26_v0  ;;  %12 = vst [vmem:[#allocation0 + $0x8] sm:$0xf] %v27_v1 }
   0x3   :  { %14 = vst [vmem:[#allocation0] sm:$0xf] %v13_v2 }
   0x9   :  { %v18_v4 = vld [vmem:[#allocation0 + $0x8] sm:$0x7]   ;;  %v22_v5 = vld [vmem:[#allocation0 + $0x10] sm:$0x7]  }
   0xa   :  { %v15_v3 = vld [vmem:[#allocation0] sm:$0x7]   ;;  %28 = vst [vmem:[%s59_s1 + $0x3] sm:$0x7] %v18_v4   ;;  %29 = vst [vmem:[%s59_s1 + $0x6] sm:$0x7] %v22_v5  }
   0xb   :  { %16 = vst [vmem:[%s59_s1] sm:$0x7] %v15_v3  }

// kernel: wsdilconv_forward.3
= control target key start
LH: loop header
LB: loop body
LE: loop exit
PB: predicated region body
PF: predicated region fallthrough
CT: control target
= control target key end

     0   :  { %s594_s12 = smov 0   ;;  %s741_s0 = inlined_call_operand.vmem [shape: bf16[2,256,128], index: 0, kind: input, shape index: {}]   ;;  %s742_s1 = inlined_call_operand.vmem [shape: f32[1,128], index: 1, kind: input, shape index: {}]   ;;  %s743_s2 = inlined_call_operand.vmem [shape: f32[1,128], index: 2, kind: input, shape index: {}]   ;;  %s744_s3 = inlined_call_operand.vmem [shape: f32[2,128,256], index: 3, kind: output, shape index: {}]  }
   0x1 LB: > { %s464_s13 = sadd.s32 4294967295, %s572_s12   ;;  %p468_p0 = scmp.ge.s32.totalorder %s572_s12, 1  ;;  %s572_s12 = sphi %s594_s12, %s13_s12  }
   0x2   : > { %p137_p1 = scmp.lt.s32.totalorder %s572_s12, 3 }
   0x4   : > { %p138_p2 = pnand %p468_p0, %p137_p1 }
   0x5   : > { %p161_p3 = scmp.lt.s32.totalorder (!%p138_p2), %s464_s13, 1  ;;  %v613_v0 = vld [vmem:[%s742_s1] ss:$0 sm:$0xff] (!%p138_p2) }
   0x6   : > { %141 = sbr.rel (%p138_p2) target bundleno = 214 (0xd6), region = 32  ;;  %v622_v9 = vld [vmem:[%s743_s2] ss:$0 sm:$0xff] (!%p138_p2) }
   0xd   : > { %s746_s13 = smov (!%p161_p3, %s464_s13), 1 }
   0xe   : > { %s477_s14 = sshll.u32 %s746_s13, 7  ;;  %s478_s22 = sshll.u32 %s746_s13, 8 }
   0xf   : > { %s608_s17 = scalar_lea.vmem %s741_s0, %s477_s14  ;;  %s704_s25 = scalar_lea.vmem %s744_s3, %s478_s22 }
  0x10   : > { %v550_v1 = vld [vmem:[%s608_s17 + $0x40] sm:$0xff]   ;;  %v551_v3 = vld [vmem:[%s608_s17 + $0x48] sm:$0xff]   ;;  %v552_v24 = vld [vmem:[%s608_s17 + $0x50] sm:$0xff]  }
  0x11   : > { %v480_v2 = vld [vmem:[%s608_s17] sm:$0xff]   ;;  %v513_v4 = vunpack.c.l.bf16 %v550_v1  ;;  %v514_v6 = vunpack.c.h.bf16 %v550_v1  ;;  %v543_v8 = vld [vmem:[%s608_s17 + $0x8] sm:$0xff]   ;;  %v517_v10 = vunpack.c.l.bf16 %v551_v3  ;;  %v518_v19 = vunpack.c.h.bf16 %v551_v3  ;;  %v544_v25 = vld [vmem:[%s608_s17 + $0x10] sm:$0xff]  }
  0x12   : > { %v481_v5 = vunpack.c.l.bf16 %v480_v2  ;;  %v482_v7 = vunpack.c.h.bf16 %v480_v2  ;;  %v485_v11 = vunpack.c.l.bf16 %v543_v8  ;;  %v486_v20 = vunpack.c.h.bf16 %v543_v8  ;;  %v553_v38 = vld [vmem:[%s608_s17 + $0x58] sm:$0xff]   ;;  %v554_v52 = vld [vmem:[%s608_s17 + $0x60] sm:$0xff]   ;;  %v555_v3 = vld [vmem:[%s608_s17 + $0x68] sm:$0xff]  }
  0x13   : > { %v258_v12 = vmul.f32 %v513_v4, %v613_v0  ;;  %v259_v14 = vmul.f32 %v514_v6, %v613_v0  ;;  %v260_v18 = vmul.f32 %v517_v10, %v613_v0  ;;  %v261_v26 = vmul.f32 %v518_v19, %v613_v0  ;;  %v545_v39 = vld [vmem:[%s608_s17 + $0x18] sm:$0xff]   ;;  %v546_v53 = vld [vmem:[%s608_s17 + $0x20] sm:$0xff]   ;;  %v547_v4 = vld [vmem:[%s608_s17 + $0x28] sm:$0xff]  }
  0x14   : > { %v242_v13 = vmul.f32 %v481_v5, %v613_v0  ;;  %v243_v15 = vmul.f32 %v482_v7, %v613_v0  ;;  %v244_v23 = vmul.f32 %v485_v11, %v613_v0  ;;  %v245_v27 = vmul.f32 %v486_v20, %v613_v0  ;;  %v548_v19 = vld [vmem:[%s608_s17 + $0x30] sm:$0xff]  }
  0x15   : > { %v297_v16 = vadd.f32 %v622_v9, %v258_v12  ;;  %v298_v21 = vadd.f32 %v622_v9, %v259_v14  ;;  %v299_v28 = vadd.f32 %v622_v9, %v260_v18  ;;  %v521_v30 = vunpack.c.l.bf16 %v552_v24  ;;  %v556_v18 = vld [vmem:[%s608_s17 + $0x70] sm:$0xff]  }
  0x16   : > { %v281_v17 = vadd.f32 %v622_v9, %v242_v13  ;;  %v282_v22 = vadd.f32 %v622_v9, %v243_v15  ;;  %v283_v29 = vadd.f32 %v622_v9, %v244_v23  ;;  %v489_v31 = vunpack.c.l.bf16 %v544_v25 }
  0x17   : > { %345 = vxpose.xlu1.b32.start [1/16] %v297_v16, 128  ;;  %v300_v32 = vadd.f32 %v622_v9, %v261_v26  ;;  %v522_v33 = vunpack.c.h.bf16 %v552_v24  ;;  %v284_v34 = vadd.f32 %v622_v9, %v245_v27  ;;  %v262_v35 = vmul.f32 %v521_v30, %v613_v0 }
  0x18   : > { %313 = vxpose.xlu0.b32.start [1/16] %v281_v17, 128  ;;  %v246_v36 = vmul.f32 %v489_v31, %v613_v0  ;;  %v490_v37 = vunpack.c.h.bf16 %v544_v25  ;;  %v525_v41 = vunpack.c.l.bf16 %v553_v38  ;;  %v493_v45 = vunpack.c.l.bf16 %v545_v39 }
  0x19   : > { %v263_v40 = vmul.f32 %v522_v33, %v613_v0  ;;  %v301_v42 = vadd.f32 %v622_v9, %v262_v35  ;;  %v526_v47 = vunpack.c.h.bf16 %v553_v38  ;;  %v494_v51 = vunpack.c.h.bf16 %v545_v39  ;;  %v549_v33 = vld [vmem:[%s608_s17 + $0x38] sm:$0xff]  }
  0x1a   : > { %v285_v43 = vadd.f32 %v622_v9, %v246_v36  ;;  %v247_v44 = vmul.f32 %v490_v37, %v613_v0  ;;  %v264_v46 = vmul.f32 %v525_v41, %v613_v0  ;;  %v248_v50 = vmul.f32 %v493_v45, %v613_v0 }
  0x1b   : > { %346 = vxpose.xlu1.b32.cont [2/16] %v298_v21, 128  ;;  %v302_v48 = vadd.f32 %v622_v9, %v263_v40  ;;  %v265_v54 = vmul.f32 %v526_v47, %v613_v0  ;;  %v529_v55 = vunpack.c.l.bf16 %v554_v52  ;;  %v249_v58 = vmul.f32 %v494_v51, %v613_v0 }
  0x1c   : > { %314 = vxpose.xlu0.b32.cont [2/16] %v282_v22, 128  ;;  %v286_v49 = vadd.f32 %v622_v9, %v247_v44  ;;  %v303_v56 = vadd.f32 %v622_v9, %v264_v46  ;;  %v287_v57 = vadd.f32 %v622_v9, %v248_v50  ;;  %v497_v59 = vunpack.c.l.bf16 %v546_v53 }
  0x1d   : > { %v304_v60 = vadd.f32 %v622_v9, %v265_v54  ;;  %v266_v61 = vmul.f32 %v529_v55, %v613_v0  ;;  %v288_v62 = vadd.f32 %v622_v9, %v249_v58  ;;  %v530_v1 = vunpack.c.h.bf16 %v554_v52 }
  0x1e   : > { %v250_v63 = vmul.f32 %v497_v59, %v613_v0  ;;  %v498_v2 = vunpack.c.h.bf16 %v546_v53  ;;  %v533_v6 = vunpack.c.l.bf16 %v555_v3  ;;  %v501_v11 = vunpack.c.l.bf16 %v547_v4 }
  0x1f   : > { %347 = vxpose.xlu1.b32.cont [3/16] %v299_v28, 128  ;;  %v305_v5 = vadd.f32 %v622_v9, %v266_v61  ;;  %v267_v8 = vmul.f32 %v530_v1, %v613_v0  ;;  %v534_v13 = vunpack.c.h.bf16 %v555_v3  ;;  %v502_v17 = vunpack.c.h.bf16 %v547_v4 }
  0x20   : > { %315 = vxpose.xlu0.b32.cont [3/16] %v283_v29, 128  ;;  %v289_v7 = vadd.f32 %v622_v9, %v250_v63  ;;  %v251_v10 = vmul.f32 %v498_v2, %v613_v0  ;;  %v268_v12 = vmul.f32 %v533_v6, %v613_v0  ;;  %v252_v16 = vmul.f32 %v501_v11, %v613_v0 }
  0x21   : > { %v306_v14 = vadd.f32 %v622_v9, %v267_v8  ;;  %v269_v20 = vmul.f32 %v534_v13, %v613_v0  ;;  %v537_v21 = vunpack.c.l.bf16 %v556_v18  ;;  %v253_v24 = vmul.f32 %v502_v17, %v613_v0 }
  0x22   : > { %v290_v15 = vadd.f32 %v622_v9, %v251_v10  ;;  %v307_v22 = vadd.f32 %v622_v9, %v268_v12  ;;  %v291_v23 = vadd.f32 %v622_v9, %v252_v16  ;;  %v505_v25 = vunpack.c.l.bf16 %v548_v19 }
  0x23   : > { %348 = vxpose.xlu1.b32.cont [4/16] %v300_v32, 128  ;;  %v308_v26 = vadd.f32 %v622_v9, %v269_v20  ;;  %v270_v27 = vmul.f32 %v537_v21, %v613_v0  ;;  %v292_v28 = vadd.f32 %v622_v9, %v253_v24  ;;  %v538_v30 = vunpack.c.h.bf16 %v556_v18  ;;  %v557_v32 = vld [vmem:[%s608_s17 + $0x78] sm:$0xff]  }
  0x24   : > { %316 = vxpose.xlu0.b32.cont [4/16] %v284_v34, 128  ;;  %v254_v29 = vmul.f32 %v505_v25, %v613_v0  ;;  %v506_v31 = vunpack.c.h.bf16 %v548_v19  ;;  %v541_v35 = vunpack.c.l.bf16 %v557_v32  ;;  %v509_v39 = vunpack.c.l.bf16 %v549_v33 }
  0x25   : > { %v309_v34 = vadd.f32 %v622_v9, %v270_v27  ;;  %v271_v37 = vmul.f32 %v538_v30, %v613_v0  ;;  %v542_v41 = vunpack.c.h.bf16 %v557_v32  ;;  %v510_v45 = vunpack.c.h.bf16 %v549_v33 }
  0x26   : > { %v293_v36 = vadd.f32 %v622_v9, %v254_v29  ;;  %v255_v38 = vmul.f32 %v506_v31, %v613_v0  ;;  %v272_v40 = vmul.f32 %v541_v35, %v613_v0  ;;  %v256_v44 = vmul.f32 %v509_v39, %v613_v0 }
  0x27   : > { %349 = vxpose.xlu1.b32.cont [5/16] %v301_v42, 128  ;;  %v310_v42 = vadd.f32 %v622_v9, %v271_v37  ;;  %v273_v46 = vmul.f32 %v542_v41, %v613_v0 }
  0x28   : > { %317 = vxpose.xlu0.b32.cont [5/16] %v285_v43, 128  ;;  %v294_v43 = vadd.f32 %v622_v9, %v255_v38  ;;  %v311_v47 = vadd.f32 %v622_v9, %v272_v40 }
  0x29   : > { %v312_v50 = vadd.f32 %v622_v9, %v273_v46 }
  0x2b   : > { %350 = vxpose.xlu1.b32.cont [6/16] %v302_v48, 128  ;;  %v295_v48 = vadd.f32 %v622_v9, %v256_v44 }
  0x2c   : > { %318 = vxpose.xlu0.b32.cont [6/16] %v286_v49, 128  ;;  %v257_v49 = vmul.f32 %v510_v45, %v613_v0 }
  0x2e   : > { %v296_v51 = vadd.f32 %v622_v9, %v257_v49 }
  0x2f   : > { %351 = vxpose.xlu1.b32.cont [7/16] %v303_v56, 128 }
  0x30   : > { %319 = vxpose.xlu0.b32.cont [7/16] %v287_v57, 128 }
  0x33   : > { %352 = vxpose.xlu1.b32.cont [8/16] %v304_v60, 128 }
  0x34   : > { %320 = vxpose.xlu0.b32.cont [8/16] %v288_v62, 128 }
  0x37   : > { %353 = vxpose.xlu1.b32.cont [9/16] %v305_v5, 128 }
  0x38   : > { %321 = vxpose.xlu0.b32.cont [9/16] %v289_v7, 128 }
  0x3b   : > { %354 = vxpose.xlu1.b32.cont [10/16] %v306_v14, 128 }
  0x3c   : > { %322 = vxpose.xlu0.b32.cont [10/16] %v290_v15, 128 }
  0x3f   : > { %355 = vxpose.xlu1.b32.cont [11/16] %v307_v22, 128 }
  0x40   : > { %323 = vxpose.xlu0.b32.cont [11/16] %v291_v23, 128 }
  0x43   : > { %356 = vxpose.xlu1.b32.cont [12/16] %v308_v26, 128 }
  0x44   : > { %324 = vxpose.xlu0.b32.cont [12/16] %v292_v28, 128 }
  0x47   : > { %357 = vxpose.xlu1.b32.cont [13/16] %v309_v34, 128 }
  0x48   : > { %325 = vxpose.xlu0.b32.cont [13/16] %v293_v36, 128 }
  0x4b   : > { %358 = vxpose.xlu1.b32.cont [14/16] %v310_v42, 128 }
  0x4c   : > { %326 = vxpose.xlu0.b32.cont [14/16] %v294_v43, 128 }
  0x4f   : > { %359 = vxpose.xlu1.b32.cont [15/16] %v311_v47, 128 }
  0x50   : > { %327 = vxpose.xlu0.b32.cont [15/16] %v295_v48, 128 }
  0x53   : > { %360 = vxpose.xlu1.b32.end [16/16] %v312_v50, 128 }
  0x54   : > { %328 = vxpose.xlu0.b32.end [16/16] %v296_v51, 128 }
  0x97   : > { %v361_v0 = vpop.trf.xlu1 }
  0x98   : > { %v329_v52 = vpop.trf.xlu0  ;;  %378 = vst [vmem:[%s704_s25 + $0x8] sm:$0xff] %v361_v0 }
  0x99   : > { %377 = vst [vmem:[%s704_s25] sm:$0xff] %v329_v52 }
  0x9b   : > { %v362_v9 = vpop.trf.xlu1 }
  0x9c   : > { %v330_v53 = vpop.trf.xlu0  ;;  %380 = vst [vmem:[%s704_s25 + $0x18] sm:$0xff] %v362_v9 }
  0x9d   : > { %379 = vst [vmem:[%s704_s25 + $0x10] sm:$0xff] %v330_v53 }
  0x9f   : > { %v363_v54 = vpop.trf.xlu1 }
  0xa0   : > { %v331_v55 = vpop.trf.xlu0  ;;  %382 = vst [vmem:[%s704_s25 + $0x28] sm:$0xff] %v363_v54 }
  0xa1   : > { %381 = vst [vmem:[%s704_s25 + $0x20] sm:$0xff] %v331_v55 }
  0xa3   : > { %v364_v56 = vpop.trf.xlu1 }
  0xa4   : > { %v332_v57 = vpop.trf.xlu0  ;;  %384 = vst [vmem:[%s704_s25 + $0x38] sm:$0xff] %v364_v56 }
  0xa5   : > { %383 = vst [vmem:[%s704_s25 + $0x30] sm:$0xff] %v332_v57 }
  0xa7   : > { %v365_v58 = vpop.trf.xlu1 }
  0xa8   : > { %v333_v59 = vpop.trf.xlu0  ;;  %386 = vst [vmem:[%s704_s25 + $0x48] sm:$0xff] %v365_v58 }
  0xa9   : > { %385 = vst [vmem:[%s704_s25 + $0x40] sm:$0xff] %v333_v59 }
  0xab   : > { %v366_v60 = vpop.trf.xlu1 }
  0xac   : > { %v334_v61 = vpop.trf.xlu0  ;;  %388 = vst [vmem:[%s704_s25 + $0x58] sm:$0xff] %v366_v60 }
  0xad   : > { %387 = vst [vmem:[%s704_s25 + $0x50] sm:$0xff] %v334_v61 }
  0xaf   : > { %v367_v62 = vpop.trf.xlu1 }
  0xb0   : > { %v335_v63 = vpop.trf.xlu0  ;;  %390 = vst [vmem:[%s704_s25 + $0x68] sm:$0xff] %v367_v62 }
  0xb1   : > { %389 = vst [vmem:[%s704_s25 + $0x60] sm:$0xff] %v335_v63 }
  0xb3   : > { %v368_v1 = vpop.trf.xlu1 }
  0xb4   : > { %v336_v2 = vpop.trf.xlu0  ;;  %392 = vst [vmem:[%s704_s25 + $0x78] sm:$0xff] %v368_v1 }
  0xb5   : > { %391 = vst [vmem:[%s704_s25 + $0x70] sm:$0xff] %v336_v2 }
  0xb7   : > { %v369_v3 = vpop.trf.xlu1 }
  0xb8   : > { %v337_v4 = vpop.trf.xlu0  ;;  %394 = vst [vmem:[%s704_s25 + $0x88] sm:$0xff] %v369_v3 }
  0xb9   : > { %393 = vst [vmem:[%s704_s25 + $0x80] sm:$0xff] %v337_v4 }
  0xbb   : > { %v370_v5 = vpop.trf.xlu1 }
  0xbc   : > { %v338_v6 = vpop.trf.xlu0  ;;  %396 = vst [vmem:[%s704_s25 + $0x98] sm:$0xff] %v370_v5 }
  0xbd   : > { %395 = vst [vmem:[%s704_s25 + $0x90] sm:$0xff] %v338_v6 }
  0xbf   : > { %v371_v7 = vpop.trf.xlu1 }
  0xc0   : > { %v339_v8 = vpop.trf.xlu0  ;;  %398 = vst [vmem:[%s704_s25 + $0xa8] sm:$0xff] %v371_v7 }
  0xc1   : > { %397 = vst [vmem:[%s704_s25 + $0xa0] sm:$0xff] %v339_v8 }
  0xc3   : > { %v372_v10 = vpop.trf.xlu1 }
  0xc4   : > { %v340_v11 = vpop.trf.xlu0  ;;  %400 = vst [vmem:[%s704_s25 + $0xb8] sm:$0xff] %v372_v10 }
  0xc5   : > { %399 = vst [vmem:[%s704_s25 + $0xb0] sm:$0xff] %v340_v11 }
  0xc7   : > { %v373_v12 = vpop.trf.xlu1 }
  0xc8   : > { %v341_v13 = vpop.trf.xlu0  ;;  %402 = vst [vmem:[%s704_s25 + $0xc8] sm:$0xff] %v373_v12 }
  0xc9   : > { %401 = vst [vmem:[%s704_s25 + $0xc0] sm:$0xff] %v341_v13 }
  0xcb   : > { %v374_v14 = vpop.trf.xlu1 }
  0xcc   : > { %v342_v15 = vpop.trf.xlu0  ;;  %404 = vst [vmem:[%s704_s25 + $0xd8] sm:$0xff] %v374_v14 }
  0xcd   : > { %403 = vst [vmem:[%s704_s25 + $0xd0] sm:$0xff] %v342_v15 }
  0xcf   : > { %v375_v16 = vpop.trf.xlu1 }
  0xd0   : > { %v343_v17 = vpop.trf.xlu0  ;;  %406 = vst [vmem:[%s704_s25 + $0xe8] sm:$0xff] %v375_v16 }
  0xd1   : > { %405 = vst [vmem:[%s704_s25 + $0xe0] sm:$0xff] %v343_v17 }
  0xd3   : > { %v376_v18 = vpop.trf.xlu1 }
  0xd4   : > { %v344_v19 = vpop.trf.xlu0  ;;  %408 = vst [vmem:[%s704_s25 + $0xf8] sm:$0xff] %v376_v18 }
  0xd5   : > { %407 = vst [vmem:[%s704_s25 + $0xf0] sm:$0xff] %v344_v19 }
  0xd6 PF: > { %s13_s12 = sadd.s32 1, %s572_s12  }
  0xd7   : > { %p10_p4 = scmp.ge.s32.totalorder %s13_s12, 4  }
  0xd9   :  { %12 = sbr.rel (!%p10_p4) target bundleno = 1 (0x1), region = 62 }

// kernel: wsdilconv_forward.2
= control target key start
LH: loop header
LB: loop body
LE: loop exit
PB: predicated region body
PF: predicated region fallthrough
CT: control target
= control target key end

     0   :  { %s6067_s12 = smov 0   ;;  %s7385_s0 = inlined_call_operand.vmem [shape: f32[2,128,256], index: 0, kind: input, shape index: {}]   ;;  %s7386_s1 = inlined_call_operand.vmem [shape: bf16[1152,128], index: 1, kind: input, shape index: {}]   ;;  %s7387_s2 = inlined_call_operand.vmem [shape: bf16[2,256,128], index: 2, kind: output, shape index: {0}]   ;;  %s7388_s3 = inlined_call_operand.vmem [shape: f32[2,2,128], index: 3, kind: output, shape index: {1}]  }
   0x1 LB: > { %s4711_s13 = sadd.s32 4294967295, %s6044_s12   ;;  %p4715_p0 = scmp.ge.s32.totalorder %s6044_s12, 1  ;;  %s6044_s12 = sphi %s6067_s12, %s14_s12  }
   0x2   : > { %p140_p1 = scmp.lt.s32.totalorder %s6044_s12, 3 }
   0x4   : > { %p141_p2 = pnand %p4715_p0, %p140_p1 }
   0x5   : > { %p168_p3 = scmp.lt.s32.totalorder (!%p141_p2), %s4711_s13, 1  ;;  %v5917_v0 = vld [vmem:[%s7386_s1 + $0x40] sm:$0xff] (!%p141_p2)   ;;  %v5919_v2 = vld [vmem:[%s7386_s1 + $0x48] sm:$0xff] (!%p141_p2)   ;;  %v5921_v4 = vld [vmem:[%s7386_s1 + $0x50] sm:$0xff] (!%p141_p2)   ;;  %v6046_v12 = vmov (!%p141_p2), 0   ;;  %vm872_vm0 = vcmask (!%p141_p2), 1042432  }
   0x6   : > { %144 = sbr.rel (%p141_p2) target bundleno = 804 (0x324), region = 28  ;;  %v5918_v1 = vld [vmem:[%s7386_s1] sm:$0xff] (!%p141_p2)   ;;  %5260 = vmatprep.subr.bf16.mxu0 (!%p141_p2), %v5917_v0  ;;  %5780 = vmatprep.subr.bf16.mxu1 (!%p141_p2), %v5917_v0  ;;  %v5920_v3 = vld [vmem:[%s7386_s1 + $0x8] sm:$0xff] (!%p141_p2)   ;;  %v5922_v10 = vld [vmem:[%s7386_s1 + $0x10] sm:$0xff] (!%p141_p2)   ;;  %587 = vst [vmem:[#allocation2] sm:$0xf] (!%p141_p2), %v6046_v12 }
   0x7   : > { %5261 = vmatpush3.bf16.msra.mxu0 (!%p141_p2), %v5918_v1  ;;  %5788 = vmatpush3.bf16.msra.mxu1 (!%p141_p2), %v5918_v1  ;;  %588 = vst [vmem:[#allocation2 + $0x4] sm:$0xf] (!%p141_p2), %v6046_v12  ;;  %589 = vst [vmem:[#allocation2 + $0x8] sm:$0x3] (!%p141_p2), %v6046_v12  ;;  %v5923_v21 = vld [vmem:[%s7386_s1 + $0x58] sm:$0xff] (!%p141_p2)   ;;  %v5925_v23 = vld [vmem:[%s7386_s1 + $0x60] sm:$0xff] (!%p141_p2)  }
   0x8   : > { %5262 = vmatprep.subr.bf16.mxu0 (!%p141_p2), %v5919_v2  ;;  %5781 = vmatprep.subr.bf16.mxu1 (!%p141_p2), %v5919_v2  ;;  %590 = vst [vmem:[#allocation2 + $0xc] sm:$0xf] (!%p141_p2), %v6046_v12  ;;  %591 = vst [vmem:[#allocation2 + $0x10] sm:$0xf] (!%p141_p2), %v6046_v12  ;;  %v5924_v22 = vld [vmem:[%s7386_s1 + $0x18] sm:$0xff] (!%p141_p2)   ;;  %v5926_v24 = vld [vmem:[%s7386_s1 + $0x20] sm:$0xff] (!%p141_p2)  }
   0x9   : > { %592 = vst [vmem:[#allocation2 + $0x14] sm:$0x3] (!%p141_p2), %v6046_v12  ;;  %594 = vst [vmem:[#allocation2 + $0xd8] sm:$0xf] (!%p141_p2), %v6046_v12  ;;  %v5927_v26 = vld [vmem:[%s7386_s1 + $0x68] sm:$0xff] (!%p141_p2)   ;;  %v5929_v33 = vld [vmem:[%s7386_s1 + $0x70] sm:$0xff] (!%p141_p2)  }
   0xa   : > { %595 = vst [vmem:[#allocation2 + $0xdc] sm:$0xf] (!%p141_p2), %v6046_v12  ;;  %596 = vst [vmem:[#allocation2 + $0xe0] sm:$0x3] (!%p141_p2), %v6046_v12  ;;  %v5928_v31 = vld [vmem:[%s7386_s1 + $0x28] sm:$0xff] (!%p141_p2)   ;;  %vm873_vm1 = vcmask (!%p141_p2), 1046532  }
   0xb   : > { %5263 = vmatpush3.bf16.msra.mxu0 (!%p141_p2), %v5920_v3  ;;  %5789 = vmatpush3.bf16.msra.mxu1 (!%p141_p2), %v5920_v3  ;;  %597 = vst [vmem:[#allocation2 + $0xe4] sm:$0xf] (!%p141_p2), %v6046_v12  ;;  %598 = vst [vmem:[#allocation2 + $0xe8] sm:$0xf] (!%p141_p2), %v6046_v12  ;;  %v5930_v34 = vld [vmem:[%s7386_s1 + $0x30] sm:$0xff] (!%p141_p2)   ;;  %v5931_v39 = vld [vmem:[%s7386_s1 + $0x78] sm:$0xff] (!%p141_p2)  }
   0xc   : > { %5264 = vmatprep.subr.bf16.mxu0 (!%p141_p2), %v5921_v4  ;;  %5782 = vmatprep.subr.bf16.mxu1 (!%p141_p2), %v5921_v4  ;;  %599 = vst [vmem:[#allocation2 + $0xec] sm:$0x3] (!%p141_p2), %v6046_v12  ;;  %600 = vst [vmem:[#allocation2 + $0x18] sm:$0x1] (!%p141_p2), %v6046_v12  ;;  %v5932_v56 = vld [vmem:[%s7386_s1 + $0x38] sm:$0xff] (!%p141_p2)   ;;  %vm407_vm3 = vcmask (!%p141_p2), 1040384  }
   0xd   : > { %s7396_s13 = smov (!%p168_p3, %s4711_s13), 1  ;;  %601 = vst [vmem:[#allocation2 + $0x24] sm:$0x1] %v6046_v12  ;;  %602 = vst [vmem:[#allocation2 + $0x30] sm:$0x1] %v6046_v12  ;;  %vm408_vm4 = vcmask 1044484  }
   0xe   : > { %s5099_s22 = sshll.u32 %s7396_s13, 8  ;;  %603 = vst [vmem:[#allocation2 + $0x3c] sm:$0x1] %v6046_v12  ;;  %604 = vst [vmem:[#allocation2 + $0x48] sm:$0x1] %v6046_v12  ;;  %v5933_v61 = vld [vmem:[#allocation2] sm:$0xff]  }
   0xf   : > { %s6096_s27 = scalar_lea.vmem %s7385_s0, %s5099_s22  ;;  %605 = vst [vmem:[#allocation2 + $0x54] sm:$0x1] %v6046_v12  ;;  %606 = vst [vmem:[#allocation2 + $0x60] sm:$0x1] %v6046_v12  ;;  %5265 = vmatpush3.bf16.msra.mxu0 %v5922_v10  ;;  %5790 = vmatpush3.bf16.msra.mxu1 %v5922_v10  ;;  %v776_v35 = vld [vmem:[#allocation2] sm:$0xe] }
  0x10   : > { %v183_v5 = vld [vmem:[%s6096_s27] sm:$0xff]  ;;  %v184_v6 = vld [vmem:[%s6096_s27 + $0x8] sm:$0xff]  ;;  %v185_v7 = vld [vmem:[%s6096_s27 + $0x10] sm:$0xff]  ;;  %607 = vst [vmem:[#allocation2 + $0x6c] sm:$0x1] %v6046_v12  ;;  %5266 = vmatprep.subr.bf16.mxu0 %v5923_v21  ;;  %5783 = vmatprep.subr.bf16.mxu1 %v5923_v21  ;;  %v4769_v41 = vrot.slane %v776_v35, 9 }
  0x11   : > { %v5805_v8 = vpack.i.bf16 %v183_v5, %v184_v6  ;;  %v186_v9 = vld [vmem:[%s6096_s27 + $0x18] sm:$0xff]  ;;  %608 = vst [vmem:[#allocation2 + $0x78] sm:$0x1] %v6046_v12  ;;  %609 = vst [vmem:[#allocation2 + $0x84] sm:$0x1] %v6046_v12  ;;  %v187_v13 = vld [vmem:[%s6096_s27 + $0x20] sm:$0xff] }
  0x12   : > { %v5807_v11 = vpack.i.bf16 %v185_v7, %v186_v9  ;;  %610 = vst [vmem:[#allocation2 + $0x90] sm:$0x1] %v6046_v12  ;;  %611 = vst [vmem:[#allocation2 + $0x9c] sm:$0x1] %v6046_v12  ;;  %v188_v14 = vld [vmem:[%s6096_s27 + $0x28] sm:$0xff]  ;;  %v189_v16 = vld [vmem:[%s6096_s27 + $0x30] sm:$0xff] }
  0x13   : > { %5806 = vxpose.xlu0.b32.start [1/16] %v5805_v8, 128  ;;  %612 = vst [vmem:[#allocation2 + $0xa8] sm:$0x1] %v6046_v12  ;;  %613 = vst [vmem:[#allocation2 + $0xb4] sm:$0x1] %v6046_v12  ;;  %v5809_v15 = vpack.i.bf16 %v187_v13, %v188_v14  ;;  %v190_v17 = vld [vmem:[%s6096_s27 + $0x38] sm:$0xff]  ;;  %v191_v18 = vld [vmem:[%s6096_s27 + $0x40] sm:$0xff]  ;;  %5267 = vmatpush3.bf16.msra.mxu0 %v5924_v22 }
  0x14   : > { %614 = vst [vmem:[#allocation2 + $0xc0] sm:$0x1] %v6046_v12  ;;  %615 = vst [vmem:[#allocation2 + $0xcc] sm:$0x1] %v6046_v12  ;;  %v192_v19 = vld [vmem:[%s6096_s27 + $0x48] sm:$0xff]  ;;  %v5811_v20 = vpack.i.bf16 %v189_v16, %v190_v17  ;;  %5791 = vmatpush3.bf16.msra.mxu1 %v5924_v22  ;;  %5268 = vmatprep.subr.bf16.mxu0 %v5925_v23  ;;  %v193_v27 = vld [vmem:[%s6096_s27 + $0x50] sm:$0xff] }
  0x15   : > { %616 = vst [vmem:[#allocation2 + $0x20] sm:$0x2] %v6046_v12  ;;  %617 = vst [vmem:[#allocation2 + $0x2c] sm:$0x2] %v6046_v12  ;;  %v5813_v25 = vpack.i.bf16 %v191_v18, %v192_v19  ;;  %v194_v28 = vld [vmem:[%s6096_s27 + $0x58] sm:$0xff]  ;;  %5784 = vmatprep.subr.bf16.mxu1 %v5925_v23  ;;  %v195_v29 = vld [vmem:[%s6096_s27 + $0x60] sm:$0xff] }
  0x16   : > { %618 = vst [vmem:[#allocation2 + $0x38] sm:$0x2] %v6046_v12  ;;  %619 = vst [vmem:[#allocation2 + $0x44] sm:$0x2] %v6046_v12  ;;  %v196_v30 = vld [vmem:[%s6096_s27 + $0x68] sm:$0xff]  ;;  %v5815_v32 = vpack.i.bf16 %v193_v27, %v194_v28  ;;  %v197_v38 = vld [vmem:[%s6096_s27 + $0x70] sm:$0xff] }
  0x17   : > { %620 = vst [vmem:[#allocation2 + $0x50] sm:$0x2] %v6046_v12  ;;  %621 = vst [vmem:[#allocation2 + $0x5c] sm:$0x2] %v6046_v12  ;;  %5808 = vxpose.xlu0.b32.cont [2/16] %v5807_v11, 128  ;;  %5269 = vmatpush3.bf16.msra.mxu0 %v5926_v24  ;;  %v777_v36 = vld [vmem:[#allocation2 + $0x4] sm:$0xf]  ;;  %v5817_v44 = vpack.i.bf16 %v195_v29, %v196_v30 }
  0x18   : > { %622 = vst [vmem:[#allocation2 + $0x68] sm:$0x2] %v6046_v12  ;;  %623 = vst [vmem:[#allocation2 + $0x74] sm:$0x2] %v6046_v12  ;;  %5792 = vmatpush3.bf16.msra.mxu1 %v5926_v24  ;;  %5270 = vmatprep.subr.bf16.mxu0 %v5927_v26  ;;  %v778_v37 = vld [vmem:[#allocation2 + $0x8] sm:$0x1] }
  0x19   : > { %624 = vst [vmem:[#allocation2 + $0x80] sm:$0x2] %v6046_v12  ;;  %625 = vst [vmem:[#allocation2 + $0x8c] sm:$0x2] %v6046_v12  ;;  %5785 = vmatprep.subr.bf16.mxu1 %v5927_v26  ;;  %v877_v42 = vrot.slane %v777_v36, 5  ;;  %v880_v43 = vrot.slane %v778_v37, 5 }
  0x1a   : > { %626 = vst [vmem:[#allocation2 + $0x98] sm:$0x2] %v6046_v12  ;;  %627 = vst [vmem:[#allocation2 + $0xa4] sm:$0x2] %v6046_v12  ;;  %v779_v45 = vld [vmem:[#allocation2 + $0xc] sm:$0xe] }
  0x1b   : > { %628 = vst [vmem:[#allocation2 + $0xb0] sm:$0x2] %v6046_v12  ;;  %629 = vst [vmem:[#allocation2 + $0xbc] sm:$0x2] %v6046_v12  ;;  %5810 = vxpose.xlu0.b32.cont [3/16] %v5809_v15, 128  ;;  %5271 = vmatpush3.bf16.msra.mxu0 %v5928_v31  ;;  %v780_v46 = vld [vmem:[#allocation2 + $0x10] sm:$0xf] }
  0x1c   : > { %630 = vst [vmem:[#allocation2 + $0xc8] sm:$0x2] %v6046_v12  ;;  %631 = vst [vmem:[#allocation2 + $0xd4] sm:$0x2] %v6046_v12  ;;  %5793 = vmatpush3.bf16.msra.mxu1 %v5928_v31  ;;  %5272 = vmatprep.subr.bf16.mxu0 %v5929_v33  ;;  %v198_v47 = vld [vmem:[%s6096_s27 + $0x78] sm:$0xff]  ;;  %v879_v49 = vrot.slane %v877_v42, 4 }
  0x1d   : > { %vm6144_vm2 = vmor %vm872_vm0, %vm873_vm1  ;;  %v781_v50 = vld [vmem:[#allocation2 + $0x14] sm:$0x1]  ;;  %v4770_v51 = vrot.slane %v779_v45, 9  ;;  %v884_v52 = vrot.slane %v780_v46, 5  ;;  %5786 = vmatprep.subr.bf16.mxu1 %v5929_v33  ;;  %v199_v54 = vld [vmem:[%s6096_s27 + $0x80] sm:$0xff]  ;;  %v5819_v59 = vpack.i.bf16 %v197_v38, %v198_v47  ;;  %vm1163_vm6 = vcmask 1041408  }
  0x1e   : > { %v878_v48 = vsel %vm6144_vm2, %v4769_v41, %v877_v42  ;;  %v887_v53 = vrot.slane %v781_v50, 5  ;;  %v200_v55 = vld [vmem:[%s6096_s27 + $0x88] sm:$0xff]  ;;  %v881_v57 = vsel %vm6144_vm2, %v879_v49, %v880_v43  ;;  %v201_v0 = vld [vmem:[%s6096_s27 + $0x90] sm:$0xff]  ;;  %v202_v1 = vld [vmem:[%s6096_s27 + $0x98] sm:$0xff]  ;;  %vm1164_vm7 = vcmask 1045508   ;;  %s5100_s14 = sshll.u32 %s7396_s13, 7 }
  0x1f   : > { %5812 = vxpose.xlu0.b32.cont [4/16] %v5811_v20, 128  ;;  %5273 = vmatpush3.bf16.msra.mxu0 %v5930_v34  ;;  %v886_v58 = vrot.slane %v884_v52, 4  ;;  %v4785_v60 = vcombine.low %v878_v48, %v881_v57  ;;  %v885_v62 = vsel %vm6144_vm2, %v4770_v51, %v884_v52  ;;  %v5821_v3 = vpack.i.bf16 %v199_v54, %v200_v55  ;;  %v203_v4 = vld [vmem:[%s6096_s27 + $0xa0] sm:$0xff]  ;;  %v204_v5 = vld [vmem:[%s6096_s27 + $0xa8] sm:$0xff]  ;;  %v205_v8 = vld [vmem:[%s6096_s27 + $0xb0] sm:$0xff]  ;;  %s7122_s17 = scalar_lea.vmem %s7387_s2, %s5100_s14  ;;  %s4720_s18 = sshll.u32 %s7396_s13, 1 }
  0x20   : > { %5794 = vmatpush3.bf16.msra.mxu1 %v5930_v34  ;;  %5274 = vmatprep.subr.bf16.mxu0 %v5931_v39  ;;  %v5823_v6 = vpack.i.bf16 %v201_v0, %v202_v1  ;;  %v5934_v7 = vld [vmem:[#allocation2 + $0xc] sm:$0xff]   ;;  %v206_v9 = vld [vmem:[%s6096_s27 + $0xb8] sm:$0xff]  ;;  %v5825_v10 = vpack.i.bf16 %v203_v4, %v204_v5  ;;  %v207_v11 = vld [vmem:[%s6096_s27 + $0xc0] sm:$0xff]  ;;  %s7271_s21 = scalar_lea.vmem %s7388_s3, %s4720_s18 }
  0x21   : > { %v888_v63 = vsel %vm6144_vm2, %v886_v58, %v887_v53  ;;  %5787 = vmatprep.subr.bf16.mxu1 %v5931_v39  ;;  %3551 = vmatprep.mubr.bf16.mxu0 %v4785_v60  ;;  %v5827_v12 = vpack.i.bf16 %v205_v8, %v206_v9  ;;  %v208_v13 = vld [vmem:[%s6096_s27 + $0xc8] sm:$0xff]  ;;  %v209_v14 = vld [vmem:[%s6096_s27 + $0xd0] sm:$0xff]  ;;  %v210_v15 = vld [vmem:[%s6096_s27 + $0xd8] sm:$0xff] }
  0x22   : > { %v4786_v2 = vcombine.low %v885_v62, %v888_v63  ;;  %v5829_v16 = vpack.i.bf16 %v207_v11, %v208_v13  ;;  %v211_v17 = vld [vmem:[%s6096_s27 + $0xe0] sm:$0xff]  ;;  %v212_v18 = vld [vmem:[%s6096_s27 + $0xe8] sm:$0xff]  ;;  %v5831_v19 = vpack.i.bf16 %v209_v14, %v210_v15  ;;  %v213_v20 = vld [vmem:[%s6096_s27 + $0xf0] sm:$0xff] }
  0x23   : > { %5814 = vxpose.xlu0.b32.cont [5/16] %v5813_v25, 128  ;;  %5275 = vmatpush3.bf16.msra.mxu0 %v5932_v56  ;;  %v214_v21 = vld [vmem:[%s6096_s27 + $0xf8] sm:$0xff]  ;;  %v5833_v22 = vpack.i.bf16 %v211_v17, %v212_v18  ;;  %v5937_v23 = vld [vmem:[%s7386_s1 + $0xc0] sm:$0xff]   ;;  %v5950_v27 = vld [vmem:[%s7386_s1 + $0x148] sm:$0xff]  }
  0x24   : > { %5795 = vmatpush3.bf16.msra.mxu1 %v5932_v56  ;;  %v5835_v24 = vpack.i.bf16 %v213_v20, %v214_v21  ;;  %v5938_v25 = vld [vmem:[%s7386_s1 + $0x140] sm:$0xff]   ;;  %v5952_v28 = vld [vmem:[%s7386_s1 + $0x108] sm:$0xff]   ;;  %v5960_v29 = vld [vmem:[%s7386_s1 + $0x150] sm:$0xff]  }
  0x25   : > { %5372 = vmatprep.subr.bf16.mxu1 %v5937_v23  ;;  %v5942_v26 = vld [vmem:[%s7386_s1 + $0x100] sm:$0xff]   ;;  %5484 = vmatprep.subr.bf16.mxu0 %v5938_v25  ;;  %v5964_v30 = vld [vmem:[%s7386_s1 + $0x110] sm:$0xff]   ;;  %v5972_v31 = vld [vmem:[%s7386_s1 + $0x158] sm:$0xff]  }
  0x26   : > { %3552 = vmatmul.mubr.bf16.vlgmr.msra.gmra.mrb[0].mxu0 %v5933_v61  ;;  %v5976_v33 = vld [vmem:[%s7386_s1 + $0x160] sm:$0xff]   ;;  %v5982_v35 = vld [vmem:[%s7386_s1 + $0x168] sm:$0xff]   ;;  %v5985_v37 = vld [vmem:[%s7386_s1 + $0x170] sm:$0xff]  }
  0x27   : > { %5816 = vxpose.xlu0.b32.cont [6/16] %v5815_v32, 128  ;;  %3559 = vmatprep.mubr.bf16.mxu0 %v4786_v2  ;;  %v5973_v32 = vld [vmem:[%s7386_s1 + $0x118] sm:$0xff]   ;;  %v5979_v34 = vld [vmem:[%s7386_s1 + $0x120] sm:$0xff]   ;;  %v5983_v36 = vld [vmem:[%s7386_s1 + $0x128] sm:$0xff]  }
  0x28   : > { %5485 = vmatpush3.bf16.msra.mxu0 %v5942_v26  ;;  %v5987_v38 = vld [vmem:[%s7386_s1 + $0x130] sm:$0xff]   ;;  %v5988_v39 = vld [vmem:[%s7386_s1 + $0x178] sm:$0xff]   ;;  %vm6227_vm5 = vmor %vm407_vm3, %vm408_vm4 }
  0x29   : > { %5486 = vmatprep.subr.bf16.mxu0 %v5950_v27  ;;  %v5989_v41 = vld [vmem:[%s7386_s1 + $0x138] sm:$0xff]   ;;  %vm6374_vm8 = vmor %vm1163_vm6, %vm1164_vm7 }
  0x2b   : > { %5818 = vxpose.xlu0.b32.cont [7/16] %v5817_v44, 128 }
  0x2c   : > { %5487 = vmatpush3.bf16.msra.mxu0 %v5952_v28 }
  0x2d   : > { %5488 = vmatprep.subr.bf16.mxu0 %v5960_v29 }
  0x2e   : > { %3560 = vmatmul.mubr.bf16.gmra.mrb[4].mxu0 %v5934_v7 }
  0x2f   : > { %5820 = vxpose.xlu0.b32.cont [8/16] %v5819_v59, 128 }
  0x30   : > { %5489 = vmatpush3.bf16.msra.mxu0 %v5964_v30 }
  0x31   : > { %5490 = vmatprep.subr.bf16.mxu0 %v5972_v31 }
  0x33   : > { %5822 = vxpose.xlu0.b32.cont [9/16] %v5821_v3, 128 }
  0x34   : > { %5491 = vmatpush3.bf16.msra.mxu0 %v5973_v32 }
  0x35   : > { %5492 = vmatprep.subr.bf16.mxu0 %v5976_v33 }
  0x37   : > { %5824 = vxpose.xlu0.b32.cont [10/16] %v5823_v6, 128 }
  0x38   : > { %5493 = vmatpush3.bf16.msra.mxu0 %v5979_v34 }
  0x39   : > { %5494 = vmatprep.subr.bf16.mxu0 %v5982_v35 }
  0x3b   : > { %5826 = vxpose.xlu0.b32.cont [11/16] %v5825_v10, 128 }
  0x3c   : > { %5495 = vmatpush3.bf16.msra.mxu0 %v5983_v36 }
  0x3d   : > { %5496 = vmatprep.subr.bf16.mxu0 %v5985_v37 }
  0x3f   : > { %5828 = vxpose.xlu0.b32.cont [12/16] %v5827_v12, 128 }
  0x40   : > { %5497 = vmatpush3.bf16.msra.mxu0 %v5987_v38 }
  0x41   : > { %5498 = vmatprep.subr.bf16.mxu0 %v5988_v39 }
  0x43   : > { %5830 = vxpose.xlu0.b32.cont [13/16] %v5829_v16, 128 }
  0x44   : > { %5499 = vmatpush3.bf16.msra.mxu0 %v5989_v41 }
  0x47   : > { %5832 = vxpose.xlu0.b32.cont [14/16] %v5831_v19, 128 }
  0x4b   : > { %5834 = vxpose.xlu0.b32.cont [15/16] %v5833_v22, 128 }
  0x4f   : > { %5836 = vxpose.xlu0.b32.end [16/16] %v5835_v24, 128 }
  0x93   : > { %v5837_v42 = vpop.trf.xlu0 }
  0x94   : > { %v5841_v43 = vunpack.i.h.bf16 %v5837_v42  ;;  %v5838_v44 = vunpack.i.l.bf16 %v5837_v42 }
  0x96   : > { %v279_v45 = vmax.f32 %v5841_v43, 0.0  ;;  %v295_v46 = vmax.f32 %v5838_v44, 0.0 }
  0x97   : > { %v5842_v47 = vpop.trf.xlu0 }
  0x98   : > { %v5101_v48 = vpack.c.bf16 %v279_v45, %v279_v45  ;;  %v5117_v49 = vpack.c.bf16 %v295_v46, %v295_v46  ;;  %v5846_v50 = vunpack.i.h.bf16 %v5842_v47  ;;  %v5843_v51 = vunpack.i.l.bf16 %v5842_v47 }
  0x9a   : > { %v410_v52 = vrot.slane %v5101_v48, 7  ;;  %v450_v53 = vrot.slane %v5117_v49, 7  ;;  %v280_v54 = vmax.f32 %v5846_v50, 0.0  ;;  %v296_v55 = vmax.f32 %v5843_v51, 0.0 }
  0x9b   : > { %v5847_v56 = vpop.trf.xlu0 }
  0x9c   : > { %539 = vst [vmem:[#allocation2 + $0x18] sm:$0xe] %v410_v52  ;;  %563 = vst [vmem:[#allocation2 + $0x78] sm:$0xe] %v450_v53  ;;  %v5102_v57 = vpack.c.bf16 %v280_v54, %v280_v54  ;;  %v5851_v58 = vunpack.i.h.bf16 %v5847_v56  ;;  %v5118_v60 = vpack.c.bf16 %v296_v55, %v296_v55  ;;  %v5848_v61 = vunpack.i.l.bf16 %v5847_v56 }
  0x9d   : > { %v411_v62 = vrot.slane %v410_v52, 4  ;;  %v451_v1 = vrot.slane %v450_v53, 4 }
  0x9e   : > { %v412_v63 = vrot.slane %v5102_v57, 7  ;;  %v281_v0 = vmax.f32 %v5851_v58, 0.0  ;;  %v452_v2 = vrot.slane %v5118_v60, 7  ;;  %v297_v3 = vmax.f32 %v5848_v61, 0.0 }
  0x9f   : > { %v5852_v4 = vpop.trf.xlu0 }
  0xa0   : > { %v414_v5 = vrot.slane %v412_v63, 4  ;;  %v413_v6 = vsel %vm6227_vm5, %v411_v62, %v412_v63  ;;  %v5103_v7 = vpack.c.bf16 %v281_v0, %v281_v0  ;;  %v5856_v8 = vunpack.i.h.bf16 %v5852_v4 }
  0xa1   : > { %v453_v9 = vsel %vm6227_vm5, %v451_v1, %v452_v2  ;;  %v454_v10 = vrot.slane %v452_v2, 4  ;;  %540 = vst [vmem:[#allocation2 + $0x1c] sm:$0xf] %v413_v6  ;;  %v5119_v11 = vpack.c.bf16 %v297_v3, %v297_v3  ;;  %v5853_v14 = vunpack.i.l.bf16 %v5852_v4 }
  0xa2   : > { %541 = vst [vmem:[#allocation2 + $0x20] sm:$0x1] %v414_v5  ;;  %564 = vst [vmem:[#allocation2 + $0x7c] sm:$0xf] %v453_v9  ;;  %v415_v12 = vrot.slane %v5103_v7, 7  ;;  %v282_v13 = vmax.f32 %v5856_v8, 0.0 }
  0xa3   : > { %565 = vst [vmem:[#allocation2 + $0x80] sm:$0x1] %v454_v10  ;;  %v455_v15 = vrot.slane %v5119_v11, 7  ;;  %v5857_v16 = vpop.trf.xlu0  ;;  %v298_v18 = vmax.f32 %v5853_v14, 0.0  ;;  %v782_v28 = vld [vmem:[#allocation2 + $0x18] sm:$0xe] }
  0xa4   : > { %542 = vst [vmem:[#allocation2 + $0x24] sm:$0xe] %v415_v12  ;;  %v5104_v17 = vpack.c.bf16 %v282_v13, %v282_v13  ;;  %v5861_v19 = vunpack.i.h.bf16 %v5857_v16  ;;  %v5858_v20 = vunpack.i.l.bf16 %v5857_v16  ;;  %v416_v21 = vrot.slane %v415_v12, 4 }
  0xa5   : > { %566 = vst [vmem:[#allocation2 + $0x84] sm:$0xe] %v455_v15  ;;  %v5120_v23 = vpack.c.bf16 %v298_v18, %v298_v18  ;;  %v456_v25 = vrot.slane %v455_v15, 4  ;;  %v4771_v45 = vrot.slane %v782_v28, 9 }
  0xa6   : > { %v417_v22 = vrot.slane %v5104_v17, 7  ;;  %v283_v24 = vmax.f32 %v5861_v19, 0.0  ;;  %v299_v26 = vmax.f32 %v5858_v20, 0.0 }
  0xa7   : > { %v5862_v27 = vpop.trf.xlu0  ;;  %v457_v31 = vrot.slane %v5120_v23, 7 }
  0xa8   : > { %v419_v29 = vrot.slane %v417_v22, 4  ;;  %v418_v30 = vsel %vm6227_vm5, %v416_v21, %v417_v22  ;;  %v5105_v32 = vpack.c.bf16 %v283_v24, %v283_v24  ;;  %v783_v33 = vld [vmem:[#allocation2 + $0x1c] sm:$0xf]  ;;  %v5121_v34 = vpack.c.bf16 %v299_v26, %v299_v26 }
  0xa9   : > { %543 = vst [vmem:[#allocation2 + $0x28] sm:$0xf] %v418_v30  ;;  %v5866_v35 = vunpack.i.h.bf16 %v5862_v27  ;;  %v784_v36 = vld [vmem:[#allocation2 + $0x20] sm:$0x1]  ;;  %v458_v37 = vsel %vm6227_vm5, %v456_v25, %v457_v31  ;;  %v459_v38 = vrot.slane %v457_v31, 4  ;;  %v5863_v41 = vunpack.i.l.bf16 %v5862_v27  ;;  %v5935_v24 = vld [vmem:[#allocation2 + $0x18] sm:$0xff]  }
  0xaa   : > { %544 = vst [vmem:[#allocation2 + $0x2c] sm:$0x1] %v419_v29  ;;  %v420_v39 = vrot.slane %v5105_v32, 7  ;;  %567 = vst [vmem:[#allocation2 + $0x88] sm:$0xf] %v458_v37  ;;  %v460_v42 = vrot.slane %v5121_v34, 7 }
  0xab   : > { %v284_v43 = vmax.f32 %v5866_v35, 0.0  ;;  %v5867_v44 = vpop.trf.xlu0  ;;  %v891_v46 = vrot.slane %v783_v33, 5  ;;  %v785_v47 = vld [vmem:[#allocation2 + $0x24] sm:$0xe]  ;;  %568 = vst [vmem:[#allocation2 + $0x8c] sm:$0x1] %v459_v38 }
  0xac   : > { %545 = vst [vmem:[#allocation2 + $0x30] sm:$0xe] %v420_v39  ;;  %v300_v48 = vmax.f32 %v5863_v41, 0.0  ;;  %v5871_v49 = vunpack.i.h.bf16 %v5867_v44  ;;  %v894_v50 = vrot.slane %v784_v36, 5  ;;  %v421_v51 = vrot.slane %v420_v39, 4  ;;  %v5999_v34 = vld [vmem:[%s7386_s1 + $0x200] sm:$0xff]  }
  0xad   : > { %569 = vst [vmem:[#allocation2 + $0x90] sm:$0xe] %v460_v42  ;;  %v5106_v52 = vpack.c.bf16 %v284_v43, %v284_v43  ;;  %v5868_v53 = vunpack.i.l.bf16 %v5867_v44  ;;  %v461_v54 = vrot.slane %v460_v42, 4  ;;  %v892_v57 = vsel %vm6144_vm2, %v4771_v45, %v891_v46  ;;  %5732 = vmatprep.subr.bf16.mxu0 %v5999_v34 }
  0xae   : > { %v5122_v55 = vpack.c.bf16 %v300_v48, %v300_v48  ;;  %v285_v56 = vmax.f32 %v5871_v49, 0.0  ;;  %v893_v62 = vrot.slane %v891_v46, 4  ;;  %v4772_v63 = vrot.slane %v785_v47, 9 }
  0xaf   : > { %v422_v58 = vrot.slane %v5106_v52, 7  ;;  %v301_v60 = vmax.f32 %v5868_v53, 0.0  ;;  %v5872_v61 = vpop.trf.xlu0 }
  0xb0   : > { %v462_v0 = vrot.slane %v5122_v55, 7  ;;  %v5107_v1 = vpack.c.bf16 %v285_v56, %v285_v56  ;;  %v5876_v2 = vunpack.i.h.bf16 %v5872_v61  ;;  %v786_v3 = vld [vmem:[#allocation2 + $0x28] sm:$0xf]  ;;  %v5873_v12 = vunpack.i.l.bf16 %v5872_v61 }
  0xb1   : > { %v424_v4 = vrot.slane %v422_v58, 4  ;;  %v423_v5 = vsel %vm6227_vm5, %v421_v51, %v422_v58  ;;  %v5123_v6 = vpack.c.bf16 %v301_v60, %v301_v60  ;;  %v895_v13 = vsel %vm6144_vm2, %v893_v62, %v894_v50  ;;  %v787_v15 = vld [vmem:[#allocation2 + $0x2c] sm:$0x1]  ;;  %v5936_v60 = vld [vmem:[#allocation2 + $0x24] sm:$0xff]  }
  0xb2   : > { %v463_v7 = vsel %vm6227_vm5, %v461_v54, %v462_v0  ;;  %v464_v8 = vrot.slane %v462_v0, 4  ;;  %546 = vst [vmem:[#allocation2 + $0x34] sm:$0xf] %v423_v5  ;;  %v425_v9 = vrot.slane %v5107_v1, 7  ;;  %v286_v10 = vmax.f32 %v5876_v2, 0.0 }
  0xb3   : > { %547 = vst [vmem:[#allocation2 + $0x38] sm:$0x1] %v424_v4  ;;  %570 = vst [vmem:[#allocation2 + $0x94] sm:$0xf] %v463_v7  ;;  %v465_v11 = vrot.slane %v5123_v6, 7  ;;  %v5877_v14 = vpop.trf.xlu0  ;;  %v898_v16 = vrot.slane %v786_v3, 5  ;;  %v4787_v19 = vcombine.low %v892_v57, %v895_v13 }
  0xb4   : > { %571 = vst [vmem:[#allocation2 + $0x98] sm:$0x1] %v464_v8  ;;  %v426_v17 = vrot.slane %v425_v9, 4  ;;  %548 = vst [vmem:[#allocation2 + $0x3c] sm:$0xe] %v425_v9  ;;  %v5108_v18 = vpack.c.bf16 %v286_v10, %v286_v10  ;;  %v5881_v20 = vunpack.i.h.bf16 %v5877_v14  ;;  %v302_v23 = vmax.f32 %v5873_v12, 0.0 }
  0xb5   : > { %v6247_v21 = vld [vmem:[#allocation2 + $0x30] sm:$0xe]  ;;  %v466_v22 = vrot.slane %v465_v11, 4  ;;  %572 = vst [vmem:[#allocation2 + $0x9c] sm:$0xe] %v465_v11  ;;  %3567 = vmatprep.mubr.bf16.mxu0 %v4787_v19  ;;  %v5878_v27 = vunpack.i.l.bf16 %v5877_v14  ;;  %v899_v28 = vsel %vm6144_vm2, %v4772_v63, %v898_v16  ;;  %v900_v31 = vrot.slane %v898_v16, 4 }
  0xb6   : > { %v427_v25 = vrot.slane %v5108_v18, 7  ;;  %v287_v26 = vmax.f32 %v5881_v20, 0.0  ;;  %v5124_v29 = vpack.c.bf16 %v302_v23, %v302_v23  ;;  %3568 = vmatmul.mubr.bf16.gmra.mrb[8].mxu0 %v5935_v24  ;;  %v901_v32 = vrot.slane %v787_v15, 5  ;;  %v6259_v46 = vld [vmem:[#allocation2 + $0x90] sm:$0xe] }
  0xb7   : > { %v5882_v30 = vpop.trf.xlu0  ;;  %v4773_v33 = vrot.slane %v6247_v21, 9  ;;  %v303_v38 = vmax.f32 %v5878_v27, 0.0  ;;  %v4781_v6 = vrot.slane %v6259_v46, 9 }
  0xb8   : > { %v429_v35 = vrot.slane %v427_v25, 4  ;;  %v428_v36 = vsel %vm6227_vm5, %v426_v17, %v427_v25  ;;  %v5109_v37 = vpack.c.bf16 %v287_v26, %v287_v26  ;;  %v467_v39 = vrot.slane %v5124_v29, 7 }
  0xb9   : > { %549 = vst [vmem:[#allocation2 + $0x40] sm:$0xf] %v428_v36  ;;  %v5886_v41 = vunpack.i.h.bf16 %v5882_v30  ;;  %v5125_v43 = vpack.c.bf16 %v303_v38, %v303_v38  ;;  %v5883_v44 = vunpack.i.l.bf16 %v5882_v30  ;;  %v902_v45 = vsel %vm6144_vm2, %v900_v31, %v901_v32  ;;  %v789_v52 = vld [vmem:[#allocation2 + $0x34] sm:$0xf] }
  0xba   : > { %550 = vst [vmem:[#allocation2 + $0x44] sm:$0x1] %v429_v35  ;;  %v430_v42 = vrot.slane %v5109_v37, 7  ;;  %v468_v47 = vsel %vm6227_vm5, %v466_v22, %v467_v39  ;;  %v469_v48 = vrot.slane %v467_v39, 4  ;;  %v4788_v50 = vcombine.low %v899_v28, %v902_v45  ;;  %v790_v57 = vld [vmem:[#allocation2 + $0x38] sm:$0x1] }
  0xbb   : > { %v288_v49 = vmax.f32 %v5886_v41, 0.0  ;;  %v5887_v51 = vpop.trf.xlu0  ;;  %573 = vst [vmem:[#allocation2 + $0xa0] sm:$0xf] %v468_v47  ;;  %v470_v54 = vrot.slane %v5125_v43, 7  ;;  %v304_v55 = vmax.f32 %v5883_v44, 0.0  ;;  %v905_v1 = vrot.slane %v789_v52, 5 }
  0xbc   : > { %v431_v53 = vrot.slane %v430_v42, 4  ;;  %551 = vst [vmem:[#allocation2 + $0x48] sm:$0xe] %v430_v42  ;;  %v5891_v56 = vunpack.i.h.bf16 %v5887_v51  ;;  %574 = vst [vmem:[#allocation2 + $0xa4] sm:$0x1] %v469_v48  ;;  %3575 = vmatprep.mubr.bf16.mxu0 %v4788_v50  ;;  %v5888_v61 = vunpack.i.l.bf16 %v5887_v51  ;;  %v908_v5 = vrot.slane %v790_v57, 5 }
  0xbd   : > { %v5110_v58 = vpack.c.bf16 %v288_v49, %v288_v49  ;;  %v471_v62 = vrot.slane %v470_v54, 4  ;;  %575 = vst [vmem:[#allocation2 + $0xa8] sm:$0xe] %v470_v54  ;;  %v5126_v63 = vpack.c.bf16 %v304_v55, %v304_v55  ;;  %v813_v10 = vld [vmem:[#allocation2 + $0x94] sm:$0xf]  ;;  %v906_v22 = vsel %vm6144_vm2, %v4773_v33, %v905_v1  ;;  %v5941_v44 = vld [vmem:[%s7386_s1 + $0x80] sm:$0xff]  }
  0xbe   : > { %v289_v0 = vmax.f32 %v5891_v56, 0.0  ;;  %3576 = vmatmul.mubr.bf16.gmra.mrb[12].mxu0 %v5936_v60  ;;  %v305_v3 = vmax.f32 %v5888_v61, 0.0  ;;  %v814_v14 = vld [vmem:[#allocation2 + $0x98] sm:$0x1]  ;;  %v907_v23 = vrot.slane %v905_v1, 4  ;;  %v961_v27 = vrot.slane %v813_v10, 5 }
  0xbf   : > { %v432_v2 = vrot.slane %v5110_v58, 7  ;;  %v5892_v4 = vpop.trf.xlu0  ;;  %v472_v7 = vrot.slane %v5126_v63, 7  ;;  %v964_v28 = vrot.slane %v814_v14, 5  ;;  %v5939_v37 = vld [vmem:[#allocation2 + $0x30] sm:$0xff]   ;;  %v791_v46 = vld [vmem:[#allocation2 + $0x3c] sm:$0xe] }
  0xc0   : > { %v5111_v8 = vpack.c.bf16 %v289_v0, %v289_v0  ;;  %v5896_v9 = vunpack.i.h.bf16 %v5892_v4  ;;  %v5127_v13 = vpack.c.bf16 %v305_v3, %v305_v3  ;;  %v5893_v20 = vunpack.i.l.bf16 %v5892_v4  ;;  %v815_v47 = vld [vmem:[#allocation2 + $0x9c] sm:$0xe]  ;;  %v5943_v51 = vld [vmem:[%s7386_s1 + $0xc8] sm:$0xff]   ;;  %v5940_v54 = vld [vmem:[#allocation2 + $0x90] sm:$0xff]  }
  0xc1   : > { %v434_v11 = vrot.slane %v432_v2, 4  ;;  %v433_v12 = vsel %vm6227_vm5, %v431_v53, %v432_v2  ;;  %v473_v15 = vsel %vm6227_vm5, %v471_v62, %v472_v7  ;;  %v474_v16 = vrot.slane %v472_v7, 4  ;;  %v792_v53 = vld [vmem:[#allocation2 + $0x40] sm:$0xf]  ;;  %v793_v57 = vld [vmem:[#allocation2 + $0x44] sm:$0x1] }
  0xc2   : > { %552 = vst [vmem:[#allocation2 + $0x4c] sm:$0xf] %v433_v12  ;;  %v435_v17 = vrot.slane %v5111_v8, 7  ;;  %v290_v18 = vmax.f32 %v5896_v9, 0.0  ;;  %576 = vst [vmem:[#allocation2 + $0xac] sm:$0xf] %v473_v15  ;;  %v909_v31 = vsel %vm6144_vm2, %v907_v23, %v908_v5  ;;  %v962_v33 = vsel %vm6144_vm2, %v4781_v6, %v961_v27 }
  0xc3   : > { %553 = vst [vmem:[#allocation2 + $0x50] sm:$0x1] %v434_v11  ;;  %v475_v19 = vrot.slane %v5127_v13, 7  ;;  %v5897_v24 = vpop.trf.xlu0  ;;  %577 = vst [vmem:[#allocation2 + $0xb0] sm:$0x1] %v474_v16  ;;  %v306_v30 = vmax.f32 %v5893_v20, 0.0  ;;  %v4789_v21 = vcombine.low %v906_v22, %v909_v31 }
  0xc4   : > { %v436_v25 = vrot.slane %v435_v17, 4  ;;  %554 = vst [vmem:[#allocation2 + $0x54] sm:$0xe] %v435_v17  ;;  %v5112_v26 = vpack.c.bf16 %v290_v18, %v290_v18  ;;  %v5901_v32 = vunpack.i.h.bf16 %v5897_v24  ;;  %v963_v35 = vrot.slane %v961_v27, 4  ;;  %v816_v58 = vld [vmem:[#allocation2 + $0xa0] sm:$0xf] }
  0xc5   : > { %v476_v29 = vrot.slane %v475_v19, 4  ;;  %578 = vst [vmem:[#allocation2 + $0xb4] sm:$0xe] %v475_v19  ;;  %v5128_v36 = vpack.c.bf16 %v306_v30, %v306_v30  ;;  %3583 = vmatprep.mubr.bf16.mxu0 %v4789_v21  ;;  %v5898_v45 = vunpack.i.l.bf16 %v5897_v24  ;;  %v817_v0 = vld [vmem:[#allocation2 + $0xa4] sm:$0x1]  ;;  %v4774_v4 = vrot.slane %v791_v46, 9 }
  0xc6   : > { %v437_v34 = vrot.slane %v5112_v26, 7  ;;  %v291_v38 = vmax.f32 %v5901_v32, 0.0  ;;  %v965_v43 = vsel %vm6144_vm2, %v963_v35, %v964_v28  ;;  %3584 = vmatmul.mubr.bf16.gmra.mrb[16].mxu0 %v5939_v37  ;;  %v912_v5 = vrot.slane %v792_v53, 5  ;;  %v5944_v7 = vld [vmem:[%s7386_s1 + $0x88] sm:$0xff]   ;;  %v5945_v15 = vld [vmem:[%s7386_s1 + $0xd0] sm:$0xff]  }
  0xc7   : > { %v5902_v39 = vpop.trf.xlu0  ;;  %v477_v48 = vrot.slane %v5128_v36, 7  ;;  %v4797_v49 = vcombine.low %v962_v33, %v965_v43  ;;  %v307_v55 = vmax.f32 %v5898_v45, 0.0  ;;  %v915_v9 = vrot.slane %v793_v57, 5  ;;  %v5949_v33 = vld [vmem:[%s7386_s1 + $0xd8] sm:$0xff]  }
  0xc8   : > { %v439_v41 = vrot.slane %v437_v34, 4  ;;  %v438_v42 = vsel %vm6227_vm5, %v436_v25, %v437_v34  ;;  %v5113_v50 = vpack.c.bf16 %v291_v38, %v291_v38  ;;  %v5906_v52 = vunpack.i.h.bf16 %v5902_v39  ;;  %v5946_v34 = vld [vmem:[#allocation2 + $0x3c] sm:$0xff]  }
  0xc9   : > { %555 = vst [vmem:[#allocation2 + $0x58] sm:$0xf] %v438_v42  ;;  %v5903_v56 = vunpack.i.l.bf16 %v5902_v39  ;;  %v478_v60 = vsel %vm6227_vm5, %v476_v29, %v477_v48  ;;  %v479_v61 = vrot.slane %v477_v48, 4  ;;  %3647 = vmatprep.mubr.bf16.mxu1 %v4797_v49  ;;  %v5129_v2 = vpack.c.bf16 %v307_v55, %v307_v55  ;;  %v5948_v29 = vld [vmem:[%s7386_s1 + $0x90] sm:$0xff]   ;;  %v5951_v36 = vld [vmem:[%s7386_s1 + $0x98] sm:$0xff]  }
  0xca   : > { %556 = vst [vmem:[#allocation2 + $0x5c] sm:$0x1] %v439_v41  ;;  %v440_v62 = vrot.slane %v5113_v50, 7  ;;  %v292_v63 = vmax.f32 %v5906_v52, 0.0  ;;  %579 = vst [vmem:[#allocation2 + $0xb8] sm:$0xf] %v478_v60  ;;  %3648 = vmatmul.mubr.bf16.vlgmr.msra.gmra.mrb[0].mxu1 %v5940_v54  ;;  %v913_v13 = vsel %vm6144_vm2, %v4774_v4, %v912_v5 }
  0xcb   : > { %v5907_v1 = vpop.trf.xlu0  ;;  %v308_v3 = vmax.f32 %v5903_v56, 0.0  ;;  %580 = vst [vmem:[#allocation2 + $0xbc] sm:$0x1] %v479_v61  ;;  %5373 = vmatpush3.bf16.msra.mxu1 %v5941_v44  ;;  %v4782_v10 = vrot.slane %v815_v47, 9  ;;  %v480_v11 = vrot.slane %v5129_v2, 7  ;;  %v914_v14 = vrot.slane %v912_v5, 4 }
  0xcc   : > { %v441_v6 = vrot.slane %v440_v62, 4  ;;  %557 = vst [vmem:[#allocation2 + $0x60] sm:$0xe] %v440_v62  ;;  %v5114_v8 = vpack.c.bf16 %v292_v63, %v292_v63  ;;  %5374 = vmatprep.subr.bf16.mxu1 %v5943_v51  ;;  %v968_v17 = vrot.slane %v816_v58, 5  ;;  %v971_v18 = vrot.slane %v817_v0, 5  ;;  %v5947_v47 = vld [vmem:[#allocation2 + $0x9c] sm:$0xff]  }
  0xcd   : > { %v5130_v12 = vpack.c.bf16 %v308_v3, %v308_v3  ;;  %v5911_v19 = vunpack.i.h.bf16 %v5907_v1  ;;  %v481_v20 = vrot.slane %v480_v11, 4  ;;  %581 = vst [vmem:[#allocation2 + $0xc0] sm:$0xe] %v480_v11  ;;  %v916_v23 = vsel %vm6144_vm2, %v914_v14, %v915_v9  ;;  %v795_v38 = vld [vmem:[#allocation2 + $0x4c] sm:$0xf]  ;;  %v5953_v51 = vld [vmem:[%s7386_s1 + $0xe0] sm:$0xff]  }
  0xce   : > { %v442_v16 = vrot.slane %v5114_v8, 7  ;;  %v4790_v27 = vcombine.low %v913_v13, %v916_v23  ;;  %v969_v28 = vsel %vm6144_vm2, %v4782_v10, %v968_v17  ;;  %v970_v32 = vrot.slane %v968_v17, 4  ;;  %v796_v39 = vld [vmem:[#allocation2 + $0x50] sm:$0x1]  ;;  %v794_v44 = vld [vmem:[#allocation2 + $0x48] sm:$0xe] }
  0xcf   : > { %v482_v22 = vrot.slane %v5130_v12, 7  ;;  %v5912_v24 = vpop.trf.xlu0  ;;  %5375 = vmatpush3.bf16.msra.mxu1 %v5944_v7  ;;  %v293_v21 = vmax.f32 %v5911_v19, 0.0  ;;  %v5908_v35 = vunpack.i.l.bf16 %v5907_v1  ;;  %v819_v45 = vld [vmem:[#allocation2 + $0xac] sm:$0xf]  ;;  %v818_v50 = vld [vmem:[#allocation2 + $0xa8] sm:$0xe] }
  0xd0   : > { %v444_v25 = vrot.slane %v442_v16, 4  ;;  %v443_v26 = vsel %vm6227_vm5, %v441_v6, %v442_v16  ;;  %5376 = vmatprep.subr.bf16.mxu1 %v5945_v15  ;;  %3591 = vmatprep.mubr.bf16.mxu0 %v4790_v27  ;;  %v5916_v37 = vunpack.i.h.bf16 %v5912_v24  ;;  %v972_v41 = vsel %vm6144_vm2, %v970_v32, %v971_v18  ;;  %v820_v56 = vld [vmem:[#allocation2 + $0xb0] sm:$0x1]  ;;  %v6318_v62 = vld [vmem:[#allocation2 + $0x58] sm:$0xf]  ;;  %v5956_v3 = vld [vmem:[%s7386_s1 + $0xa0] sm:$0xff]  }
  0xd1   : > { %v483_v30 = vsel %vm6227_vm5, %v481_v20, %v482_v22  ;;  %v484_v31 = vrot.slane %v482_v22, 4  ;;  %558 = vst [vmem:[#allocation2 + $0x64] sm:$0xf] %v443_v26  ;;  %3592 = vmatmul.mubr.bf16.gmra.mrb[20].mxu0 %v5946_v34  ;;  %v5115_v42 = vpack.c.bf16 %v293_v21, %v293_v21  ;;  %v5913_v43 = vunpack.i.l.bf16 %v5912_v24  ;;  %v797_v4 = vld [vmem:[#allocation2 + $0x54] sm:$0xe]  ;;  %v5957_v10 = vld [vmem:[%s7386_s1 + $0xe8] sm:$0xff]  }
  0xd2   : > { %559 = vst [vmem:[#allocation2 + $0x68] sm:$0x1] %v444_v25  ;;  %582 = vst [vmem:[#allocation2 + $0xc4] sm:$0xf] %v483_v30  ;;  %v4798_v46 = vcombine.low %v969_v28, %v972_v41  ;;  %v309_v48 = vmax.f32 %v5908_v35, 0.0  ;;  %v294_v49 = vmax.f32 %v5916_v37, 0.0 }
  0xd3   : > { %583 = vst [vmem:[#allocation2 + $0xc8] sm:$0x1] %v484_v31  ;;  %5377 = vmatpush3.bf16.msra.mxu1 %v5948_v29  ;;  %v445_v52 = vrot.slane %v5115_v42, 7  ;;  %v310_v53 = vmax.f32 %v5913_v43, 0.0  ;;  %v919_v54 = vrot.slane %v795_v38, 5  ;;  %v922_v55 = vrot.slane %v796_v39, 5 }
  0xd4   : > { %5378 = vmatprep.subr.bf16.mxu1 %v5949_v33  ;;  %3655 = vmatprep.mubr.bf16.mxu1 %v4798_v46  ;;  %v5131_v57 = vpack.c.bf16 %v309_v48, %v309_v48  ;;  %v5116_v58 = vpack.c.bf16 %v294_v49, %v294_v49  ;;  %v4775_v60 = vrot.slane %v794_v44, 9  ;;  %v975_v61 = vrot.slane %v819_v45, 5  ;;  %v799_v5 = vld [vmem:[#allocation2 + $0x5c] sm:$0x1]  ;;  %v821_v11 = vld [vmem:[#allocation2 + $0xb4] sm:$0xe] }
  0xd5   : > { %3656 = vmatmul.mubr.bf16.gmra.mrb[4].mxu1 %v5947_v47  ;;  %v446_v63 = vrot.slane %v445_v52, 4  ;;  %560 = vst [vmem:[#allocation2 + $0x6c] sm:$0xe] %v445_v52  ;;  %v5132_v0 = vpack.c.bf16 %v310_v53, %v310_v53  ;;  %v921_v1 = vrot.slane %v919_v54, 4  ;;  %v4783_v2 = vrot.slane %v818_v50, 9  ;;  %v5954_v27 = vld [vmem:[#allocation2 + $0x48] sm:$0xff]  }
  0xd6   : > { %v485_v6 = vrot.slane %v5131_v57, 7  ;;  %v447_v7 = vrot.slane %v5116_v58, 7  ;;  %v920_v8 = vsel %vm6144_vm2, %v4775_v60, %v919_v54  ;;  %v977_v9 = vrot.slane %v975_v61, 4  ;;  %v822_v12 = vld [vmem:[#allocation2 + $0xb8] sm:$0xf]  ;;  %v5958_v34 = vld [vmem:[%s7386_s1 + $0xa8] sm:$0xff]  }
  0xd7   : > { %5379 = vmatpush3.bf16.msra.mxu1 %v5951_v36  ;;  %v487_v13 = vrot.slane %v5132_v0, 7  ;;  %v923_v14 = vsel %vm6144_vm2, %v921_v1, %v922_v55  ;;  %v976_v15 = vsel %vm6144_vm2, %v4783_v2, %v975_v61  ;;  %v978_v16 = vrot.slane %v820_v56, 5  ;;  %v823_v17 = vld [vmem:[#allocation2 + $0xbc] sm:$0x1]  ;;  %v800_v18 = vld [vmem:[#allocation2 + $0x60] sm:$0xe] }
  0xd8   : > { %5380 = vmatprep.subr.bf16.mxu1 %v5953_v51  ;;  %v486_v19 = vrot.slane %v485_v6, 4  ;;  %584 = vst [vmem:[#allocation2 + $0xcc] sm:$0xe] %v485_v6  ;;  %v449_v20 = vrot.slane %v447_v7, 4  ;;  %v448_v22 = vsel %vm6227_vm5, %v446_v63, %v447_v7  ;;  %v4791_v23 = vcombine.low %v920_v8, %v923_v14  ;;  %v801_v24 = vld [vmem:[#allocation2 + $0x64] sm:$0xf] }
  0xd9   : > { %v489_v25 = vrot.slane %v487_v13, 4  ;;  %561 = vst [vmem:[#allocation2 + $0x70] sm:$0xf] %v448_v22  ;;  %v979_v26 = vsel %vm6144_vm2, %v977_v9, %v978_v16  ;;  %v926_v28 = vrot.slane %v6318_v62, 5  ;;  %v929_v29 = vrot.slane %v799_v5, 5  ;;  %v5955_v36 = vld [vmem:[#allocation2 + $0xa8] sm:$0xff]  }
  0xda   : > { %v802_v30 = vld [vmem:[#allocation2 + $0x68] sm:$0x1]  ;;  %562 = vst [vmem:[#allocation2 + $0x74] sm:$0x1] %v449_v20  ;;  %v488_v31 = vsel %vm6227_vm5, %v486_v19, %v487_v13  ;;  %3599 = vmatprep.mubr.bf16.mxu0 %v4791_v23  ;;  %v4799_v32 = vcombine.low %v976_v15, %v979_v26  ;;  %v4776_v21 = vrot.slane %v797_v4, 9  ;;  %v982_v33 = vrot.slane %v822_v12, 5 }
  0xdb   : > { %5381 = vmatpush3.bf16.msra.mxu1 %v5956_v3  ;;  %v6342_v35 = vld [vmem:[#allocation2 + $0x4] sm:$0xf]  ;;  %585 = vst [vmem:[#allocation2 + $0xd0] sm:$0xf] %v488_v31  ;;  %586 = vst [vmem:[#allocation2 + $0xd4] sm:$0x1] %v489_v25  ;;  %3600 = vmatmul.mubr.bf16.gmra.mrb[24].mxu0 %v5954_v27 }
  0xdc   : > { %5382 = vmatprep.subr.bf16.mxu1 %v5957_v10  ;;  %v928_v37 = vrot.slane %v926_v28, 4  ;;  %v4784_v38 = vrot.slane %v821_v11, 9  ;;  %v985_v59 = vrot.slane %v823_v17, 5  ;;  %v5959_v39 = vld [vmem:[%s7386_s1 + $0xf0] sm:$0xff]   ;;  %v4777_v41 = vrot.slane %v800_v18, 9  ;;  %3663 = vmatprep.mubr.bf16.mxu1 %v4799_v32  ;;  %v5966_v52 = vld [vmem:[%s7386_s1 + $0xf8] sm:$0xff]  }
  0xdd   : > { %v984_v42 = vrot.slane %v982_v33, 4  ;;  %v933_v43 = vrot.slane %v801_v24, 5  ;;  %v936_v44 = vrot.slane %v802_v30, 5  ;;  %3664 = vmatmul.mubr.bf16.gmra.mrb[8].mxu1 %v5955_v36  ;;  %v927_v45 = vsel %vm6144_vm2, %v4776_v21, %v926_v28  ;;  %v5963_v48 = vld [vmem:[%s7386_s1 + $0xb0] sm:$0xff]   ;;  %v803_v55 = vld [vmem:[#allocation2 + $0x6c] sm:$0xe] }
  0xde   : > { %v930_v46 = vsel %vm6144_vm2, %v928_v37, %v929_v29  ;;  %v983_v47 = vsel %vm6144_vm2, %v4784_v38, %v982_v33  ;;  %v1168_v49 = vrot.slane %v6342_v35, 6  ;;  %v1067_v57 = vld [vmem:[#allocation2] sm:$0xc]  ;;  %v1069_v58 = vld [vmem:[#allocation2 + $0x8] sm:$0x3]  ;;  %v5961_v62 = vld [vmem:[#allocation2 + $0x54] sm:$0xff]  }
  0xdf   : > { %5383 = vmatpush3.bf16.msra.mxu1 %v5958_v34  ;;  %v4792_v50 = vcombine.low %v927_v45, %v930_v46  ;;  %v986_v51 = vsel %vm6144_vm2, %v984_v42, %v985_v59  ;;  %v934_v53 = vsel %vm6144_vm2, %v4777_v41, %v933_v43  ;;  %v935_v54 = vrot.slane %v933_v43, 4  ;;  %v5967_v3 = vld [vmem:[%s7386_s1 + $0xb8] sm:$0xff]   ;;  %v5968_v9 = vld [vmem:[%s7386_s1 + $0x1c0] sm:$0xff]   ;;  %v1071_v11 = vld [vmem:[#allocation2 + $0x10] sm:$0xf] }
  0xe0   : > { %v4800_v56 = vcombine.low %v983_v47, %v986_v51  ;;  %5384 = vmatprep.subr.bf16.mxu1 %v5959_v39  ;;  %v804_v61 = vld [vmem:[#allocation2 + $0x70] sm:$0xf]  ;;  %v4778_v1 = vrot.slane %v803_v55, 9  ;;  %v4801_v4 = vrot.slane %v1067_v57, 10  ;;  %v1170_v5 = vrot.slane %v1168_v49, 4  ;;  %v5962_v8 = vld [vmem:[#allocation2 + $0xb4] sm:$0xff]  }
  0xe1   : > { %3607 = vmatprep.mubr.bf16.mxu0 %v4792_v50  ;;  %v937_v60 = vsel %vm6144_vm2, %v935_v54, %v936_v44  ;;  %v805_v0 = vld [vmem:[#allocation2 + $0x74] sm:$0x1]  ;;  %v940_v2 = vrot.slane %v804_v61, 5  ;;  %v1171_v6 = vrot.slane %v1069_v58, 6  ;;  %v5965_v12 = vld [vmem:[#allocation2 + $0x18] sm:$0xff]   ;;  %v1175_v22 = vrot.slane %v1071_v11, 6 }
  0xe2   : > { %3671 = vmatprep.mubr.bf16.mxu1 %v4800_v56  ;;  %v4793_v63 = vcombine.low %v934_v53, %v937_v60  ;;  %v943_v7 = vrot.slane %v805_v0, 5  ;;  %v807_v13 = vld [vmem:[#allocation2 + $0x7c] sm:$0xf]  ;;  %v1169_v17 = vsel %vm6374_vm8, %v4801_v4, %v1168_v49  ;;  %v1070_v19 = vld [vmem:[#allocation2 + $0xc] sm:$0xc]  ;;  %v5969_v23 = vld [vmem:[#allocation2 + $0x60] sm:$0xff]  }
  0xe3   : > { %5385 = vmatpush3.bf16.msra.mxu1 %v5963_v48  ;;  %3608 = vmatmul.mubr.bf16.gmra.mrb[28].mxu0 %v5961_v62  ;;  %v942_v10 = vrot.slane %v940_v2, 4  ;;  %v941_v15 = vsel %vm6144_vm2, %v4778_v1, %v940_v2  ;;  %v1172_v18 = vsel %vm6374_vm8, %v1170_v5, %v1171_v6  ;;  %v1072_v20 = vld [vmem:[#allocation2 + $0x14] sm:$0x3]  ;;  %v947_v24 = vrot.slane %v807_v13, 5  ;;  %v808_v26 = vld [vmem:[#allocation2 + $0x80] sm:$0x1] }
  0xe4   : > { %5386 = vmatprep.subr.bf16.mxu1 %v5966_v52  ;;  %3615 = vmatprep.mubr.bf16.mxu0 %v4793_v63  ;;  %v4817_v27 = vcombine.low %v1169_v17, %v1172_v18  ;;  %v5970_v28 = vld [vmem:[%s7386_s1 + $0x180] sm:$0xff]   ;;  %v4802_v29 = vrot.slane %v1070_v19, 10  ;;  %v1177_v30 = vrot.slane %v1175_v22, 4  ;;  %v1178_v31 = vrot.slane %v1072_v20, 6  ;;  %v5977_v21 = vld [vmem:[%s7386_s1 + $0x1c8] sm:$0xff]   ;;  %v5990_v45 = vld [vmem:[%s7386_s1 + $0x1d0] sm:$0xff]  }
  0xe5   : > { %3672 = vmatmul.mubr.bf16.gmra.mrb[12].mxu1 %v5962_v8  ;;  %v944_v16 = vsel %vm6144_vm2, %v942_v10, %v943_v7  ;;  %v949_v32 = vrot.slane %v947_v24, 4  ;;  %v950_v34 = vrot.slane %v808_v26, 5  ;;  %v5971_v33 = vld [vmem:[#allocation2 + $0x24] sm:$0xff]   ;;  %v806_v35 = vld [vmem:[#allocation2 + $0x78] sm:$0xe]  ;;  %v5974_v41 = vld [vmem:[#allocation2 + $0x6c] sm:$0xff]  }
  0xe6   : > { %3712 = vmatprep.mubr.bf16.mxu1 %v5965_v12  ;;  %v4794_v25 = vcombine.low %v941_v15, %v944_v16  ;;  %v810_v36 = vld [vmem:[#allocation2 + $0x88] sm:$0xf]  ;;  %v1074_v37 = vld [vmem:[#allocation2 + $0x1c] sm:$0xf]  ;;  %v1176_v38 = vsel %vm6374_vm8, %v4802_v29, %v1175_v22  ;;  %v1179_v59 = vsel %vm6374_vm8, %v1177_v30, %v1178_v31  ;;  %v4779_v42 = vrot.slane %v806_v35, 9  ;;  %v5991_v52 = vld [vmem:[%s7386_s1 + $0x190] sm:$0xff]  }
  0xe7   : > { %5387 = vmatpush3.bf16.msra.mxu1 %v5967_v3  ;;  %v5980_v39 = vld [vmem:[%s7386_s1 + $0x188] sm:$0xff]   ;;  %v951_v43 = vsel %vm6144_vm2, %v949_v32, %v950_v34  ;;  %v954_v44 = vrot.slane %v810_v36, 5  ;;  %v1182_v46 = vrot.slane %v1074_v37, 6  ;;  %v4818_v48 = vcombine.low %v1176_v38, %v1179_v59  ;;  %v1075_v50 = vld [vmem:[#allocation2 + $0x20] sm:$0x3]  ;;  %v5994_v53 = vld [vmem:[%s7386_s1 + $0x1d8] sm:$0xff]  }
  0xe8   : > { %5596 = vmatprep.subr.bf16.mxu1 %v5968_v9  ;;  %v811_v47 = vld [vmem:[#allocation2 + $0x8c] sm:$0x1]  ;;  %v948_v49 = vsel %vm6144_vm2, %v4779_v42, %v947_v24  ;;  %v1073_v54 = vld [vmem:[#allocation2 + $0x18] sm:$0xc]  ;;  %v809_v55 = vld [vmem:[#allocation2 + $0x84] sm:$0xe] }
  0xe9   : > { %v4795_v51 = vcombine.low %v948_v49, %v951_v43  ;;  %v956_v56 = vrot.slane %v954_v44, 4  ;;  %v957_v57 = vrot.slane %v811_v47, 5  ;;  %v5975_v58 = vld [vmem:[#allocation2 + $0x30] sm:$0xff]   ;;  %v1184_v60 = vrot.slane %v1182_v46, 4  ;;  %v1791_v62 = vld [vmem:[#allocation2 + $0x1c] sm:$0xf] }
  0xea   : > { %v1185_v61 = vrot.slane %v1075_v50, 6  ;;  %v1077_v63 = vld [vmem:[#allocation2 + $0x28] sm:$0xf]  ;;  %v5995_v0 = vld [vmem:[%s7386_s1 + $0x198] sm:$0xff]   ;;  %v4780_v1 = vrot.slane %v809_v55, 9  ;;  %v1888_v3 = vrot.slane %v1791_v62, 6 }
  0xeb   : > { %3616 = vmatmul.mubr.bf16.gmra.mrb[32].mxu0 %v5969_v23  ;;  %v958_v2 = vsel %vm6144_vm2, %v956_v56, %v957_v57  ;;  %v5998_v4 = vld [vmem:[%s7386_s1 + $0x1e0] sm:$0xff]   ;;  %v4803_v5 = vrot.slane %v1073_v54, 10  ;;  %v1189_v7 = vrot.slane %v1077_v63, 6  ;;  %v5978_v9 = vld [vmem:[#allocation2 + $0x78] sm:$0xff]   ;;  %v1078_v11 = vld [vmem:[#allocation2 + $0x2c] sm:$0x3] }
  0xec   : > { %3623 = vmatprep.mubr.bf16.mxu0 %v4794_v25  ;;  %v1186_v6 = vsel %vm6374_vm8, %v1184_v60, %v1185_v61  ;;  %v1792_v8 = vld [vmem:[#allocation2 + $0x20] sm:$0x3]  ;;  %v955_v10 = vsel %vm6144_vm2, %v4780_v1, %v954_v44  ;;  %v1790_v16 = vld [vmem:[#allocation2 + $0x18] sm:$0xc]  ;;  %v6003_v18 = vld [vmem:[%s7386_s1 + $0x1e8] sm:$0xff]   ;;  %v1890_v20 = vrot.slane %v1888_v3, 4 }
  0xed   : > { %3713 = vmatmul.mubr.bf16.vlgmr.msra.gmra.mrb[16].mxu1 %v4817_v27  ;;  %v1183_v12 = vsel %vm6374_vm8, %v4803_v5, %v1182_v46  ;;  %v4796_v13 = vcombine.low %v955_v10, %v958_v2  ;;  %v5981_v15 = vld [vmem:[#allocation2 + $0x3c] sm:$0xff]   ;;  %v1891_v22 = vrot.slane %v1792_v8, 6  ;;  %v6434_v24 = vld [vmem:[#allocation2 + $0x28] sm:$0xf]  ;;  %v1191_v25 = vrot.slane %v1189_v7, 4  ;;  %v6010_v49 = vld [vmem:[%s7386_s1 + $0x1b0] sm:$0xff]  }
  0xee   : > { %5597 = vmatpush3.bf16.msra.mxu1 %v5970_v28  ;;  %3720 = vmatprep.mubr.bf16.mxu1 %v5971_v33  ;;  %v6000_v17 = vld [vmem:[%s7386_s1 + $0x1a0] sm:$0xff]   ;;  %v4819_v19 = vcombine.low %v1183_v12, %v1186_v6  ;;  %v6432_v23 = vld [vmem:[#allocation2 + $0x1c] sm:$0xf]  ;;  %v1192_v26 = vrot.slane %v1078_v11, 6  ;;  %v6436_v28 = vld [vmem:[#allocation2 + $0x34] sm:$0xf] }
  0xef   : > { %5598 = vmatprep.subr.bf16.mxu1 %v5977_v21  ;;  %v1076_v27 = vld [vmem:[#allocation2 + $0x24] sm:$0xc]  ;;  %v1600_v29 = vrot.slane %v6432_v23, 5  ;;  %v6005_v30 = vld [vmem:[%s7386_s1 + $0x1a8] sm:$0xff]   ;;  %v4881_v31 = vrot.slane %v1790_v16, 10  ;;  %v1892_v32 = vsel %vm6374_vm8, %v1890_v20, %v1891_v22  ;;  %v1895_v21 = vrot.slane %v6434_v24, 6 }
  0xf0   : > { %v1504_v34 = vld [vmem:[#allocation2 + $0x20] sm:$0x1]  ;;  %v6008_v33 = vld [vmem:[%s7386_s1 + $0x1f0] sm:$0xff]   ;;  %v4804_v35 = vrot.slane %v1076_v27, 10  ;;  %v1193_v36 = vsel %vm6374_vm8, %v1191_v25, %v1192_v26  ;;  %v1196_v37 = vrot.slane %v6436_v28, 6  ;;  %v5984_v59 = vld [vmem:[#allocation2 + $0x84] sm:$0xff]  }
  0xf1   : > { %v1795_v38 = vld [vmem:[#allocation2 + $0x2c] sm:$0x3]  ;;  %v1502_v42 = vld [vmem:[#allocation2 + $0x18] sm:$0xe]  ;;  %v1602_v46 = vrot.slane %v1600_v29, 4  ;;  %v1603_v47 = vrot.slane %v1504_v34, 5 }
  0xf2   : > { %5599 = vmatpush3.bf16.msra.mxu1 %v5980_v39  ;;  %v1889_v39 = vsel %vm6374_vm8, %v4881_v31, %v1888_v3  ;;  %v1190_v43 = vsel %vm6374_vm8, %v4804_v35, %v1189_v7  ;;  %v5986_v44 = vld [vmem:[#allocation2 + $0x48] sm:$0xff]   ;;  %v6013_v50 = vld [vmem:[%s7386_s1 + $0x1f8] sm:$0xff]   ;;  %v1198_v54 = vrot.slane %v1196_v37, 4  ;;  %v1793_v56 = vld [vmem:[#allocation2 + $0x24] sm:$0xc]  ;;  %v4849_v61 = vrot.slane %v1502_v42, 9 }
  0xf3   : > { %3624 = vmatmul.mubr.bf16.gmra.mrb[36].mxu0 %v5974_v41  ;;  %5600 = vmatprep.subr.bf16.mxu1 %v5990_v45  ;;  %v1081_v41 = vld [vmem:[#allocation2 + $0x38] sm:$0x3]  ;;  %v4897_v45 = vcombine.low %v1889_v39, %v1892_v32  ;;  %v6463_v57 = vld [vmem:[#allocation2 + $0x34] sm:$0xf]  ;;  %v6465_v60 = vld [vmem:[#allocation2 + $0x40] sm:$0xf]  ;;  %v1604_v62 = vsel %vm6144_vm2, %v1602_v46, %v1603_v47 }
  0xf4   : > { %3631 = vmatprep.mubr.bf16.mxu0 %v4795_v51  ;;  %v4820_v51 = vcombine.low %v1190_v43, %v1193_v36  ;;  %v1199_v55 = vrot.slane %v1081_v41, 6  ;;  %v4882_v1 = vrot.slane %v1793_v56, 10  ;;  %v1507_v3 = vld [vmem:[#allocation2 + $0x2c] sm:$0x1]  ;;  %v1601_v7 = vsel %vm6144_vm2, %v4849_v61, %v1600_v29  ;;  %v1505_v24 = vld [vmem:[#allocation2 + $0x24] sm:$0xe] }
  0xf5   : > { %3721 = vmatmul.mubr.bf16.gmra.mrb[20].mxu1 %v4818_v48  ;;  %v6455_v48 = vld [vmem:[#allocation2 + $0x28] sm:$0xf]  ;;  %v1203_v8 = vrot.slane %v6465_v60, 6  ;;  %v4865_v11 = vcombine.low %v1601_v7, %v1604_v62  ;;  %v1610_v22 = vrot.slane %v1507_v3, 5  ;;  %v6492_v27 = vld [vmem:[#allocation2 + $0x34] sm:$0xf] }
  0xf6   : > { %3728 = vmatprep.mubr.bf16.mxu1 %v5975_v58  ;;  %5601 = vmatpush3.bf16.msra.mxu1 %v5991_v52  ;;  %v1897_v52 = vrot.slane %v1895_v21, 4  ;;  %v1079_v58 = vld [vmem:[#allocation2 + $0x30] sm:$0xc]  ;;  %v1607_v63 = vrot.slane %v6455_v48, 5  ;;  %v1200_v6 = vsel %vm6374_vm8, %v1198_v54, %v1199_v55  ;;  %v1896_v12 = vsel %vm6374_vm8, %v4882_v1, %v1895_v21  ;;  %v6494_v31 = vld [vmem:[#allocation2 + $0x40] sm:$0xf] }
  0xf7   : > { %5602 = vmatprep.subr.bf16.mxu1 %v5994_v53  ;;  %v1898_v53 = vrot.slane %v1795_v38, 6  ;;  %v4805_v5 = vrot.slane %v1079_v58, 10  ;;  %v1205_v28 = vrot.slane %v1203_v8, 4  ;;  %v6037_v32 = vld [vmem:[%s7386_s1 + $0x200] sm:$0xff]   ;;  %v1082_v34 = vld [vmem:[#allocation2 + $0x3c] sm:$0xc] }
  0xf8   : > { %v1609_v20 = vrot.slane %v1607_v63, 4  ;;  %v6499_v21 = vld [vmem:[#allocation2 + $0x4c] sm:$0xf]  ;;  %v4850_v35 = vrot.slane %v1505_v24, 9  ;;  %v1510_v41 = vld [vmem:[#allocation2 + $0x38] sm:$0x1] }
  0xf9   : > { %v1899_v2 = vsel %vm6374_vm8, %v1897_v52, %v1898_v53  ;;  %v6481_v10 = vpop.f32.mrb[0].mxu0  ;;  %v1909_v42 = vrot.slane %v6494_v31, 6  ;;  %v1210_v47 = vrot.slane %v6499_v21, 6  ;;  %v1801_v48 = vld [vmem:[#allocation2 + $0x44] sm:$0x3]  ;;  %v1617_v60 = vrot.slane %v1510_v41, 5 }
  0xfa   : > { %5603 = vmatpush3.bf16.msra.mxu1 %v5995_v0  ;;  %v6015_v0 = vld [vmem:[%s7386_s1 + $0x1b8] sm:$0xff]   ;;  %v6488_v16 = vpop.f32.mrb[1].mxu0  ;;  %v1611_v36 = vsel %vm6144_vm2, %v1609_v20, %v1610_v22  ;;  %v1608_v46 = vsel %vm6144_vm2, %v4850_v35, %v1607_v63  ;;  %v1087_v53 = vld [vmem:[#allocation2 + $0x50] sm:$0x3]  ;;  %v5993_v55 = vld [vmem:[#allocation2 + $0x60] sm:$0xff]   ;;  %v1912_v1 = vrot.slane %v1801_v48, 6 }
  0xfb   : > { %3632 = vmatmul.mubr.bf16.gmra.mrb[40].mxu0 %v5978_v9  ;;  %5604 = vmatprep.subr.bf16.mxu1 %v5998_v4  ;;  %v1902_v4 = vrot.slane %v6463_v57, 6  ;;  %v1798_v9 = vld [vmem:[#allocation2 + $0x38] sm:$0x3]  ;;  %v6507_v38 = vpop.f32.mrb[2].mxu0  ;;  %v1085_v57 = vld [vmem:[#allocation2 + $0x48] sm:$0xc] }
  0xfc   : > { %3639 = vmatprep.mubr.bf16.mxu0 %v4796_v13  ;;  %v1084_v13 = vld [vmem:[#allocation2 + $0x44] sm:$0x3]  ;;  %v1905_v26 = vrot.slane %v1798_v9, 6  ;;  %v6512_v43 = vpop.f32.mrb[3].mxu0  ;;  %v1508_v63 = vld [vmem:[#allocation2 + $0x30] sm:$0xe] }
  0xfd   : > { %3729 = vmatmul.mubr.bf16.gmra.mrb[24].mxu1 %v4819_v19  ;;  %v4898_v19 = vcombine.low %v1896_v12, %v1899_v2  ;;  %v1904_v25 = vrot.slane %v1902_v4, 4  ;;  %v1206_v29 = vrot.slane %v1084_v13, 6  ;;  %v6530_v2 = vld [vmem:[#allocation2 + $0x40] sm:$0xf]  ;;  %v1212_v3 = vrot.slane %v1210_v47, 4  ;;  %v6020_v31 = vld [vmem:[%s7386_s1 + $0x228] sm:$0xff]  }
  0xfe   : > { %3736 = vmatprep.mubr.bf16.mxu1 %v5981_v15  ;;  %5605 = vmatpush3.bf16.msra.mxu1 %v6000_v17  ;;  %v6004_v15 = vld [vmem:[%s7386_s1 + $0x208] sm:$0xff]   ;;  %v1197_v17 = vsel %vm6374_vm8, %v4805_v5, %v1196_v37  ;;  %v1614_v37 = vrot.slane %v6492_v27, 5  ;;  %v1799_v5 = vld [vmem:[#allocation2 + $0x3c] sm:$0xc]  ;;  %v6534_v7 = vld [vmem:[#allocation2 + $0x58] sm:$0xf]  ;;  %v6567_v48 = vadd.f32 %v6512_v43, %v6507_v38 }
  0xff   : > { %5606 = vmatprep.subr.bf16.mxu1 %v6003_v18  ;;  %v5992_v18 = vld [vmem:[#allocation2 + $0x54] sm:$0xff]   ;;  %v4821_v23 = vcombine.low %v1197_v17, %v1200_v6  ;;  %v1906_v39 = vsel %vm6374_vm8, %v1904_v25, %v1905_v26  ;;  %v6532_v6 = vld [vmem:[#allocation2 + $0x4c] sm:$0xf]  ;;  %v1513_v13 = vld [vmem:[#allocation2 + $0x44] sm:$0x1]  ;;  %v1217_v26 = vrot.slane %v6534_v7, 6 }
 0x100   : > { %v1616_v58 = vrot.slane %v1614_v37, 4  ;;  %v1804_v22 = vld [vmem:[#allocation2 + $0x50] sm:$0x3]  ;;  %v1088_v21 = vld [vmem:[#allocation2 + $0x54] sm:$0xc]  ;;  %v1624_v35 = vrot.slane %v1513_v13, 5 }
 0x101   : > { %v1919_v41 = vrot.slane %v1804_v22, 6  ;;  %v1516_v43 = vld [vmem:[#allocation2 + $0x50] sm:$0x1]  ;;  %v6595_v13 = vld [vmem:[#allocation2 + $0x58] sm:$0xf] }
 0x102   : > { %5607 = vmatpush3.bf16.msra.mxu1 %v6005_v30  ;;  %v1796_v30 = vld [vmem:[#allocation2 + $0x30] sm:$0xc]  ;;  %v1618_v12 = vsel %vm6144_vm2, %v1616_v58, %v1617_v60  ;;  %v1631_v7 = vrot.slane %v1516_v43, 5 }
 0x103   : > { %3640 = vmatmul.mubr.bf16.gmra.mrb[44].mxu0 %v5984_v59  ;;  %5608 = vmatprep.subr.bf16.mxu1 %v6008_v33  ;;  %v6009_v33 = vld [vmem:[%s7386_s1 + $0x210] sm:$0xff]   ;;  %v4883_v59 = vrot.slane %v1796_v30, 10  ;;  %v1090_v30 = vld [vmem:[#allocation2 + $0x5c] sm:$0x3] }
 0x104   : > { %3873 = vmatprep.mubr.bf16.mxu0 %v4897_v45  ;;  %v1207_v45 = vsel %vm6374_vm8, %v1205_v28, %v1206_v29  ;;  %v1095_v22 = vld [vmem:[#allocation2 + $0x70] sm:$0xf] }
 0x105   : > { %3737 = vmatmul.mubr.bf16.gmra.mrb[28].mxu1 %v4820_v51  ;;  %v4866_v51 = vcombine.low %v1608_v46, %v1611_v36  ;;  %v1903_v52 = vsel %vm6374_vm8, %v4883_v59, %v1902_v4  ;;  %v1213_v4 = vrot.slane %v1087_v53, 6  ;;  %v6559_v36 = vadd.f32 %v6488_v16, %v6481_v10  ;;  %v1511_v59 = vld [vmem:[#allocation2 + $0x3c] sm:$0xe]  ;;  %v1802_v46 = vld [vmem:[#allocation2 + $0x48] sm:$0xc]  ;;  %v6023_v16 = vld [vmem:[%s7386_s1 + $0x230] sm:$0xff]  }
 0x106   : > { %3744 = vmatprep.mubr.bf16.mxu1 %v5986_v44  ;;  %5609 = vmatpush3.bf16.msra.mxu1 %v6010_v49  ;;  %v4806_v44 = vrot.slane %v1082_v34, 10  ;;  %v6014_v49 = vld [vmem:[%s7386_s1 + $0x218] sm:$0xff]   ;;  %v4899_v56 = vcombine.low %v1903_v52, %v1906_v39  ;;  %v1092_v10 = vld [vmem:[#allocation2 + $0x64] sm:$0xf]  ;;  %v1812_v43 = vld [vmem:[#allocation2 + $0x70] sm:$0xf] }
 0x107   : > { %5610 = vmatprep.subr.bf16.mxu1 %v6013_v50  ;;  %v6522_v50 = vpop.f32.mrb[4].mxu0  ;;  %v1214_v24 = vsel %vm6374_vm8, %v1212_v3, %v1213_v4  ;;  %v1224_v60 = vrot.slane %v1092_v10, 6  ;;  %v1093_v3 = vld [vmem:[#allocation2 + $0x68] sm:$0x3] }
 0x108   : > { %v1204_v54 = vsel %vm6374_vm8, %v4806_v44, %v1203_v8  ;;  %v6528_v61 = vpop.f32.mrb[5].mxu0  ;;  %v6017_v8 = vld [vmem:[%s7386_s1 + $0x220] sm:$0xff]   ;;  %v1219_v44 = vrot.slane %v1217_v26, 4 }
 0x109   : > { %v4822_v62 = vcombine.low %v1204_v54, %v1207_v45  ;;  %v5285_v9 = vpop.f32.mrb[6].mxu0  ;;  %v1220_v45 = vrot.slane %v1090_v30, 6  ;;  %v4885_v54 = vrot.slane %v1802_v46, 10 }
 0x10a   : > { %5611 = vmatpush3.bf16.msra.mxu1 %v6015_v0  ;;  %v1911_v0 = vrot.slane %v1909_v42, 4  ;;  %v5286_v17 = vpop.f32.mrb[7].mxu0 }
 0x10b   : > { %3874 = vmatmul.mubr.bf16.vlgmr.msra.gmra.mrb[48].mxu0 %v4865_v11  ;;  %v4851_v11 = vrot.slane %v1508_v63, 9  ;;  %v6586_v63 = vadd.f32 %v5286_v17, %v5285_v9  ;;  %v1805_v9 = vld [vmem:[#allocation2 + $0x54] sm:$0xc] }
 0x10c   : > { %3881 = vmatprep.mubr.bf16.mxu0 %v4898_v19  ;;  %5733 = vmatpush3.bf16.msra.mxu0 %v6037_v32  ;;  %v4884_v19 = vrot.slane %v1799_v5, 10  ;;  %v1913_v20 = vsel %vm6374_vm8, %v1911_v0, %v1912_v1  ;;  %v5996_v32 = vld [vmem:[#allocation2 + $0x6c] sm:$0xff]   ;;  %v1514_v5 = vld [vmem:[#allocation2 + $0x48] sm:$0xe] }
 0x10d   : > { %3745 = vmatmul.mubr.bf16.gmra.mrb[32].mxu1 %v4821_v23  ;;  %5734 = vmatprep.subr.bf16.mxu0 %v6004_v15  ;;  %v1916_v23 = vrot.slane %v6532_v6, 6  ;;  %v1615_v25 = vsel %vm6144_vm2, %v4851_v11, %v1614_v37 }
 0x10e   : > { %3752 = vmatprep.mubr.bf16.mxu1 %v5992_v18  ;;  %v4807_v18 = vrot.slane %v1085_v57, 10  ;;  %v4867_v28 = vcombine.low %v1615_v25, %v1618_v12  ;;  %v1910_v29 = vsel %vm6374_vm8, %v4884_v19, %v1909_v42  ;;  %v6561_v42 = vld [vmem:[#allocation2 + $0x4c] sm:$0xf]  ;;  %v1221_v57 = vsel %vm6374_vm8, %v1219_v44, %v1220_v45 }
 0x10f   : > { %v4900_v34 = vcombine.low %v1910_v29, %v1913_v20  ;;  %v1918_v39 = vrot.slane %v1916_v23, 4  ;;  %v1628_v53 = vrot.slane %v6561_v42, 5  ;;  %v1917_v1 = vsel %vm6374_vm8, %v4885_v54, %v1916_v23  ;;  %v1809_v20 = vld [vmem:[#allocation2 + $0x64] sm:$0xf]  ;;  %v1519_v29 = vld [vmem:[#allocation2 + $0x5c] sm:$0x1] }
 0x110   : > { %5735 = vmatpush3.bf16.msra.mxu0 %v6004_v15  ;;  %v1621_v15 = vrot.slane %v6530_v2, 5  ;;  %v1211_v27 = vsel %vm6374_vm8, %v4807_v18, %v1210_v47  ;;  %v6563_v47 = vld [vmem:[#allocation2 + $0x58] sm:$0xf]  ;;  %v1091_v2 = vld [vmem:[#allocation2 + $0x60] sm:$0xc]  ;;  %v1226_v18 = vrot.slane %v1224_v60, 4 }
 0x111   : > { %5736 = vmatprep.subr.bf16.mxu0 %v6009_v33  ;;  %v4823_v37 = vcombine.low %v1211_v27, %v1214_v24  ;;  %v1920_v38 = vsel %vm6374_vm8, %v1918_v39, %v1919_v41  ;;  %v1630_v6 = vrot.slane %v1628_v53, 4  ;;  %v4809_v17 = vrot.slane %v1091_v2, 10  ;;  %v1096_v39 = vld [vmem:[#allocation2 + $0x74] sm:$0x3]  ;;  %v6610_v42 = vld [vmem:[#allocation2 + $0x7c] sm:$0xf] }
 0x112   : > { %v4901_v4 = vcombine.low %v1917_v1, %v1920_v38  ;;  %v1227_v19 = vrot.slane %v1093_v3, 6  ;;  %v4853_v23 = vrot.slane %v1514_v5, 9  ;;  %v1635_v25 = vrot.slane %v6595_v13, 5  ;;  %v1517_v41 = vld [vmem:[#allocation2 + $0x54] sm:$0xe] }
 0x113   : > { %3882 = vmatmul.mubr.bf16.gmra.mrb[52].mxu0 %v4866_v51  ;;  %v4852_v51 = vrot.slane %v1511_v59, 9  ;;  %v1632_v24 = vsel %vm6144_vm2, %v1630_v6, %v1631_v7  ;;  %v1930_v30 = vrot.slane %v1809_v20, 6  ;;  %v1638_v46 = vrot.slane %v1519_v29, 5  ;;  %v1522_v3 = vld [vmem:[#allocation2 + $0x68] sm:$0x1] }
 0x114   : > { %3889 = vmatprep.mubr.bf16.mxu0 %v4899_v56  ;;  %5737 = vmatpush3.bf16.msra.mxu0 %v6009_v33  ;;  %v1623_v33 = vrot.slane %v1621_v15, 4  ;;  %v6580_v56 = vadd.f32 %v6528_v61, %v6522_v50  ;;  %v6024_v50 = vld [vmem:[%s7386_s1 + $0x238] sm:$0xff]   ;;  %v1637_v45 = vrot.slane %v1635_v25, 4  ;;  %v1234_v38 = vrot.slane %v1096_v39, 6  ;;  %v1813_v7 = vld [vmem:[#allocation2 + $0x74] sm:$0x3] }
 0x115   : > { %3753 = vmatmul.mubr.bf16.gmra.mrb[36].mxu1 %v4822_v62  ;;  %5738 = vmatprep.subr.bf16.mxu0 %v6014_v49  ;;  %v1622_v58 = vsel %vm6144_vm2, %v4852_v51, %v1621_v15  ;;  %v1807_v62 = vld [vmem:[#allocation2 + $0x5c] sm:$0x3]  ;;  %v1521_v51 = vld [vmem:[#allocation2 + $0x64] sm:$0xf]  ;;  %v1097_v13 = vld [vmem:[#allocation2 + $0x78] sm:$0xc] }
 0x116   : > { %3760 = vmatprep.mubr.bf16.mxu1 %v5993_v55  ;;  %v1625_v52 = vsel %vm6144_vm2, %v1623_v33, %v1624_v35  ;;  %v1923_v55 = vrot.slane %v6563_v47, 6  ;;  %v1926_v12 = vrot.slane %v1807_v62, 6  ;;  %v5997_v15 = vld [vmem:[#allocation2 + $0x78] sm:$0xff]   ;;  %v1808_v33 = vld [vmem:[#allocation2 + $0x60] sm:$0xc] }
 0x117   : > { %v4868_v0 = vcombine.low %v1622_v58, %v1625_v52  ;;  %v1810_v35 = vld [vmem:[#allocation2 + $0x68] sm:$0x3]  ;;  %v4887_v10 = vrot.slane %v1808_v33, 10  ;;  %v1639_v58 = vsel %vm6144_vm2, %v1637_v45, %v1638_v46  ;;  %v1520_v62 = vld [vmem:[#allocation2 + $0x60] sm:$0xe] }
 0x118   : > { %5739 = vmatpush3.bf16.msra.mxu0 %v6014_v49  ;;  %v4808_v49 = vrot.slane %v1088_v21, 10  ;;  %v1925_v11 = vrot.slane %v1923_v55, 4  ;;  %v1231_v21 = vrot.slane %v1095_v22, 6  ;;  %v6001_v52 = vld [vmem:[#allocation2 + $0x84] sm:$0xff]  }
 0x119   : > { %5740 = vmatprep.subr.bf16.mxu0 %v6017_v8  ;;  %v1931_v1 = vsel %vm6374_vm8, %v4887_v10, %v1930_v30  ;;  %v1100_v46 = vld [vmem:[#allocation2 + $0x84] sm:$0xc]  ;;  %v6006_v10 = vld [vmem:[#allocation2 + $0x9c] sm:$0xff]  }
 0x11a   : > { %v1218_v61 = vsel %vm6374_vm8, %v4808_v49, %v1217_v26  ;;  %v4886_v26 = vrot.slane %v1805_v9, 10  ;;  %v1927_v27 = vsel %vm6374_vm8, %v1925_v11, %v1926_v12  ;;  %v1933_v49 = vrot.slane %v1810_v35, 6  ;;  %v1523_v35 = vld [vmem:[#allocation2 + $0x6c] sm:$0xe] }
 0x11b   : > { %3890 = vmatmul.mubr.bf16.gmra.mrb[56].mxu0 %v4867_v28  ;;  %v1094_v28 = vld [vmem:[#allocation2 + $0x6c] sm:$0xc]  ;;  %v1233_v54 = vrot.slane %v1231_v21, 4  ;;  %v4855_v11 = vrot.slane %v1520_v62, 9 }
 0x11c   : > { %3897 = vmatprep.mubr.bf16.mxu0 %v4900_v34  ;;  %5741 = vmatpush3.bf16.msra.mxu0 %v6017_v8  ;;  %v4824_v8 = vcombine.low %v1218_v61, %v1221_v57  ;;  %v1629_v34 = vsel %vm6144_vm2, %v4853_v23, %v1628_v53  ;;  %v1924_v59 = vsel %vm6374_vm8, %v4886_v26, %v1923_v55  ;;  %v4810_v53 = vrot.slane %v1094_v28, 10  ;;  %v1099_v55 = vld [vmem:[#allocation2 + $0x80] sm:$0x3]  ;;  %v6002_v26 = vld [vmem:[#allocation2 + $0x90] sm:$0xff]   ;;  %v1815_v28 = vld [vmem:[#allocation2 + $0x7c] sm:$0xf] }
 0x11d   : > { %3761 = vmatmul.mubr.bf16.gmra.mrb[40].mxu1 %v4823_v37  ;;  %5742 = vmatprep.subr.bf16.mxu0 %v6020_v31  ;;  %v4869_v37 = vcombine.low %v1629_v34, %v1632_v24  ;;  %v4902_v44 = vcombine.low %v1924_v59, %v1927_v27  ;;  %v4854_v57 = vrot.slane %v1517_v41, 9  ;;  %v1937_v61 = vrot.slane %v1812_v43, 6  ;;  %v1524_v24 = vld [vmem:[#allocation2 + $0x70] sm:$0xf]  ;;  %v1101_v27 = vld [vmem:[#allocation2 + $0x88] sm:$0xf] }
 0x11e   : > { %3768 = vmatprep.mubr.bf16.mxu1 %v5996_v32  ;;  %v1228_v32 = vsel %vm6374_vm8, %v1226_v18, %v1227_v19  ;;  %v1235_v5 = vsel %vm6374_vm8, %v1233_v54, %v1234_v38  ;;  %v1241_v9 = vrot.slane %v1099_v55, 6  ;;  %v1645_v18 = vrot.slane %v1522_v3, 5  ;;  %v1102_v41 = vld [vmem:[#allocation2 + $0x8c] sm:$0x3] }
 0x11f   : > { %v1636_v6 = vsel %vm6144_vm2, %v4854_v57, %v1635_v25  ;;  %v1939_v22 = vrot.slane %v1937_v61, 4  ;;  %v1940_v23 = vrot.slane %v1813_v7, 6  ;;  %v4811_v25 = vrot.slane %v1097_v13, 10  ;;  %v1527_v57 = vld [vmem:[#allocation2 + $0x7c] sm:$0xf] }
 0x120   : > { %5743 = vmatpush3.bf16.msra.mxu0 %v6020_v31  ;;  %v1225_v31 = vsel %vm6374_vm8, %v4809_v17, %v1224_v60  ;;  %v1238_v60 = vrot.slane %v6610_v42, 6  ;;  %v1245_v33 = vrot.slane %v1101_v27, 6  ;;  %v1944_v59 = vrot.slane %v1815_v28, 6  ;;  %v1816_v42 = vld [vmem:[#allocation2 + $0x80] sm:$0x3]  ;;  %v6007_v28 = vld [vmem:[#allocation2 + $0xa8] sm:$0xff]  }
 0x121   : > { %5744 = vmatprep.subr.bf16.mxu0 %v6023_v16  ;;  %v4825_v47 = vcombine.low %v1225_v31, %v1228_v32  ;;  %v1649_v32 = vrot.slane %v1524_v24, 5  ;;  %v1248_v38 = vrot.slane %v1102_v41, 6  ;;  %v1947_v55 = vrot.slane %v1816_v42, 6  ;;  %v1819_v7 = vld [vmem:[#allocation2 + $0x8c] sm:$0x3] }
 0x122   : > { %v1239_v39 = vsel %vm6374_vm8, %v4811_v25, %v1238_v60  ;;  %v1247_v54 = vrot.slane %v1245_v33, 4  ;;  %v1946_v43 = vrot.slane %v1944_v59, 4  ;;  %v1530_v27 = vld [vmem:[#allocation2 + $0x88] sm:$0xf]  ;;  %v1107_v25 = vld [vmem:[#allocation2 + $0xa0] sm:$0xf] }
 0x123   : > { %3898 = vmatmul.mubr.bf16.gmra.mrb[60].mxu0 %v4868_v0  ;;  %v1642_v0 = vrot.slane %v1521_v51, 5  ;;  %v1651_v51 = vrot.slane %v1649_v32, 4  ;;  %v1108_v42 = vld [vmem:[#allocation2 + $0xa4] sm:$0x3] }
 0x124   : > { %3905 = vmatprep.mubr.bf16.mxu0 %v4901_v4  ;;  %5745 = vmatpush3.bf16.msra.mxu0 %v6023_v16  ;;  %v1932_v16 = vrot.slane %v1930_v30, 4  ;;  %v1232_v4 = vsel %vm6374_vm8, %v4810_v53, %v1231_v21  ;;  %v1941_v21 = vsel %vm6374_vm8, %v1939_v22, %v1940_v23  ;;  %v1104_v53 = vld [vmem:[#allocation2 + $0x94] sm:$0xf]  ;;  %v1249_v3 = vsel %vm6374_vm8, %v1247_v54, %v1248_v38 }
 0x125   : > { %3769 = vmatmul.mubr.bf16.gmra.mrb[44].mxu1 %v4824_v8  ;;  %5746 = vmatprep.subr.bf16.mxu0 %v6024_v50  ;;  %v4870_v8 = vcombine.low %v1636_v6, %v1639_v58  ;;  %v1644_v17 = vrot.slane %v1642_v0, 4  ;;  %v4826_v19 = vcombine.low %v1232_v4, %v1235_v5  ;;  %v1643_v30 = vsel %vm6144_vm2, %v4855_v11, %v1642_v0  ;;  %v1818_v58 = vld [vmem:[#allocation2 + $0x88] sm:$0xf]  ;;  %v1528_v5 = vld [vmem:[#allocation2 + $0x80] sm:$0x1] }
 0x126   : > { %3776 = vmatprep.mubr.bf16.mxu1 %v5997_v15  ;;  %v1934_v2 = vsel %vm6374_vm8, %v1932_v16, %v1933_v49  ;;  %v1240_v15 = vrot.slane %v1238_v60, 4  ;;  %v4856_v49 = vrot.slane %v1523_v35, 9  ;;  %v4812_v60 = vrot.slane %v1100_v46, 10 }
 0x127   : > { %v4903_v12 = vcombine.low %v1931_v1, %v1934_v2  ;;  %v1646_v31 = vsel %vm6144_vm2, %v1644_v17, %v1645_v18  ;;  %v1656_v2 = vrot.slane %v1527_v57, 5  ;;  %v1252_v4 = vrot.slane %v1104_v53, 6  ;;  %v1526_v17 = vld [vmem:[#allocation2 + $0x78] sm:$0xe]  ;;  %v1533_v57 = vld [vmem:[#allocation2 + $0x94] sm:$0xf] }
 0x128   : > { %5747 = vmatpush3.bf16.msra.mxu0 %v6024_v50  ;;  %v1811_v50 = vld [vmem:[#allocation2 + $0x6c] sm:$0xc]  ;;  %v1242_v29 = vsel %vm6374_vm8, %v1240_v15, %v1241_v9  ;;  %v4871_v45 = vcombine.low %v1643_v30, %v1646_v31  ;;  %v1650_v62 = vsel %vm6144_vm2, %v4856_v49, %v1649_v32  ;;  %v1951_v6 = vrot.slane %v1818_v58, 6  ;;  %v1820_v58 = vld [vmem:[#allocation2 + $0x90] sm:$0xc] }
 0x129   : > { %v4888_v20 = vrot.slane %v1811_v50, 10  ;;  %v1948_v50 = vsel %vm6374_vm8, %v1946_v43, %v1947_v55  ;;  %v1658_v18 = vrot.slane %v1656_v2, 4  ;;  %v1254_v22 = vrot.slane %v1252_v4, 4 }
 0x12a   : > { %v1953_v24 = vrot.slane %v1951_v6, 4  ;;  %v4857_v31 = vrot.slane %v1526_v17, 9  ;;  %v1262_v38 = vrot.slane %v1108_v42, 6 }
 0x12b   : > { %3906 = vmatmul.mubr.bf16.gmra.mrb[64].mxu0 %v4869_v37  ;;  %v1938_v34 = vsel %vm6374_vm8, %v4888_v20, %v1937_v61  ;;  %v1525_v37 = vld [vmem:[#allocation2 + $0x74] sm:$0x1]  ;;  %v1105_v61 = vld [vmem:[#allocation2 + $0x98] sm:$0x3]  ;;  %v1817_v20 = vld [vmem:[#allocation2 + $0x84] sm:$0xc] }
 0x12c   : > { %3913 = vmatprep.mubr.bf16.mxu0 %v4902_v44  ;;  %v4827_v44 = vcombine.low %v1239_v39, %v1242_v29  ;;  %v4904_v16 = vcombine.low %v1938_v34, %v1941_v21  ;;  %v1255_v23 = vrot.slane %v1105_v61, 6  ;;  %v1821_v29 = vld [vmem:[#allocation2 + $0x94] sm:$0xf]  ;;  %v4890_v34 = vrot.slane %v1817_v20, 10  ;;  %v1109_v20 = vld [vmem:[#allocation2 + $0xa8] sm:$0xc] }
 0x12d   : > { %3777 = vmatmul.mubr.bf16.gmra.mrb[48].mxu1 %v4825_v47  ;;  %v1814_v47 = vld [vmem:[#allocation2 + $0x78] sm:$0xc]  ;;  %v1663_v21 = vrot.slane %v1530_v27, 5  ;;  %v1958_v39 = vrot.slane %v1821_v29, 6  ;;  %v1657_v41 = vsel %vm6144_vm2, %v4857_v31, %v1656_v2  ;;  %v1823_v31 = vld [vmem:[#allocation2 + $0x9c] sm:$0xc] }
 0x12e   : > { %3784 = vmatprep.mubr.bf16.mxu1 %v6001_v52  ;;  %v1652_v52 = vrot.slane %v1525_v37, 5  ;;  %v4889_v1 = vrot.slane %v1814_v47, 10  ;;  %v1259_v37 = vrot.slane %v1107_v25, 6  ;;  %v1952_v47 = vsel %vm6374_vm8, %v4890_v34, %v1951_v6  ;;  %v6673_v34 = vld [vmem:[#allocation2 + $0xb8] sm:$0xf] }
 0x12f   : > { %v1960_v43 = vrot.slane %v1958_v39, 4 }
 0x130   : > { %v1653_v0 = vsel %vm6144_vm2, %v1651_v51, %v1652_v52  ;;  %v1945_v11 = vsel %vm6374_vm8, %v4889_v1, %v1944_v59  ;;  %v1531_v59 = vld [vmem:[#allocation2 + $0x8c] sm:$0x1]  ;;  %v1529_v51 = vld [vmem:[#allocation2 + $0x84] sm:$0xe]  ;;  %v1665_v52 = vrot.slane %v1663_v21, 4  ;;  %v1261_v54 = vrot.slane %v1259_v37, 4 }
 0x131   : > { %v4872_v9 = vcombine.low %v1650_v62, %v1653_v0  ;;  %v4905_v15 = vcombine.low %v1945_v11, %v1948_v50  ;;  %v1666_v53 = vrot.slane %v1531_v59, 5  ;;  %v1106_v62 = vld [vmem:[#allocation2 + $0x9c] sm:$0xc]  ;;  %v1110_v0 = vld [vmem:[#allocation2 + $0xac] sm:$0xf]  ;;  %v4858_v1 = vrot.slane %v1529_v51, 9 }
 0x132   : > { %v4891_v50 = vrot.slane %v1820_v58, 10  ;;  %v4814_v6 = vrot.slane %v1106_v62, 10  ;;  %v1825_v11 = vld [vmem:[#allocation2 + $0xa4] sm:$0x3]  ;;  %v6677_v59 = vld [vmem:[#allocation2 + $0x34] sm:$0xf] }
 0x133   : > { %3914 = vmatmul.mubr.bf16.gmra.mrb[68].mxu0 %v4870_v8  ;;  %v1246_v8 = vsel %vm6374_vm8, %v4812_v60, %v1245_v33  ;;  %v1256_v33 = vsel %vm6374_vm8, %v1254_v22, %v1255_v23  ;;  %v1824_v60 = vld [vmem:[#allocation2 + $0xa0] sm:$0xf]  ;;  %v1667_v2 = vsel %vm6144_vm2, %v1665_v52, %v1666_v53  ;;  %v1532_v22 = vld [vmem:[#allocation2 + $0x90] sm:$0xe]  ;;  %v1968_v25 = vrot.slane %v1825_v11, 6 }
 0x134   : > { %3921 = vmatprep.mubr.bf16.mxu0 %v4903_v12  ;;  %v1103_v12 = vld [vmem:[#allocation2 + $0x90] sm:$0xc]  ;;  %v4828_v13 = vcombine.low %v1246_v8, %v1249_v3  ;;  %v1670_v3 = vrot.slane %v1533_v57, 5  ;;  %v1664_v8 = vsel %vm6144_vm2, %v4858_v1, %v1663_v21  ;;  %v1260_v17 = vsel %vm6374_vm8, %v4814_v6, %v1259_v37  ;;  %v1537_v21 = vld [vmem:[#allocation2 + $0xa4] sm:$0x1] }
 0x135   : > { %3785 = vmatmul.mubr.bf16.gmra.mrb[52].mxu1 %v4826_v19  ;;  %v1659_v19 = vrot.slane %v1528_v5, 5  ;;  %v4813_v30 = vrot.slane %v1103_v12, 10  ;;  %v1965_v5 = vrot.slane %v1824_v60, 6  ;;  %v4874_v12 = vcombine.low %v1664_v8, %v1667_v2  ;;  %v1828_v51 = vld [vmem:[#allocation2 + $0xb0] sm:$0x3] }
 0x136   : > { %3792 = vmatprep.mubr.bf16.mxu1 %v6002_v26  ;;  %v1954_v26 = vrot.slane %v1819_v7, 6  ;;  %v1263_v7 = vsel %vm6374_vm8, %v1261_v54, %v1262_v38  ;;  %v1672_v23 = vrot.slane %v1670_v3, 4  ;;  %v2321_v38 = vrot.slane %v6677_v59, 5  ;;  %v2225_v57 = vld [vmem:[#allocation2 + $0x38] sm:$0x1] }
 0x137   : > { %v1660_v32 = vsel %vm6144_vm2, %v1658_v18, %v1659_v19  ;;  %v6012_v18 = vld [vmem:[#allocation2 + $0xc0] sm:$0xff]   ;;  %v4830_v27 = vcombine.low %v1260_v17, %v1263_v7  ;;  %v1539_v58 = vld [vmem:[#allocation2 + $0xac] sm:$0xf]  ;;  %v1112_v62 = vld [vmem:[#allocation2 + $0xb4] sm:$0xc]  ;;  %v1975_v2 = vrot.slane %v1828_v51, 6 }
 0x138   : > { %v1955_v35 = vsel %vm6374_vm8, %v1953_v24, %v1954_v26  ;;  %v4873_v46 = vcombine.low %v1657_v41, %v1660_v32  ;;  %v1536_v26 = vld [vmem:[#allocation2 + $0xa0] sm:$0xf]  ;;  %v1827_v32 = vld [vmem:[#allocation2 + $0xac] sm:$0xf]  ;;  %v4892_v41 = vrot.slane %v1823_v31, 10  ;;  %v2323_v8 = vrot.slane %v2321_v38, 4 }
 0x139   : > { %v4906_v49 = vcombine.low %v1952_v47, %v1955_v35  ;;  %v4859_v35 = vrot.slane %v1532_v22, 9  ;;  %v2223_v7 = vld [vmem:[#allocation2 + $0x30] sm:$0xe]  ;;  %v1684_v11 = vrot.slane %v1539_v58, 5  ;;  %v4816_v17 = vrot.slane %v1112_v62, 10 }
 0x13a   : > { %v1966_v53 = vsel %vm6374_vm8, %v4892_v41, %v1965_v5  ;;  %v2228_v31 = vld [vmem:[#allocation2 + $0x44] sm:$0x1]  ;;  %v1829_v59 = vld [vmem:[#allocation2 + $0xb4] sm:$0xc] }
 0x13b   : > { %3922 = vmatmul.mubr.bf16.gmra.mrb[72].mxu0 %v4871_v45  ;;  %v1253_v45 = vsel %vm6374_vm8, %v4813_v30, %v1252_v4  ;;  %v1534_v4 = vld [vmem:[#allocation2 + $0x98] sm:$0x1]  ;;  %v1671_v47 = vsel %vm6144_vm2, %v4859_v35, %v1670_v3  ;;  %v6016_v3 = vld [vmem:[#allocation2 + $0xcc] sm:$0xff]  }
 0x13c   : > { %3929 = vmatprep.mubr.bf16.mxu0 %v4904_v16  ;;  %v6011_v16 = vld [vmem:[#allocation2 + $0xb4] sm:$0xff]   ;;  %v1673_v24 = vrot.slane %v1534_v4, 5 }
 0x13d   : > { %3793 = vmatmul.mubr.bf16.gmra.mrb[56].mxu1 %v4827_v44  ;;  %v1822_v44 = vld [vmem:[#allocation2 + $0x98] sm:$0x3] }
 0x13e   : > { %3800 = vmatprep.mubr.bf16.mxu1 %v6006_v10  ;;  %v4829_v10 = vcombine.low %v1253_v45, %v1256_v33  ;;  %v1961_v55 = vrot.slane %v1822_v44, 6  ;;  %v1677_v33 = vrot.slane %v1536_v26, 5  ;;  %v1674_v37 = vsel %vm6144_vm2, %v1672_v23, %v1673_v24  ;;  %v1114_v44 = vld [vmem:[#allocation2 + $0xbc] sm:$0x3] }
 0x13f   : > { %v1972_v45 = vrot.slane %v1827_v32, 6  ;;  %v4875_v52 = vcombine.low %v1671_v47, %v1674_v37  ;;  %v4929_v26 = vrot.slane %v2223_v7, 9  ;;  %v1543_v47 = vld [vmem:[#allocation2 + $0xbc] sm:$0x1]  ;;  %v2231_v7 = vld [vmem:[#allocation2 + $0x50] sm:$0x1] }
 0x140   : > { %v1962_v61 = vsel %vm6374_vm8, %v1960_v43, %v1961_v55  ;;  %v1679_v54 = vrot.slane %v1677_v33, 4  ;;  %v1694_v62 = vrot.slane %v1543_v47, 5 }
 0x141   : > { %v1974_v1 = vrot.slane %v1972_v45, 4  ;;  %v2322_v37 = vsel %vm6144_vm2, %v4929_v26, %v2321_v38  ;;  %v2233_v26 = vld [vmem:[#allocation2 + $0x58] sm:$0xf] }
 0x143   : > { %3930 = vmatmul.mubr.bf16.gmra.mrb[76].mxu0 %v4872_v9  ;;  %v1266_v9 = vrot.slane %v1110_v0, 6  ;;  %v1826_v0 = vld [vmem:[#allocation2 + $0xa8] sm:$0xc] }
 0x144   : > { %3937 = vmatprep.mubr.bf16.mxu0 %v4905_v15  ;;  %v1111_v15 = vld [vmem:[#allocation2 + $0xb0] sm:$0x3] }
 0x145   : > { %3801 = vmatmul.mubr.bf16.gmra.mrb[60].mxu1 %v4828_v13  ;;  %v1959_v13 = vsel %vm6374_vm8, %v4891_v50, %v1958_v39  ;;  %v1268_v29 = vrot.slane %v1266_v9, 4  ;;  %v1269_v30 = vrot.slane %v1111_v15, 6  ;;  %v4815_v39 = vrot.slane %v1109_v20, 10  ;;  %v2227_v15 = vld [vmem:[#allocation2 + $0x40] sm:$0xf] }
 0x146   : > { %3808 = vmatprep.mubr.bf16.mxu1 %v6007_v28  ;;  %v4907_v19 = vcombine.low %v1959_v13, %v1962_v61  ;;  %v1967_v28 = vrot.slane %v1965_v5, 4  ;;  %v1276_v61 = vrot.slane %v1114_v44, 6  ;;  %v1830_v5 = vld [vmem:[#allocation2 + $0xb8] sm:$0xf]  ;;  %v1540_v13 = vld [vmem:[#allocation2 + $0xb0] sm:$0x1] }
 0x147   : > { %v1267_v43 = vsel %vm6374_vm8, %v4815_v39, %v1266_v9  ;;  %v2324_v9 = vrot.slane %v2225_v57, 5  ;;  %v1979_v20 = vrot.slane %v1830_v5, 6  ;;  %v2328_v32 = vrot.slane %v2227_v15, 5 }
 0x148   : > { %v1969_v42 = vsel %vm6374_vm8, %v1967_v28, %v1968_v25  ;;  %v1831_v28 = vld [vmem:[#allocation2 + $0xbc] sm:$0x3] }
 0x149   : > { %v4908_v55 = vcombine.low %v1966_v53, %v1969_v42  ;;  %v2325_v25 = vsel %vm6144_vm2, %v2323_v8, %v2324_v9  ;;  %v1981_v39 = vrot.slane %v1979_v20, 4  ;;  %v1982_v41 = vrot.slane %v1831_v28, 6  ;;  %v2226_v42 = vld [vmem:[#allocation2 + $0x3c] sm:$0xe]  ;;  %v1545_v8 = vld [vmem:[#allocation2 + $0xc4] sm:$0xf] }
 0x14a   : > { %v4945_v44 = vcombine.low %v2322_v37, %v2325_v25 }
 0x14b   : > { %3938 = vmatmul.mubr.bf16.gmra.mrb[80].mxu0 %v4873_v46  ;;  %v1270_v46 = vsel %vm6374_vm8, %v1268_v29, %v1269_v30  ;;  %v1686_v29 = vrot.slane %v1684_v11, 4  ;;  %v1687_v30 = vrot.slane %v1540_v13, 5  ;;  %v1983_v38 = vsel %vm6374_vm8, %v1981_v39, %v1982_v41  ;;  %v2229_v13 = vld [vmem:[#allocation2 + $0x48] sm:$0xe]  ;;  %v2234_v41 = vld [vmem:[#allocation2 + $0x5c] sm:$0x1] }
 0x14c   : > { %3945 = vmatprep.mubr.bf16.mxu0 %v4906_v49  ;;  %v1680_v49 = vrot.slane %v1537_v21, 5  ;;  %v4831_v60 = vcombine.low %v1267_v43, %v1270_v46  ;;  %v2331_v46 = vrot.slane %v2228_v31, 5  ;;  %v1541_v43 = vld [vmem:[#allocation2 + $0xb4] sm:$0xe]  ;;  %v4931_v31 = vrot.slane %v2229_v13, 9 }
 0x14d   : > { %3809 = vmatmul.mubr.bf16.gmra.mrb[64].mxu1 %v4829_v10  ;;  %v1273_v10 = vrot.slane %v6673_v34, 6  ;;  %v4862_v5 = vrot.slane %v1541_v43, 9 }
 0x14e   : > { %3816 = vmatprep.mubr.bf16.mxu1 %v6011_v16  ;;  %v1535_v16 = vld [vmem:[#allocation2 + $0x9c] sm:$0xe]  ;;  %v1681_v6 = vsel %vm6144_vm2, %v1679_v54, %v1680_v49  ;;  %v2330_v49 = vrot.slane %v2328_v32, 4  ;;  %v4894_v54 = vrot.slane %v1829_v59, 10  ;;  %v2342_v59 = vrot.slane %v2233_v26, 5 }
 0x14f   : > { %v1275_v50 = vrot.slane %v1273_v10, 4  ;;  %v4860_v4 = vrot.slane %v1535_v16, 9  ;;  %v1274_v34 = vsel %vm6374_vm8, %v4816_v17, %v1273_v10  ;;  %v1833_v16 = vld [vmem:[#allocation2 + $0xc4] sm:$0xf]  ;;  %v1688_v10 = vsel %vm6144_vm2, %v1686_v29, %v1687_v30  ;;  %v1544_v17 = vld [vmem:[#allocation2 + $0xc0] sm:$0xe] }
 0x150   : > { %v1986_v57 = vrot.slane %v1833_v16, 6 }
 0x151   : > { %v1277_v22 = vsel %vm6374_vm8, %v1275_v50, %v1276_v61 }
 0x152   : > { %v4832_v35 = vcombine.low %v1274_v34, %v1277_v22  ;;  %v2338_v22 = vrot.slane %v2231_v7, 5  ;;  %v1835_v34 = vld [vmem:[#allocation2 + $0xcc] sm:$0xc] }
 0x153   : > { %3946 = vmatmul.mubr.bf16.gmra.mrb[84].mxu0 %v4874_v12  ;;  %v4893_v12 = vrot.slane %v1826_v0, 10  ;;  %v1834_v0 = vld [vmem:[#allocation2 + $0xc8] sm:$0x3] }
 0x154   : > { %3953 = vmatprep.mubr.bf16.mxu0 %v4907_v19  ;;  %v1976_v19 = vsel %vm6374_vm8, %v1974_v1, %v1975_v2  ;;  %v6018_v1 = vld [vmem:[#allocation2 + $0x30] sm:$0xff]   ;;  %v1980_v2 = vsel %vm6374_vm8, %v4894_v54, %v1979_v20  ;;  %v2344_v54 = vrot.slane %v2342_v59, 4 }
 0x155   : > { %3817 = vmatmul.mubr.bf16.gmra.mrb[68].mxu1 %v4830_v27  ;;  %v1973_v24 = vsel %vm6374_vm8, %v4893_v12, %v1972_v45  ;;  %v1538_v27 = vld [vmem:[#allocation2 + $0xa8] sm:$0xe]  ;;  %v1989_v12 = vrot.slane %v1834_v0, 6 }
 0x156   : > { %3824 = vmatprep.mubr.bf16.mxu1 %v6012_v18  ;;  %v1678_v18 = vsel %vm6144_vm2, %v4860_v4, %v1677_v33  ;;  %v4909_v21 = vcombine.low %v1973_v24, %v1976_v19  ;;  %v1542_v33 = vld [vmem:[#allocation2 + $0xb8] sm:$0xf]  ;;  %v4861_v45 = vrot.slane %v1538_v27, 9  ;;  %v4910_v4 = vcombine.low %v1980_v2, %v1983_v38 }
 0x157   : > { %v4876_v23 = vcombine.low %v1678_v18, %v1681_v6  ;;  %v1691_v51 = vrot.slane %v1542_v33, 5  ;;  %v1836_v18 = vld [vmem:[#allocation2 + $0xd0] sm:$0xf]  ;;  %v1698_v24 = vrot.slane %v1545_v8, 5  ;;  %v2345_v38 = vrot.slane %v2234_v41, 5 }
 0x158   : > { %v1685_v53 = vsel %vm6144_vm2, %v4861_v45, %v1684_v11  ;;  %v1988_v11 = vrot.slane %v1986_v57, 4  ;;  %v1993_v29 = vrot.slane %v1836_v18, 6  ;;  %v2237_v8 = vld [vmem:[#allocation2 + $0x68] sm:$0x1]  ;;  %v2238_v41 = vld [vmem:[#allocation2 + $0x6c] sm:$0xe] }
 0x159   : > { %v4877_v58 = vcombine.low %v1685_v53, %v1688_v10  ;;  %v1693_v50 = vrot.slane %v1691_v51, 4  ;;  %v1692_v27 = vsel %vm6144_vm2, %v4862_v5, %v1691_v51  ;;  %v2232_v51 = vld [vmem:[#allocation2 + $0x54] sm:$0xe] }
 0x15a   : > { %v1990_v25 = vsel %vm6374_vm8, %v1988_v11, %v1989_v12  ;;  %v1995_v47 = vrot.slane %v1993_v29, 4  ;;  %v4932_v2 = vrot.slane %v2232_v51, 9  ;;  %v2515_v11 = vld [vmem:[#allocation2 + $0x40] sm:$0xf]  ;;  %v6021_v12 = vld [vmem:[#allocation2 + $0x48] sm:$0xff]  }
 0x15b   : > { %3954 = vmatmul.mubr.bf16.gmra.mrb[88].mxu0 %v4875_v52  ;;  %v2230_v52 = vld [vmem:[#allocation2 + $0x4c] sm:$0xf]  ;;  %v1695_v19 = vsel %vm6144_vm2, %v1693_v50, %v1694_v62 }
 0x15c   : > { %3961 = vmatprep.mubr.bf16.mxu0 %v4908_v55  ;;  %v1832_v55 = vld [vmem:[#allocation2 + $0xc0] sm:$0xc]  ;;  %v2335_v61 = vrot.slane %v2230_v52, 5  ;;  %v4878_v30 = vcombine.low %v1692_v27, %v1695_v19  ;;  %v2512_v52 = vld [vmem:[#allocation2 + $0x34] sm:$0xf]  ;;  %v2343_v13 = vsel %vm6144_vm2, %v4932_v2, %v2342_v59 }
 0x15d   : > { %3825 = vmatmul.mubr.bf16.gmra.mrb[72].mxu1 %v4831_v60  ;;  %v4930_v60 = vrot.slane %v2226_v42, 9  ;;  %v4895_v6 = vrot.slane %v1832_v55, 10  ;;  %v1548_v42 = vld [vmem:[#allocation2 + $0xd0] sm:$0xf]  ;;  %v2236_v55 = vld [vmem:[#allocation2 + $0x64] sm:$0xf] }
 0x15e   : > { %3832 = vmatprep.mubr.bf16.mxu1 %v6016_v3  ;;  %v2332_v3 = vsel %vm6144_vm2, %v2330_v49, %v2331_v46  ;;  %v2337_v20 = vrot.slane %v2335_v61, 4  ;;  %v2336_v45 = vsel %vm6144_vm2, %v4931_v31, %v2335_v61  ;;  %v4896_v46 = vrot.slane %v1835_v34, 10  ;;  %v2513_v61 = vld [vmem:[#allocation2 + $0x38] sm:$0x3] }
 0x15f   : > { %v2329_v9 = vsel %vm6144_vm2, %v4930_v60, %v2328_v32  ;;  %v1987_v28 = vsel %vm6374_vm8, %v4895_v6, %v1986_v57  ;;  %v4863_v32 = vrot.slane %v1544_v17, 9  ;;  %v1705_v43 = vrot.slane %v1548_v42, 5  ;;  %v1547_v57 = vld [vmem:[#allocation2 + $0xcc] sm:$0xe] }
 0x160   : > { %v4946_v15 = vcombine.low %v2329_v9, %v2332_v3  ;;  %v2339_v33 = vsel %vm6144_vm2, %v2337_v20, %v2338_v22  ;;  %v4911_v39 = vcombine.low %v1987_v28, %v1990_v25  ;;  %v1994_v60 = vsel %vm6374_vm8, %v4896_v46, %v1993_v29  ;;  %v2235_v3 = vld [vmem:[#allocation2 + $0x60] sm:$0xe]  ;;  %v2516_v25 = vld [vmem:[#allocation2 + $0x44] sm:$0x3]  ;;  %v2239_v29 = vld [vmem:[#allocation2 + $0x70] sm:$0xf] }
 0x161   : > { %v4947_v10 = vcombine.low %v2336_v45, %v2339_v33  ;;  %v1699_v49 = vsel %vm6144_vm2, %v4863_v32, %v1698_v24  ;;  %v2609_v0 = vrot.slane %v2512_v52, 6  ;;  %v2349_v50 = vrot.slane %v2236_v55, 5  ;;  %v2514_v45 = vld [vmem:[#allocation2 + $0x3c] sm:$0xc]  ;;  %v2240_v46 = vld [vmem:[#allocation2 + $0x74] sm:$0x1] }
 0x162   : > { %v4864_v5 = vrot.slane %v1547_v57, 9  ;;  %v1707_v6 = vrot.slane %v1705_v43, 4  ;;  %v2612_v18 = vrot.slane %v2513_v61, 6  ;;  %v2352_v22 = vrot.slane %v2237_v8, 5 }
 0x163   : > { %3962 = vmatmul.mubr.bf16.gmra.mrb[92].mxu0 %v4876_v23  ;;  %v1546_v23 = vld [vmem:[#allocation2 + $0xc8] sm:$0x1]  ;;  %v2611_v17 = vrot.slane %v2609_v0, 4  ;;  %v2351_v20 = vrot.slane %v2349_v50, 4  ;;  %v2616_v28 = vrot.slane %v2515_v11, 6  ;;  %v2356_v42 = vrot.slane %v2239_v29, 5 }
 0x164   : > { %3969 = vmatprep.mubr.bf16.mxu0 %v4909_v21  ;;  %v1837_v21 = vld [vmem:[#allocation2 + $0xd4] sm:$0x3]  ;;  %v1701_v37 = vrot.slane %v1546_v23, 5  ;;  %v2511_v23 = vld [vmem:[#allocation2 + $0x30] sm:$0xc]  ;;  %v1706_v26 = vsel %vm6144_vm2, %v4864_v5, %v1705_v43  ;;  %v4934_v52 = vrot.slane %v2238_v41, 9 }
 0x165   : > { %3833 = vmatmul.mubr.bf16.gmra.mrb[76].mxu1 %v4832_v35  ;;  %v1700_v35 = vrot.slane %v1698_v24, 4  ;;  %v1996_v16 = vrot.slane %v1837_v21, 6  ;;  %v2518_v24 = vld [vmem:[#allocation2 + $0x4c] sm:$0xf]  ;;  %v2613_v31 = vsel %vm6374_vm8, %v2611_v17, %v2612_v18  ;;  %v2353_v33 = vsel %vm6144_vm2, %v2351_v20, %v2352_v22  ;;  %v2243_v22 = vld [vmem:[#allocation2 + $0x80] sm:$0x1] }
 0x166   : > { %4034 = vmatprep.mubr.bf16.mxu1 %v4945_v44  ;;  %v6019_v44 = vld [vmem:[#allocation2 + $0x3c] sm:$0xff]   ;;  %v2623_v32 = vrot.slane %v2518_v24, 6  ;;  %v2618_v59 = vrot.slane %v2616_v28, 4  ;;  %v2358_v55 = vrot.slane %v2356_v42, 4  ;;  %v2359_v57 = vrot.slane %v2240_v46, 5 }
 0x167   : > { %v1702_v53 = vsel %vm6144_vm2, %v1700_v35, %v1701_v37  ;;  %v1997_v62 = vsel %vm6374_vm8, %v1995_v47, %v1996_v16  ;;  %v2519_v35 = vld [vmem:[#allocation2 + $0x50] sm:$0x3]  ;;  %v6022_v47 = vld [vmem:[#allocation2 + $0x54] sm:$0xff]  }
 0x168   : > { %v4912_v9 = vcombine.low %v1994_v60, %v1997_v62  ;;  %v2625_v16 = vrot.slane %v2623_v32, 4  ;;  %v6760_v60 = vld [vmem:[#allocation2 + $0x7c] sm:$0xf]  ;;  %v2360_v8 = vsel %vm6144_vm2, %v2358_v55, %v2359_v57 }
 0x16b   : > { %3970 = vmatmul.mubr.bf16.gmra.mrb[96].mxu0 %v4877_v58  ;;  %v1549_v58 = vld [vmem:[#allocation2 + $0xd4] sm:$0x1] }
 0x16c   : > { %3977 = vmatprep.mubr.bf16.mxu0 %v4910_v4  ;;  %v2346_v4 = vsel %vm6144_vm2, %v2344_v54, %v2345_v38  ;;  %v1708_v7 = vrot.slane %v1549_v58, 5  ;;  %v2524_v54 = vld [vmem:[#allocation2 + $0x64] sm:$0xf]  ;;  %v4962_v38 = vrot.slane %v2514_v45, 10 }
 0x16d   : > { %4035 = vmatmul.mubr.bf16.vlgmr.msra.gmra.mrb[80].mxu1 %v6018_v1  ;;  %v4879_v1 = vcombine.low %v1699_v49, %v1702_v53  ;;  %v4948_v19 = vcombine.low %v2343_v13, %v2346_v4  ;;  %v6755_v49 = vld [vmem:[#allocation2 + $0x58] sm:$0xf]  ;;  %v2517_v53 = vld [vmem:[#allocation2 + $0x48] sm:$0xc]  ;;  %v2357_v4 = vsel %vm6144_vm2, %v4934_v52, %v2356_v42  ;;  %v2520_v13 = vld [vmem:[#allocation2 + $0x54] sm:$0xc] }
 0x16e   : > { %4042 = vmatprep.mubr.bf16.mxu1 %v4946_v15  ;;  %v4933_v15 = vrot.slane %v2235_v3, 9  ;;  %v1709_v27 = vsel %vm6144_vm2, %v1707_v6, %v1708_v7  ;;  %v2630_v58 = vrot.slane %v6755_v49, 6  ;;  %v2617_v62 = vsel %vm6374_vm8, %v4962_v38, %v2616_v28  ;;  %v2522_v3 = vld [vmem:[#allocation2 + $0x5c] sm:$0x3]  ;;  %v2523_v6 = vld [vmem:[#allocation2 + $0x60] sm:$0xc] }
 0x16f   : > { %v4880_v34 = vcombine.low %v1706_v26, %v1709_v27  ;;  %v2525_v7 = vld [vmem:[#allocation2 + $0x68] sm:$0x3]  ;;  %v2633_v20 = vrot.slane %v2522_v3, 6  ;;  %v4965_v26 = vrot.slane %v2523_v6, 10  ;;  %v4950_v29 = vcombine.low %v2357_v4, %v2360_v8  ;;  %v2526_v42 = vld [vmem:[#allocation2 + $0x6c] sm:$0xc] }
 0x170   : > { %v2350_v21 = vsel %vm6144_vm2, %v4933_v15, %v2349_v50  ;;  %v2637_v50 = vrot.slane %v2524_v54, 6  ;;  %v2363_v15 = vrot.slane %v6760_v60, 5  ;;  %v2640_v28 = vrot.slane %v2525_v7, 6  ;;  %v2529_v4 = vld [vmem:[#allocation2 + $0x78] sm:$0xc] }
 0x171   : > { %v4949_v51 = vcombine.low %v2350_v21, %v2353_v33  ;;  %v4964_v21 = vrot.slane %v2520_v13, 10  ;;  %v4966_v55 = vrot.slane %v2526_v42, 10  ;;  %v2244_v6 = vld [vmem:[#allocation2 + $0x84] sm:$0xe] }
 0x172   : > { %v2639_v27 = vrot.slane %v2637_v50, 4 }
 0x173   : > { %3978 = vmatmul.mubr.bf16.gmra.mrb[100].mxu0 %v4878_v30  ;;  %v4961_v30 = vrot.slane %v2511_v23, 10  ;;  %v6025_v23 = vld [vmem:[#allocation2 + $0x60] sm:$0xff]   ;;  %v2631_v46 = vsel %vm6374_vm8, %v4964_v21, %v2630_v58 }
 0x174   : > { %3985 = vmatprep.mubr.bf16.mxu0 %v4911_v39  ;;  %v2619_v39 = vrot.slane %v2516_v25, 6  ;;  %v2527_v25 = vld [vmem:[#allocation2 + $0x70] sm:$0xf] }
 0x175   : > { %4043 = vmatmul.mubr.bf16.gmra.mrb[84].mxu1 %v6019_v44  ;;  %v2610_v37 = vsel %vm6374_vm8, %v4961_v30, %v2609_v0  ;;  %v4963_v0 = vrot.slane %v2517_v53, 10  ;;  %v2530_v30 = vld [vmem:[#allocation2 + $0x7c] sm:$0xf] }
 0x176   : > { %4050 = vmatprep.mubr.bf16.mxu1 %v4947_v10  ;;  %v4977_v44 = vcombine.low %v2610_v37, %v2613_v31  ;;  %v2626_v10 = vrot.slane %v2519_v35, 6  ;;  %v2620_v43 = vsel %vm6374_vm8, %v2618_v59, %v2619_v39  ;;  %v2241_v31 = vld [vmem:[#allocation2 + $0x78] sm:$0xe]  ;;  %v2644_v35 = vrot.slane %v2527_v25, 6  ;;  %v6779_v37 = vld [vmem:[#allocation2 + $0x88] sm:$0xf] }
 0x177   : > { %v4978_v61 = vcombine.low %v2617_v62, %v2620_v43  ;;  %v2638_v59 = vsel %vm6374_vm8, %v4965_v26, %v2637_v50  ;;  %v2641_v39 = vsel %vm6374_vm8, %v2639_v27, %v2640_v28  ;;  %v2651_v45 = vrot.slane %v2530_v30, 6  ;;  %v2246_v62 = vld [vmem:[#allocation2 + $0x8c] sm:$0x1]  ;;  %v6796_v50 = vld [vmem:[#allocation2 + $0x88] sm:$0xf] }
 0x178   : > { %v2370_v54 = vrot.slane %v6779_v37, 5  ;;  %v4981_v38 = vcombine.low %v2638_v59, %v2641_v39  ;;  %v2646_v57 = vrot.slane %v2644_v35, 4  ;;  %v2373_v8 = vrot.slane %v2246_v62, 5 }
 0x179   : > { %v2658_v13 = vrot.slane %v6796_v50, 6  ;;  %v2540_v50 = vld [vmem:[#allocation2 + $0xa4] sm:$0x3] }
 0x17a   : > { %v2372_v7 = vrot.slane %v2370_v54, 4 }
 0x17b   : > { %3986 = vmatmul.mubr.bf16.gmra.mrb[104].mxu0 %v4879_v1  ;;  %v2627_v1 = vsel %vm6374_vm8, %v2625_v16, %v2626_v10  ;;  %v2531_v10 = vld [vmem:[#allocation2 + $0x80] sm:$0x3] }
 0x17c   : > { %3993 = vmatprep.mubr.bf16.mxu0 %v4912_v9  ;;  %v2624_v9 = vsel %vm6374_vm8, %v4963_v0, %v2623_v32  ;;  %v2365_v32 = vrot.slane %v2363_v15, 4  ;;  %v6026_v0 = vld [vmem:[#allocation2 + $0x6c] sm:$0xff]   ;;  %v2654_v3 = vrot.slane %v2531_v10, 6  ;;  %v2374_v27 = vsel %vm6144_vm2, %v2372_v7, %v2373_v8  ;;  %v6028_v8 = vld [vmem:[#allocation2 + $0x84] sm:$0xff]  }
 0x17d   : > { %4051 = vmatmul.mubr.bf16.gmra.mrb[88].mxu1 %v6021_v12  ;;  %v4979_v17 = vcombine.low %v2624_v9, %v2627_v1  ;;  %v2645_v9 = vsel %vm6374_vm8, %v4966_v55, %v2644_v35  ;;  %v6027_v35 = vld [vmem:[#allocation2 + $0x78] sm:$0xff]   ;;  %v6821_v10 = vld [vmem:[#allocation2 + $0xac] sm:$0xf]  ;;  %v2543_v7 = vld [vmem:[#allocation2 + $0xb0] sm:$0x3] }
 0x17e   : > { %4058 = vmatprep.mubr.bf16.mxu1 %v4948_v19  ;;  %v2632_v19 = vrot.slane %v2630_v58, 4 }
 0x180   : > { %v2634_v33 = vsel %vm6374_vm8, %v2632_v19, %v2633_v20  ;;  %v2534_v19 = vld [vmem:[#allocation2 + $0x8c] sm:$0x3] }
 0x181   : > { %v4980_v49 = vcombine.low %v2631_v46, %v2634_v33  ;;  %v2661_v21 = vrot.slane %v2534_v19, 6  ;;  %v2249_v33 = vld [vmem:[#allocation2 + $0x98] sm:$0x1]  ;;  %v2538_v19 = vld [vmem:[#allocation2 + $0x9c] sm:$0xc] }
 0x183   : > { %3994 = vmatmul.mubr.bf16.gmra.mrb[108].mxu0 %v4880_v34  ;;  %v2366_v34 = vrot.slane %v2243_v22, 5  ;;  %v4936_v22 = vrot.slane %v2244_v6, 9 }
 0x184   : > { %5748 = vmatprep.mubr.bf16.mxu0 %v4977_v44  ;;  %v2528_v44 = vld [vmem:[#allocation2 + $0x74] sm:$0x3] }
 0x185   : > { %4059 = vmatmul.mubr.bf16.gmra.mrb[92].mxu1 %v6022_v47  ;;  %v4935_v47 = vrot.slane %v2241_v31, 9  ;;  %v2647_v60 = vrot.slane %v2528_v44, 6  ;;  %v2371_v37 = vsel %vm6144_vm2, %v4936_v22, %v2370_v54  ;;  %v6819_v44 = vld [vmem:[#allocation2 + $0xa0] sm:$0xf] }
 0x186   : > { %4066 = vmatprep.mubr.bf16.mxu1 %v4949_v51  ;;  %v2367_v51 = vsel %vm6144_vm2, %v2365_v32, %v2366_v34  ;;  %v2660_v34 = vrot.slane %v2658_v13, 4  ;;  %v2672_v62 = vrot.slane %v6819_v44, 6 }
 0x187   : > { %v2364_v58 = vsel %vm6144_vm2, %v4935_v47, %v2363_v15  ;;  %v6805_v15 = vld [vmem:[#allocation2 + $0x94] sm:$0xf] }
 0x188   : > { %v2377_v30 = vrot.slane %v6805_v15, 5  ;;  %v2674_v22 = vrot.slane %v2672_v62, 4 }
 0x189   : > { %v5288_v2 = vpop.f32.mrb[8].mxu0 }
 0x18a   : > { %v5289_v5 = vpop.f32.mrb[9].mxu0  ;;  %v2379_v54 = vrot.slane %v2377_v30, 4 }
 0x18b   : > { %v6772_v11 = vadd.f32 %v5289_v5, %v5288_v2  ;;  %v5291_v12 = vpop.f32.mrb[10].mxu0  ;;  %5749 = vmatmul.mubr.bf16.vlgmr.msra.gmra.mrb[112].mxu0 %v4978_v61  ;;  %v2653_v2 = vrot.slane %v2651_v45, 4  ;;  %v4951_v61 = vcombine.low %v2364_v58, %v2367_v51  ;;  %v6798_v5 = vld [vmem:[#allocation2 + $0x94] sm:$0xf] }
 0x18c   : > { %v5292_v18 = vpop.f32.mrb[11].mxu0  ;;  %5752 = vmatprep.mubr.bf16.mxu0 %v4979_v17  ;;  %v4967_v17 = vrot.slane %v2529_v4, 10  ;;  %v2665_v20 = vrot.slane %v6798_v5, 6 }
 0x18d   : > { %v6775_v24 = vadd.f32 %v5292_v18, %v5291_v12  ;;  %4067 = vmatmul.mubr.bf16.gmra.mrb[96].mxu1 %v6025_v23  ;;  %v2648_v12 = vsel %vm6374_vm8, %v2646_v57, %v2647_v60  ;;  %v2655_v18 = vsel %vm6374_vm8, %v2653_v2, %v2654_v3  ;;  %v2537_v23 = vld [vmem:[#allocation2 + $0x98] sm:$0x3]  ;;  %v2662_v60 = vsel %vm6374_vm8, %v2660_v34, %v2661_v21 }
 0x18e   : > { %4074 = vmatprep.mubr.bf16.mxu1 %v4950_v29  ;;  %v4982_v26 = vcombine.low %v2645_v9, %v2648_v12  ;;  %v2652_v28 = vsel %vm6374_vm8, %v4967_v17, %v2651_v45  ;;  %v2532_v29 = vld [vmem:[#allocation2 + $0x84] sm:$0xc]  ;;  %v2668_v42 = vrot.slane %v2537_v23, 6  ;;  %v4952_v45 = vcombine.low %v2371_v37, %v2374_v27  ;;  %v2541_v27 = vld [vmem:[#allocation2 + $0xa8] sm:$0xc] }
 0x18f   : > { %v4983_v31 = vcombine.low %v2652_v28, %v2655_v18  ;;  %v4968_v57 = vrot.slane %v2532_v29, 10  ;;  %v2675_v23 = vrot.slane %v2540_v50, 6  ;;  %v6846_v29 = vld [vmem:[#allocation2 + $0xb8] sm:$0xf]  ;;  %v4970_v21 = vrot.slane %v2538_v19, 10 }
 0x190   : > { %v2686_v44 = vrot.slane %v6846_v29, 6  ;;  %v6868_v50 = vld [vmem:[#allocation2 + $0xa8] sm:$0xe] }
 0x191   : > { %v5294_v41 = vpop.f32.mrb[12].mxu0  ;;  %v2659_v5 = vsel %vm6374_vm8, %v4968_v57, %v2658_v13  ;;  %v2547_v57 = vld [vmem:[#allocation2 + $0xc0] sm:$0xc] }
 0x192   : > { %v5295_v16 = vpop.f32.mrb[13].mxu0  ;;  %v4984_v9 = vcombine.low %v2659_v5, %v2662_v60  ;;  %v2549_v60 = vld [vmem:[#allocation2 + $0xc8] sm:$0x3]  ;;  %v2255_v5 = vld [vmem:[#allocation2 + $0xb0] sm:$0x1] }
 0x193   : > { %v6789_v52 = vadd.f32 %v5295_v16, %v5294_v41  ;;  %v5297_v53 = vpop.f32.mrb[14].mxu0  ;;  %5753 = vmatmul.mubr.bf16.gmra.mrb[116].mxu0 %v4980_v49  ;;  %v2667_v41 = vrot.slane %v2665_v20, 4  ;;  %v2535_v16 = vld [vmem:[#allocation2 + $0x90] sm:$0xc]  ;;  %v2394_v29 = vrot.slane %v2255_v5, 5 }
 0x194   : > { %v5298_v43 = vpop.f32.mrb[15].mxu0  ;;  %5756 = vmatprep.mubr.bf16.mxu0 %v4981_v38  ;;  %v2380_v38 = vrot.slane %v2249_v33, 5  ;;  %v4969_v2 = vrot.slane %v2535_v16, 10  ;;  %v2250_v33 = vld [vmem:[#allocation2 + $0x9c] sm:$0xe] }
 0x195   : > { %v6794_v1 = vadd.f32 %v5298_v43, %v5297_v53  ;;  %4075 = vmatmul.mubr.bf16.gmra.mrb[100].mxu1 %v6026_v0  ;;  %v2247_v53 = vld [vmem:[#allocation2 + $0x90] sm:$0xe]  ;;  %v6830_v0 = vld [vmem:[#allocation2 + $0xa0] sm:$0xf]  ;;  %v2669_v3 = vsel %vm6374_vm8, %v2667_v41, %v2668_v42  ;;  %v2676_v41 = vsel %vm6374_vm8, %v2674_v22, %v2675_v23  ;;  %v4971_v42 = vrot.slane %v2541_v27, 10 }
 0x196   : > { %4082 = vmatprep.mubr.bf16.mxu1 %v4951_v61  ;;  %v2679_v61 = vrot.slane %v6821_v10, 6  ;;  %v4937_v6 = vrot.slane %v2247_v53, 9  ;;  %v2381_v12 = vsel %vm6144_vm2, %v2379_v54, %v2380_v38  ;;  %v2666_v15 = vsel %vm6374_vm8, %v4969_v2, %v2665_v20  ;;  %v6848_v20 = vld [vmem:[#allocation2 + $0xc4] sm:$0xf]  ;;  %v2544_v16 = vld [vmem:[#allocation2 + $0xb4] sm:$0xc] }
 0x197   : > { %v2384_v17 = vrot.slane %v6830_v0, 5  ;;  %v4985_v18 = vcombine.low %v2666_v15, %v2669_v3  ;;  %v2546_v10 = vld [vmem:[#allocation2 + $0xbc] sm:$0x3]  ;;  %v2673_v38 = vsel %vm6374_vm8, %v4970_v21, %v2672_v62  ;;  %v6029_v62 = vld [vmem:[#allocation2 + $0x90] sm:$0xff]   ;;  %v2553_v21 = vld [vmem:[#allocation2 + $0xd8] sm:$0xc] }
 0x198   : > { %v2378_v13 = vsel %vm6144_vm2, %v4937_v6, %v2377_v30  ;;  %v2681_v28 = vrot.slane %v2679_v61, 4  ;;  %v2680_v3 = vsel %vm6374_vm8, %v4971_v42, %v2679_v61  ;;  %v2689_v15 = vrot.slane %v2546_v10, 6 }
 0x199   : > { %v5300_v25 = vpop.f32.mrb[16].mxu0  ;;  %v4973_v61 = vrot.slane %v2547_v57, 10 }
 0x19a   : > { %v5301_v32 = vpop.f32.mrb[17].mxu0 }
 0x19b   : > { %5757 = vmatmul.mubr.bf16.gmra.mrb[120].mxu0 %v4982_v26  ;;  %v6817_v59 = vadd.f32 %v5301_v32, %v5300_v25  ;;  %v5303_v39 = vpop.f32.mrb[18].mxu0  ;;  %v2252_v26 = vld [vmem:[#allocation2 + $0xa4] sm:$0x1]  ;;  %v2682_v25 = vrot.slane %v2543_v7, 6 }
 0x19c   : > { %5760 = vmatprep.mubr.bf16.mxu0 %v4983_v31  ;;  %v5304_v47 = vpop.f32.mrb[19].mxu0  ;;  %v4953_v31 = vcombine.low %v2378_v13, %v2381_v12  ;;  %v2387_v37 = vrot.slane %v2252_v26, 5  ;;  %v2688_v12 = vrot.slane %v2686_v44, 4  ;;  %v2696_v26 = vrot.slane %v2549_v60, 6  ;;  %v2551_v13 = vld [vmem:[#allocation2 + $0xd0] sm:$0xf] }
 0x19d   : > { %v5348_v46 = vpop.f32.mrb[0].mxu1  ;;  %4083 = vmatmul.mubr.bf16.gmra.mrb[104].mxu1 %v6027_v35  ;;  %v6823_v51 = vadd.f32 %v5304_v47, %v5303_v39  ;;  %v2386_v35 = vrot.slane %v2384_v17, 4  ;;  %v2683_v47 = vsel %vm6374_vm8, %v2681_v28, %v2682_v25  ;;  %v4972_v25 = vrot.slane %v2544_v16, 10 }
 0x19e   : > { %v5349_v49 = vpop.f32.mrb[1].mxu1  ;;  %4090 = vmatprep.mubr.bf16.mxu1 %v4952_v45  ;;  %v6855_v45 = vld [vmem:[#allocation2 + $0xac] sm:$0xf]  ;;  %v4975_v60 = vrot.slane %v2553_v21, 10  ;;  %v2256_v21 = vld [vmem:[#allocation2 + $0xb4] sm:$0xe] }
 0x19f   : > { %v6825_v43 = vadd.f32 %v5349_v49, %v5348_v46  ;;  %v5351_v55 = vpop.f32.mrb[2].mxu1  ;;  %v2693_v49 = vrot.slane %v6848_v20, 6  ;;  %v2388_v2 = vsel %vm6144_vm2, %v2386_v35, %v2387_v37  ;;  %v2391_v6 = vrot.slane %v6855_v45, 5 }
 0x1a0   : > { %v5352_v58 = vpop.f32.mrb[3].mxu1  ;;  %v2690_v35 = vsel %vm6374_vm8, %v2688_v12, %v2689_v15  ;;  %v4939_v37 = vrot.slane %v6868_v50, 9  ;;  %v2687_v45 = vsel %vm6374_vm8, %v4972_v25, %v2686_v44  ;;  %v2557_v50 = vld [vmem:[#allocation2 + $0xe8] sm:$0xf]  ;;  %v2258_v15 = vld [vmem:[#allocation2 + $0xbc] sm:$0x1] }
 0x1a1   : > { %v6835_v4 = vadd.f32 %v5352_v58, %v5351_v55  ;;  %v4938_v55 = vrot.slane %v2250_v33, 9  ;;  %v4986_v58 = vcombine.low %v2673_v38, %v2676_v41  ;;  %v2695_v23 = vrot.slane %v2693_v49, 4  ;;  %v2555_v41 = vld [vmem:[#allocation2 + $0xe0] sm:$0x3] }
 0x1a2   : > { %v2393_v20 = vrot.slane %v2391_v6, 4  ;;  %v2401_v25 = vrot.slane %v2258_v15, 5 }
 0x1a3   : > { %5761 = vmatmul.mubr.bf16.gmra.mrb[124].mxu0 %v4984_v9  ;;  %v4987_v9 = vcombine.low %v2680_v3, %v2683_v47  ;;  %v2385_v22 = vsel %vm6144_vm2, %v4938_v55, %v2384_v17  ;;  %v2697_v47 = vsel %vm6374_vm8, %v2695_v23, %v2696_v26  ;;  %v2556_v26 = vld [vmem:[#allocation2 + $0xe4] sm:$0xc] }
 0x1a4   : > { %5764 = vmatprep.mubr.bf16.mxu0 %v4985_v18  ;;  %v5306_v32 = vpop.f32.mrb[20].mxu0  ;;  %v6873_v18 = vld [vmem:[#allocation2 + $0xdc] sm:$0xf]  ;;  %v4954_v28 = vcombine.low %v2385_v22, %v2388_v2  ;;  %v4988_v2 = vcombine.low %v2687_v45, %v2690_v35  ;;  %v2395_v44 = vsel %vm6144_vm2, %v2393_v20, %v2394_v29  ;;  %v2392_v22 = vsel %vm6144_vm2, %v4939_v37, %v2391_v6 }
 0x1a5   : > { %4091 = vmatmul.mubr.bf16.gmra.mrb[108].mxu1 %v6028_v8  ;;  %v5307_v34 = vpop.f32.mrb[21].mxu0  ;;  %v2707_v33 = vrot.slane %v6873_v18, 6  ;;  %v4955_v23 = vcombine.low %v2392_v22, %v2395_v44  ;;  %v4976_v37 = vrot.slane %v2556_v26, 10  ;;  %v2259_v44 = vld [vmem:[#allocation2 + $0xc0] sm:$0xe] }
 0x1a6   : > { %4098 = vmatprep.mubr.bf16.mxu1 %v4953_v31  ;;  %v6850_v39 = vadd.f32 %v5307_v34, %v5306_v32  ;;  %v5309_v30 = vpop.f32.mrb[22].mxu0  ;;  %v2550_v31 = vld [vmem:[#allocation2 + $0xcc] sm:$0xc]  ;;  %v2552_v32 = vld [vmem:[#allocation2 + $0xd4] sm:$0x3] }
 0x1a7   : > { %v5310_v46 = vpop.f32.mrb[23].mxu0  ;;  %v6879_v34 = vld [vmem:[#allocation2 + $0xb8] sm:$0xf]  ;;  %v4974_v16 = vrot.slane %v2550_v31, 10  ;;  %v2703_v55 = vrot.slane %v2552_v32, 6  ;;  %v2709_v3 = vrot.slane %v2707_v33, 4  ;;  %v2708_v29 = vsel %vm6374_vm8, %v4975_v60, %v2707_v33 }
 0x1a8   : > { %v5354_v53 = vpop.f32.mrb[4].mxu1  ;;  %v6860_v54 = vadd.f32 %v5310_v46, %v5309_v30  ;;  %v2700_v30 = vrot.slane %v2551_v13, 6  ;;  %v2694_v46 = vsel %vm6374_vm8, %v4973_v61, %v2693_v49  ;;  %v2398_v57 = vrot.slane %v6879_v34, 5  ;;  %v2558_v32 = vld [vmem:[#allocation2 + $0xec] sm:$0x3] }
 0x1a9   : > { %v5355_v0 = vpop.f32.mrb[5].mxu1  ;;  %v2710_v49 = vrot.slane %v2555_v41, 6  ;;  %v2714_v13 = vrot.slane %v2557_v50, 6  ;;  %v6031_v50 = vld [vmem:[#allocation2 + $0xa8] sm:$0xff]  }
 0x1aa   : > { %v6871_v7 = vadd.f32 %v5355_v0, %v5354_v53  ;;  %v5357_v8 = vpop.f32.mrb[6].mxu1  ;;  %v2702_v12 = vrot.slane %v2700_v30, 4  ;;  %v2701_v6 = vsel %vm6374_vm8, %v4974_v16, %v2700_v30 }
 0x1ab   : > { %v5358_v19 = vpop.f32.mrb[7].mxu1  ;;  %5765 = vmatmul.mubr.bf16.gmra.mrb[128].mxu0 %v4986_v58  ;;  %v2711_v31 = vsel %vm6374_vm8, %v2709_v3, %v2710_v49  ;;  %v2261_v3 = vld [vmem:[#allocation2 + $0xc8] sm:$0x1]  ;;  %v2715_v15 = vsel %vm6374_vm8, %v4976_v37, %v2714_v13  ;;  %v2262_v37 = vld [vmem:[#allocation2 + $0xcc] sm:$0xe] }
 0x1ac   : > { %v6877_v27 = vadd.f32 %v5358_v19, %v5357_v8  ;;  %5768 = vmatprep.mubr.bf16.mxu0 %v4987_v9  ;;  %v4989_v9 = vcombine.low %v2694_v46, %v2697_v47  ;;  %v6030_v19 = vld [vmem:[#allocation2 + $0x9c] sm:$0xff]   ;;  %v2704_v34 = vsel %vm6374_vm8, %v2702_v12, %v2703_v55  ;;  %v4991_v45 = vcombine.low %v2708_v29, %v2711_v31 }
 0x1ad   : > { %4099 = vmatmul.mubr.bf16.gmra.mrb[112].mxu1 %v6029_v62  ;;  %v2716_v46 = vrot.slane %v2714_v13, 4  ;;  %v2717_v47 = vrot.slane %v2558_v32, 6  ;;  %v4990_v60 = vcombine.low %v2701_v6, %v2704_v34 }
 0x1ae   : > { %4106 = vmatprep.mubr.bf16.mxu1 %v4954_v28  ;;  %v5312_v17 = vpop.f32.mrb[24].mxu0  ;;  %v2400_v28 = vrot.slane %v2398_v57, 4 }
 0x1af   : > { %v5313_v42 = vpop.f32.mrb[25].mxu0 }
 0x1b0   : > { %v5360_v10 = vpop.f32.mrb[8].mxu1  ;;  %v6891_v53 = vadd.f32 %v5313_v42, %v5312_v17  ;;  %v5315_v38 = vpop.f32.mrb[26].mxu0  ;;  %v2260_v17 = vld [vmem:[#allocation2 + $0xc4] sm:$0xf]  ;;  %v2402_v30 = vsel %vm6144_vm2, %v2400_v28, %v2401_v25  ;;  %v2263_v28 = vld [vmem:[#allocation2 + $0xd0] sm:$0xf] }
 0x1b1   : > { %v5361_v0 = vpop.f32.mrb[9].mxu1  ;;  %v5316_v58 = vpop.f32.mrb[27].mxu0  ;;  %v2405_v16 = vrot.slane %v2260_v17, 5  ;;  %v2412_v34 = vrot.slane %v2263_v28, 5 }
 0x1b2   : > { %v6896_v5 = vadd.f32 %v5361_v0, %v5360_v10  ;;  %v5363_v8 = vpop.f32.mrb[10].mxu1  ;;  %v6898_v62 = vadd.f32 %v5316_v58, %v5315_v38  ;;  %v4940_v0 = vrot.slane %v2256_v21, 9 }
 0x1b3   : > { %v5364_v18 = vpop.f32.mrb[11].mxu1  ;;  %5769 = vmatmul.mubr.bf16.gmra.mrb[132].mxu0 %v4988_v2  ;;  %v2407_v22 = vrot.slane %v2405_v16, 4 }
 0x1b4   : > { %v6902_v61 = vadd.f32 %v5364_v18, %v5363_v8  ;;  %5772 = vmatprep.mubr.bf16.mxu0 %v4989_v9  ;;  %v2399_v8 = vsel %vm6144_vm2, %v4940_v0, %v2398_v57  ;;  %v2718_v18 = vsel %vm6374_vm8, %v2716_v46, %v2717_v47  ;;  %v2414_v0 = vrot.slane %v2412_v34, 4 }
 0x1b5   : > { %4107 = vmatmul.mubr.bf16.gmra.mrb[116].mxu1 %v6030_v19  ;;  %v4956_v12 = vcombine.low %v2399_v8, %v2402_v30  ;;  %v4941_v19 = vrot.slane %v2259_v44, 9  ;;  %v4992_v29 = vcombine.low %v2715_v15, %v2718_v18 }
 0x1b6   : > { %4114 = vmatprep.mubr.bf16.mxu1 %v4955_v23  ;;  %v5318_v20 = vpop.f32.mrb[28].mxu0  ;;  %v2408_v23 = vrot.slane %v2261_v3, 5 }
 0x1b7   : > { %v5319_v35 = vpop.f32.mrb[29].mxu0  ;;  %v2406_v13 = vsel %vm6144_vm2, %v4941_v19, %v2405_v16 }
 0x1b8   : > { %v5366_v41 = vpop.f32.mrb[12].mxu1  ;;  %v6912_v42 = vadd.f32 %v5319_v35, %v5318_v20  ;;  %v5321_v33 = vpop.f32.mrb[30].mxu0  ;;  %v2409_v14 = vsel %vm6144_vm2, %v2407_v22, %v2408_v23 }
 0x1b9   : > { %v5367_v10 = vpop.f32.mrb[13].mxu1  ;;  %v5322_v38 = vpop.f32.mrb[31].mxu0 }
 0x1ba   : > { %v6916_v55 = vadd.f32 %v5367_v10, %v5366_v41  ;;  %v5369_v58 = vpop.f32.mrb[14].mxu1  ;;  %v6918_v2 = vadd.f32 %v5322_v38, %v5321_v33  ;;  %v2264_v41 = vld [vmem:[#allocation2 + $0xd4] sm:$0x1]  ;;  %v4957_v10 = vcombine.low %v2406_v13, %v2409_v14  ;;  %v2266_v38 = vld [vmem:[#allocation2 + $0xdc] sm:$0xf] }
 0x1bb   : > { %v5370_v49 = vpop.f32.mrb[15].mxu1  ;;  %5773 = vmatmul.mubr.bf16.gmra.mrb[136].mxu0 %v4990_v60  ;;  %v4942_v60 = vrot.slane %v2262_v37, 9  ;;  %v2415_v30 = vrot.slane %v2264_v41, 5  ;;  %v2419_v3 = vrot.slane %v2266_v38, 5  ;;  %v2270_v38 = vld [vmem:[#allocation2 + $0xec] sm:$0x1] }
 0x1bc   : > { %v6922_v9 = vadd.f32 %v5370_v49, %v5369_v58  ;;  %5776 = vmatprep.mubr.bf16.mxu0 %v4991_v45  ;;  %v6032_v45 = vld [vmem:[#allocation2 + $0xb4] sm:$0xff]  }
 0x1bd   : > { %4115 = vmatmul.mubr.bf16.gmra.mrb[120].mxu1 %v6031_v50  ;;  %v2413_v18 = vsel %vm6144_vm2, %v4942_v60, %v2412_v34  ;;  %v2416_v19 = vsel %vm6144_vm2, %v2414_v0, %v2415_v30 }
 0x1be   : > { %4122 = vmatprep.mubr.bf16.mxu1 %v4956_v12  ;;  %v5324_v26 = vpop.f32.mrb[32].mxu0  ;;  %v2267_v12 = vld [vmem:[#allocation2 + $0xe0] sm:$0x1]  ;;  %v4958_v14 = vcombine.low %v2413_v18, %v2416_v19 }
 0x1bf   : > { %v5325_v25 = vpop.f32.mrb[33].mxu0 }
 0x1c0   : > { %v5388_v57 = vpop.f32.mrb[16].mxu1  ;;  %v6928_v31 = vadd.f32 %v5325_v25, %v5324_v26  ;;  %v5327_v32 = vpop.f32.mrb[34].mxu0  ;;  %v6033_v25 = vld [vmem:[#allocation2 + $0xc0] sm:$0xff]  }
 0x1c1   : > { %v5389_v20 = vpop.f32.mrb[17].mxu1  ;;  %v5328_v6 = vpop.f32.mrb[35].mxu0 }
 0x1c2   : > { %v5390_v21 = vadd.f32 %v5389_v20, %v5388_v57  ;;  %v5391_v17 = vpop.f32.mrb[18].mxu1  ;;  %v6934_v35 = vadd.f32 %v5328_v6, %v5327_v32  ;;  %v2421_v57 = vrot.slane %v2419_v3, 4  ;;  %v2422_v32 = vrot.slane %v2267_v12, 5  ;;  %v2269_v6 = vld [vmem:[#allocation2 + $0xe8] sm:$0xf] }
 0x1c3   : > { %v5392_v33 = vpop.f32.mrb[19].mxu1  ;;  %5777 = vmatmul.mubr.bf16.gmra.mrb[140].mxu0 %v4992_v29  ;;  %v2429_v12 = vrot.slane %v2270_v38, 5 }
 0x1c4   : > { %v6937_v46 = vadd.f32 %v5390_v21, %v6559_v36  ;;  %v5393_v47 = vadd.f32 %v5392_v33, %v5391_v17  ;;  %v2265_v36 = vld [vmem:[#allocation2 + $0xd8] sm:$0xe]  ;;  %v2423_v41 = vsel %vm6144_vm2, %v2421_v57, %v2422_v32  ;;  %v2426_v33 = vrot.slane %v2269_v6, 5 }
 0x1c5   : > { %4123 = vmatmul.mubr.bf16.gmra.mrb[124].mxu1 %v6032_v45  ;;  %v4943_v29 = vrot.slane %v2265_v36, 9 }
 0x1c6   : > { %v6940_v16 = vadd.f32 %v5393_v47, %v6567_v48  ;;  %4130 = vmatprep.mubr.bf16.mxu1 %v4957_v10  ;;  %v5330_v58 = vpop.f32.mrb[36].mxu0  ;;  %v2268_v10 = vld [vmem:[#allocation2 + $0xe4] sm:$0xe]  ;;  %v2428_v36 = vrot.slane %v2426_v33, 4 }
 0x1c7   : > { %v5331_v44 = vpop.f32.mrb[37].mxu0  ;;  %v2420_v37 = vsel %vm6144_vm2, %v4943_v29, %v2419_v3  ;;  %v4944_v3 = vrot.slane %v2268_v10, 9 }
 0x1c8   : > { %v5394_v49 = vpop.f32.mrb[20].mxu1  ;;  %v6942_v50 = vadd.f32 %v5331_v44, %v5330_v58  ;;  %v5333_v8 = vpop.f32.mrb[38].mxu0  ;;  %v4959_v44 = vcombine.low %v2420_v37, %v2423_v41 }
 0x1c9   : > { %v5395_v15 = vpop.f32.mrb[21].mxu1  ;;  %v5334_v22 = vpop.f32.mrb[39].mxu0 }
 0x1ca   : > { %v5396_v48 = vadd.f32 %v5395_v15, %v5394_v49  ;;  %v5397_v23 = vpop.f32.mrb[22].mxu1  ;;  %v6948_v26 = vadd.f32 %v5334_v22, %v5333_v8  ;;  %v6034_v8 = vld [vmem:[#allocation2 + $0xcc] sm:$0xff]  }
 0x1cb   : > { %v5398_v28 = vpop.f32.mrb[23].mxu1 }
 0x1cc   : > { %v6951_v20 = vadd.f32 %v5396_v48, %v6580_v56  ;;  %v5399_v13 = vadd.f32 %v5398_v28, %v5397_v23  ;;  %v2427_v23 = vsel %vm6144_vm2, %v4944_v3, %v2426_v33  ;;  %v2430_v28 = vsel %vm6144_vm2, %v2428_v36, %v2429_v12 }
 0x1cd   : > { %4131 = vmatmul.mubr.bf16.gmra.mrb[128].mxu1 %v6033_v25 }
 0x1ce   : > { %v6954_v34 = vadd.f32 %v5399_v13, %v6586_v63  ;;  %4138 = vmatprep.mubr.bf16.mxu1 %v4958_v14  ;;  %v5336_v21 = vpop.f32.mrb[40].mxu0  ;;  %v6035_v13 = vld [vmem:[#allocation2 + $0xd8] sm:$0xff]  }
 0x1cf   : > { %v5337_v17 = vpop.f32.mrb[41].mxu0 }
 0x1d0   : > { %v5400_v45 = vpop.f32.mrb[24].mxu1  ;;  %v6960_v56 = vadd.f32 %v5337_v17, %v5336_v21  ;;  %v5339_v47 = vpop.f32.mrb[42].mxu0  ;;  %v4960_v21 = vcombine.low %v2427_v23, %v2430_v28 }
 0x1d1   : > { %v5401_v60 = vpop.f32.mrb[25].mxu1  ;;  %v5340_v0 = vpop.f32.mrb[43].mxu0 }
 0x1d2   : > { %v5402_v63 = vadd.f32 %v5401_v60, %v5400_v45  ;;  %v5403_v30 = vpop.f32.mrb[26].mxu1  ;;  %v6962_v58 = vadd.f32 %v5340_v0, %v5339_v47 }
 0x1d3   : > { %v5404_v49 = vpop.f32.mrb[27].mxu1 }
 0x1d4   : > { %v6965_v15 = vadd.f32 %v5402_v63, %v6772_v11  ;;  %v5405_v18 = vadd.f32 %v5404_v49, %v5403_v30  ;;  %v6036_v63 = vld [vmem:[#allocation2 + $0xe4] sm:$0xff]  }
 0x1d5   : > { %4139 = vmatmul.mubr.bf16.gmra.mrb[132].mxu1 %v6034_v8 }
 0x1d6   : > { %v6968_v19 = vadd.f32 %v5405_v18, %v6775_v24  ;;  %v5342_v22 = vpop.f32.mrb[44].mxu0  ;;  %4146 = vmatprep.mubr.bf16.mxu1 %v4959_v44 }
 0x1d7   : > { %v5343_v48 = vpop.f32.mrb[45].mxu0 }
 0x1d8   : > { %v5406_v25 = vpop.f32.mrb[28].mxu1  ;;  %v6974_v29 = vadd.f32 %v5343_v48, %v5342_v22  ;;  %v5345_v57 = vpop.f32.mrb[46].mxu0 }
 0x1d9   : > { %v5407_v11 = vpop.f32.mrb[29].mxu1  ;;  %v5346_v32 = vpop.f32.mrb[47].mxu0 }
 0x1da   : > { %v5408_v14 = vadd.f32 %v5407_v11, %v5406_v25  ;;  %v5409_v6 = vpop.f32.mrb[30].mxu1  ;;  %v6976_v24 = vadd.f32 %v5346_v32, %v5345_v57 }
 0x1db   : > { %v5410_v17 = vpop.f32.mrb[31].mxu1 }
 0x1dc   : > { %v6979_v37 = vadd.f32 %v5408_v14, %v6789_v52  ;;  %v5411_v41 = vadd.f32 %v5410_v17, %v5409_v6 }
 0x1dd   : > { %4147 = vmatmul.mubr.bf16.gmra.mrb[136].mxu1 %v6035_v13 }
 0x1de   : > { %v6982_v40 = vadd.f32 %v5411_v41, %v6794_v1  ;;  %v5500_v33 = vpop.f32.mrb[48].mxu0  ;;  %4154 = vmatprep.mubr.bf16.mxu1 %v4960_v21 }
 0x1df   : > { %v5501_v45 = vpop.f32.mrb[49].mxu0 }
 0x1e0   : > { %v5412_v47 = vpop.f32.mrb[32].mxu1  ;;  %v5502_v10 = vadd.f32 %v5501_v45, %v5500_v33  ;;  %v5503_v38 = vpop.f32.mrb[50].mxu0 }
 0x1e1   : > { %v5413_v60 = vpop.f32.mrb[33].mxu1  ;;  %v5504_v0 = vpop.f32.mrb[51].mxu0 }
 0x1e2   : > { %v5414_v30 = vadd.f32 %v5413_v60, %v5412_v47  ;;  %v6985_v44 = vadd.f32 %v5502_v10, %v6937_v46  ;;  %v5415_v52 = vpop.f32.mrb[34].mxu1  ;;  %v5505_v49 = vadd.f32 %v5504_v0, %v5503_v38 }
 0x1e3   : > { %v5416_v8 = vpop.f32.mrb[35].mxu1 }
 0x1e4   : > { %v3747_v3 = vadd.f32 %v5414_v30, %v6817_v59  ;;  %v5417_v1 = vadd.f32 %v5416_v8, %v5415_v52  ;;  %v6989_v36 = vadd.f32 %v5505_v49, %v6940_v16 }
 0x1e5   : > { %4155 = vmatmul.mubr.bf16.gmra.mrb[140].mxu1 %v6036_v63 }
 0x1e6   : > { %v6992_v12 = vadd.f32 %v5417_v1, %v6823_v51  ;;  %v5506_v18 = vpop.f32.mrb[52].mxu0 }
 0x1e7   : > { %v5507_v22 = vpop.f32.mrb[53].mxu0 }
 0x1e8   : > { %v5418_v48 = vpop.f32.mrb[36].mxu1  ;;  %v5508_v23 = vadd.f32 %v5507_v22, %v5506_v18  ;;  %v5509_v28 = vpop.f32.mrb[54].mxu0 }
 0x1e9   : > { %v5419_v46 = vpop.f32.mrb[37].mxu1  ;;  %v5510_v25 = vpop.f32.mrb[55].mxu0 }
 0x1ea   : > { %v5420_v57 = vadd.f32 %v5419_v46, %v5418_v48  ;;  %v6995_v11 = vadd.f32 %v5508_v23, %v6951_v20  ;;  %v5421_v59 = vpop.f32.mrb[38].mxu1  ;;  %v5511_v32 = vadd.f32 %v5510_v25, %v5509_v28 }
 0x1eb   : > { %v5422_v13 = vpop.f32.mrb[39].mxu1 }
 0x1ec   : > { %v3755_v16 = vadd.f32 %v5420_v57, %v6850_v39  ;;  %v5423_v14 = vadd.f32 %v5422_v13, %v5421_v59  ;;  %v6999_v51 = vadd.f32 %v5511_v32, %v6954_v34 }
 0x1ee   : > { %v7002_v6 = vadd.f32 %v5423_v14, %v6860_v54  ;;  %v5512_v21 = vpop.f32.mrb[56].mxu0 }
 0x1ef   : > { %v5513_v17 = vpop.f32.mrb[57].mxu0 }
 0x1f0   : > { %v5424_v41 = vpop.f32.mrb[40].mxu1  ;;  %v5514_v33 = vadd.f32 %v5513_v17, %v5512_v21  ;;  %v5515_v45 = vpop.f32.mrb[58].mxu0 }
 0x1f1   : > { %v5425_v47 = vpop.f32.mrb[41].mxu1  ;;  %v5516_v20 = vpop.f32.mrb[59].mxu0 }
 0x1f2   : > { %v5426_v10 = vadd.f32 %v5425_v47, %v5424_v41  ;;  %v7005_v38 = vadd.f32 %v5514_v33, %v6965_v15  ;;  %v5427_v60 = vpop.f32.mrb[42].mxu1  ;;  %v5517_v39 = vadd.f32 %v5516_v20, %v5515_v45 }
 0x1f3   : > { %v5428_v0 = vpop.f32.mrb[43].mxu1 }
 0x1f4   : > { %v3763_v34 = vadd.f32 %v5426_v10, %v6891_v53  ;;  %v5429_v63 = vadd.f32 %v5428_v0, %v5427_v60  ;;  %v7009_v54 = vadd.f32 %v5517_v39, %v6968_v19 }
 0x1f6   : > { %v7012_v30 = vadd.f32 %v5429_v63, %v6898_v62  ;;  %v5518_v52 = vpop.f32.mrb[60].mxu0 }
 0x1f7   : > { %v5519_v49 = vpop.f32.mrb[61].mxu0 }
 0x1f8   : > { %v5430_v8 = vpop.f32.mrb[44].mxu1  ;;  %v5520_v1 = vadd.f32 %v5519_v49, %v5518_v52  ;;  %v5521_v18 = vpop.f32.mrb[62].mxu0 }
 0x1f9   : > { %v5431_v22 = vpop.f32.mrb[45].mxu1  ;;  %v5522_v15 = vpop.f32.mrb[63].mxu0 }
 0x1fa   : > { %v5432_v48 = vadd.f32 %v5431_v22, %v5430_v8  ;;  %v7015_v23 = vadd.f32 %v5520_v1, %v6979_v37  ;;  %v5433_v28 = vpop.f32.mrb[46].mxu1  ;;  %v5523_v53 = vadd.f32 %v5522_v15, %v5521_v18 }
 0x1fb   : > { %v5434_v46 = vpop.f32.mrb[47].mxu1 }
 0x1fc   : > { %v3771_v19 = vadd.f32 %v5432_v48, %v6912_v42  ;;  %v5435_v25 = vadd.f32 %v5434_v46, %v5433_v28  ;;  %v7019_v62 = vadd.f32 %v5523_v53, %v6982_v40 }
 0x1fe   : > { %v7022_v57 = vadd.f32 %v5435_v25, %v6918_v2  ;;  %v5524_v59 = vpop.f32.mrb[64].mxu0 }
 0x1ff   : > { %v5525_v32 = vpop.f32.mrb[65].mxu0 }
 0x200   : > { %v5436_v13 = vpop.f32.mrb[48].mxu1  ;;  %v5526_v14 = vadd.f32 %v5525_v32, %v5524_v59  ;;  %v5527_v21 = vpop.f32.mrb[66].mxu0 }
 0x201   : > { %v5437_v17 = vpop.f32.mrb[49].mxu1  ;;  %v5528_v37 = vpop.f32.mrb[67].mxu0 }
 0x202   : > { %v5438_v41 = vadd.f32 %v5437_v17, %v5436_v13  ;;  %v7024_v33 = vadd.f32 %v5526_v14, %v3747_v3  ;;  %v5439_v45 = vpop.f32.mrb[50].mxu1  ;;  %v5529_v47 = vadd.f32 %v5528_v37, %v5527_v21 }
 0x203   : > { %v5440_v42 = vpop.f32.mrb[51].mxu1 }
 0x204   : > { %v3779_v20 = vadd.f32 %v5438_v41, %v6928_v31  ;;  %v5441_v40 = vadd.f32 %v5440_v42, %v5439_v45  ;;  %v7028_v10 = vadd.f32 %v5529_v47, %v6992_v12 }
 0x206   : > { %v7031_v2 = vadd.f32 %v5441_v40, %v6934_v35  ;;  %v5530_v60 = vpop.f32.mrb[68].mxu0 }
 0x207   : > { %v5531_v39 = vpop.f32.mrb[69].mxu0 }
 0x208   : > { %v5442_v0 = vpop.f32.mrb[52].mxu1  ;;  %v5532_v63 = vadd.f32 %v5531_v39, %v5530_v60  ;;  %v5533_v52 = vpop.f32.mrb[70].mxu0 }
 0x209   : > { %v5443_v49 = vpop.f32.mrb[53].mxu1  ;;  %v5534_v3 = vpop.f32.mrb[71].mxu0 }
 0x20a   : > { %v5444_v8 = vadd.f32 %v5443_v49, %v5442_v0  ;;  %v7033_v1 = vadd.f32 %v5532_v63, %v3755_v16  ;;  %v5445_v18 = vpop.f32.mrb[54].mxu1  ;;  %v5535_v22 = vadd.f32 %v5534_v3, %v5533_v52 }
 0x20b   : > { %v5446_v31 = vpop.f32.mrb[55].mxu1 }
 0x20c   : > { %v3787_v15 = vadd.f32 %v5444_v8, %v6942_v50  ;;  %v5447_v12 = vadd.f32 %v5446_v31, %v5445_v18  ;;  %v7037_v48 = vadd.f32 %v5535_v22, %v7002_v6 }
 0x20e   : > { %v7040_v35 = vadd.f32 %v5447_v12, %v6948_v26  ;;  %v5536_v28 = vpop.f32.mrb[72].mxu0 }
 0x20f   : > { %v5537_v53 = vpop.f32.mrb[73].mxu0 }
 0x210   : > { %v5448_v46 = vpop.f32.mrb[56].mxu1  ;;  %v5538_v25 = vadd.f32 %v5537_v53, %v5536_v28  ;;  %v5539_v59 = vpop.f32.mrb[74].mxu0 }
 0x211   : > { %v5449_v32 = vpop.f32.mrb[57].mxu1  ;;  %v5540_v16 = vpop.f32.mrb[75].mxu0 }
 0x212   : > { %v5450_v13 = vadd.f32 %v5449_v32, %v5448_v46  ;;  %v7042_v14 = vadd.f32 %v5538_v25, %v3763_v34  ;;  %v5451_v21 = vpop.f32.mrb[58].mxu1  ;;  %v5541_v17 = vadd.f32 %v5540_v16, %v5539_v59 }
 0x213   : > { %v5452_v50 = vpop.f32.mrb[59].mxu1 }
 0x214   : > { %v3795_v37 = vadd.f32 %v5450_v13, %v6960_v56  ;;  %v5453_v6 = vadd.f32 %v5452_v50, %v5451_v21  ;;  %v7046_v41 = vadd.f32 %v5541_v17, %v7012_v30 }
 0x216   : > { %v7049_v26 = vadd.f32 %v5453_v6, %v6962_v58  ;;  %v5542_v45 = vpop.f32.mrb[76].mxu0 }
 0x217   : > { %v5543_v47 = vpop.f32.mrb[77].mxu0 }
 0x218   : > { %v5454_v42 = vpop.f32.mrb[60].mxu1  ;;  %v5544_v40 = vadd.f32 %v5543_v47, %v5542_v45  ;;  %v5545_v60 = vpop.f32.mrb[78].mxu0 }
 0x219   : > { %v5455_v39 = vpop.f32.mrb[61].mxu1  ;;  %v5546_v34 = vpop.f32.mrb[79].mxu0 }
 0x21a   : > { %v5456_v0 = vadd.f32 %v5455_v39, %v5454_v42  ;;  %v7051_v63 = vadd.f32 %v5544_v40, %v3771_v19  ;;  %v5457_v52 = vpop.f32.mrb[62].mxu1  ;;  %v5547_v49 = vadd.f32 %v5546_v34, %v5545_v60 }
 0x21b   : > { %v5458_v56 = vpop.f32.mrb[63].mxu1 }
 0x21c   : > { %v3803_v3 = vadd.f32 %v5456_v0, %v6974_v29  ;;  %v5459_v30 = vadd.f32 %v5458_v56, %v5457_v52  ;;  %v7055_v8 = vadd.f32 %v5547_v49, %v7022_v57 }
 0x21e   : > { %v7058_v58 = vadd.f32 %v5459_v30, %v6976_v24  ;;  %v5548_v18 = vpop.f32.mrb[80].mxu0 }
 0x21f   : > { %v5549_v22 = vpop.f32.mrb[81].mxu0 }
 0x220   : > { %v5460_v31 = vpop.f32.mrb[64].mxu1  ;;  %v5550_v12 = vadd.f32 %v5549_v22, %v5548_v18  ;;  %v5551_v28 = vpop.f32.mrb[82].mxu0 }
 0x221   : > { %v5461_v53 = vpop.f32.mrb[65].mxu1  ;;  %v5552_v19 = vpop.f32.mrb[83].mxu0 }
 0x222   : > { %v5462_v46 = vadd.f32 %v5461_v53, %v5460_v31  ;;  %v7060_v25 = vadd.f32 %v5550_v12, %v3779_v20  ;;  %v5463_v59 = vpop.f32.mrb[66].mxu1  ;;  %v5553_v32 = vadd.f32 %v5552_v19, %v5551_v28 }
 0x223   : > { %v5464_v29 = vpop.f32.mrb[67].mxu1 }
 0x224   : > { %v3811_v16 = vadd.f32 %v5462_v46, %v6825_v43  ;;  %v5465_v57 = vadd.f32 %v5464_v29, %v5463_v59  ;;  %v7064_v13 = vadd.f32 %v5553_v32, %v7031_v2 }
 0x226   : > { %v3814_v24 = vadd.f32 %v5465_v57, %v6835_v4  ;;  %v5554_v21 = vpop.f32.mrb[84].mxu0 }
 0x227   : > { %v5555_v17 = vpop.f32.mrb[85].mxu0 }
 0x228   : > { %v5466_v50 = vpop.f32.mrb[68].mxu1  ;;  %v5556_v6 = vadd.f32 %v5555_v17, %v5554_v21  ;;  %v5557_v45 = vpop.f32.mrb[86].mxu0 }
 0x229   : > { %v5467_v47 = vpop.f32.mrb[69].mxu1  ;;  %v5558_v42 = vpop.f32.mrb[87].mxu0 }
 0x22a   : > { %v5468_v20 = vadd.f32 %v5467_v47, %v5466_v50  ;;  %v7067_v40 = vadd.f32 %v5556_v6, %v3787_v15  ;;  %v5469_v60 = vpop.f32.mrb[70].mxu1  ;;  %v5559_v39 = vadd.f32 %v5558_v42, %v5557_v45 }
 0x22b   : > { %v5470_v34 = vpop.f32.mrb[71].mxu1 }
 0x22c   : > { %v3819_v43 = vadd.f32 %v5468_v20, %v6871_v7  ;;  %v5471_v0 = vadd.f32 %v5470_v34, %v5469_v60  ;;  %v7071_v2 = vadd.f32 %v5559_v39, %v7040_v35 }
 0x22e   : > { %v3822_v4 = vadd.f32 %v5471_v0, %v6877_v27  ;;  %v5560_v52 = vpop.f32.mrb[88].mxu0 }
 0x22f   : > { %v5561_v49 = vpop.f32.mrb[89].mxu0 }
 0x230   : > { %v5472_v56 = vpop.f32.mrb[72].mxu1  ;;  %v5562_v30 = vadd.f32 %v5561_v49, %v5560_v52  ;;  %v5563_v18 = vpop.f32.mrb[90].mxu0 }
 0x231   : > { %v5473_v22 = vpop.f32.mrb[73].mxu1  ;;  %v5564_v31 = vpop.f32.mrb[91].mxu0 }
 0x232   : > { %v5474_v15 = vadd.f32 %v5473_v22, %v5472_v56  ;;  %v7074_v12 = vadd.f32 %v5562_v30, %v3795_v37  ;;  %v5475_v28 = vpop.f32.mrb[74].mxu1  ;;  %v5565_v53 = vadd.f32 %v5564_v31, %v5563_v18 }
 0x233   : > { %v5476_v19 = vpop.f32.mrb[75].mxu1 }
 0x234   : > { %v3827_v7 = vadd.f32 %v5474_v15, %v6896_v5  ;;  %v5477_v46 = vadd.f32 %v5476_v19, %v5475_v28  ;;  %v7078_v35 = vadd.f32 %v5565_v53, %v7049_v26 }
 0x236   : > { %v3830_v27 = vadd.f32 %v5477_v46, %v6902_v61  ;;  %v5566_v59 = vpop.f32.mrb[92].mxu0 }
 0x237   : > { %v5567_v32 = vpop.f32.mrb[93].mxu0 }
 0x238   : > { %v5478_v29 = vpop.f32.mrb[76].mxu1  ;;  %v5568_v57 = vadd.f32 %v5567_v32, %v5566_v59  ;;  %v5569_v21 = vpop.f32.mrb[94].mxu0 }
 0x239   : > { %v5479_v17 = vpop.f32.mrb[77].mxu1  ;;  %v5570_v50 = vpop.f32.mrb[95].mxu0 }
 0x23a   : > { %v5480_v37 = vadd.f32 %v5479_v17, %v5478_v29  ;;  %v7081_v6 = vadd.f32 %v5568_v57, %v3803_v3  ;;  %v5481_v45 = vpop.f32.mrb[78].mxu1  ;;  %v5571_v47 = vadd.f32 %v5570_v50, %v5569_v21 }
 0x23b   : > { %v5482_v42 = vpop.f32.mrb[79].mxu1 }
 0x23c   : > { %v3835_v5 = vadd.f32 %v5480_v37, %v6916_v55  ;;  %v5483_v20 = vadd.f32 %v5482_v42, %v5481_v45  ;;  %v7085_v26 = vadd.f32 %v5571_v47, %v7058_v58 }
 0x23e   : > { %v3838_v61 = vadd.f32 %v5483_v20, %v6922_v9  ;;  %v5572_v60 = vpop.f32.mrb[96].mxu0 }
 0x23f   : > { %v5573_v39 = vpop.f32.mrb[97].mxu0 }
 0x240   : > { %v5612_v34 = vpop.f32.mrb[80].mxu1  ;;  %v5574_v0 = vadd.f32 %v5573_v39, %v5572_v60  ;;  %v5575_v52 = vpop.f32.mrb[98].mxu0 }
 0x241   : > { %v5613_v49 = vpop.f32.mrb[81].mxu1  ;;  %v5576_v56 = vpop.f32.mrb[99].mxu0 }
 0x242   : > { %v7088_v3 = vadd.f32 %v5574_v0, %v3811_v16  ;;  %v5614_v30 = vadd.f32 %v5613_v49, %v5612_v34  ;;  %v5615_v18 = vpop.f32.mrb[82].mxu1  ;;  %v5577_v22 = vadd.f32 %v5576_v56, %v5575_v52 }
 0x243   : > { %v5616_v31 = vpop.f32.mrb[83].mxu1 }
 0x244   : > { %v7090_v55 = vadd.f32 %v5577_v22, %v3814_v24  ;;  %v5617_v15 = vadd.f32 %v5616_v31, %v5615_v18  ;;  %v4037_v58 = vadd.f32 %v5614_v30, %v6985_v44 }
 0x246   : > { %v5578_v28 = vpop.f32.mrb[100].mxu0  ;;  %v4040_v9 = vadd.f32 %v5617_v15, %v6989_v36 }
 0x247   : > { %v5579_v53 = vpop.f32.mrb[101].mxu0 }
 0x248   : > { %v5618_v19 = vpop.f32.mrb[84].mxu1  ;;  %v5580_v46 = vadd.f32 %v5579_v53, %v5578_v28  ;;  %v5581_v59 = vpop.f32.mrb[102].mxu0 }
 0x249   : > { %v5619_v32 = vpop.f32.mrb[85].mxu1  ;;  %v5582_v29 = vpop.f32.mrb[103].mxu0 }
 0x24a   : > { %v7094_v16 = vadd.f32 %v5580_v46, %v3819_v43  ;;  %v5620_v57 = vadd.f32 %v5619_v32, %v5618_v19  ;;  %v5621_v21 = vpop.f32.mrb[86].mxu1  ;;  %v5583_v17 = vadd.f32 %v5582_v29, %v5581_v59 }
 0x24b   : > { %v5622_v50 = vpop.f32.mrb[87].mxu1 }
 0x24c   : > { %v7096_v24 = vadd.f32 %v5583_v17, %v3822_v4  ;;  %v5623_v37 = vadd.f32 %v5622_v50, %v5621_v21  ;;  %v4045_v44 = vadd.f32 %v5620_v57, %v6995_v11 }
 0x24e   : > { %v5584_v45 = vpop.f32.mrb[104].mxu0  ;;  %v4048_v36 = vadd.f32 %v5623_v37, %v6999_v51 }
 0x24f   : > { %v5585_v47 = vpop.f32.mrb[105].mxu0 }
 0x250   : > { %v5624_v42 = vpop.f32.mrb[88].mxu1  ;;  %v5586_v20 = vadd.f32 %v5585_v47, %v5584_v45  ;;  %v5587_v60 = vpop.f32.mrb[106].mxu0 }
 0x251   : > { %v5625_v39 = vpop.f32.mrb[89].mxu1  ;;  %v5588_v34 = vpop.f32.mrb[107].mxu0 }
 0x252   : > { %v7100_v43 = vadd.f32 %v5586_v20, %v3827_v7  ;;  %v5626_v0 = vadd.f32 %v5625_v39, %v5624_v42  ;;  %v5627_v52 = vpop.f32.mrb[90].mxu1  ;;  %v5589_v49 = vadd.f32 %v5588_v34, %v5587_v60 }
 0x253   : > { %v5628_v56 = vpop.f32.mrb[91].mxu1 }
 0x254   : > { %v7102_v4 = vadd.f32 %v5589_v49, %v3830_v27  ;;  %v5629_v30 = vadd.f32 %v5628_v56, %v5627_v52  ;;  %v4053_v11 = vadd.f32 %v5626_v0, %v7005_v38 }
 0x256   : > { %v5590_v18 = vpop.f32.mrb[108].mxu0  ;;  %v4056_v51 = vadd.f32 %v5629_v30, %v7009_v54 }
 0x257   : > { %v5591_v22 = vpop.f32.mrb[109].mxu0 }
 0x258   : > { %v5630_v31 = vpop.f32.mrb[92].mxu1  ;;  %v5592_v15 = vadd.f32 %v5591_v22, %v5590_v18  ;;  %v5593_v28 = vpop.f32.mrb[110].mxu0 }
 0x259   : > { %v5631_v53 = vpop.f32.mrb[93].mxu1  ;;  %v5594_v7 = vpop.f32.mrb[111].mxu0 }
 0x25a   : > { %v7106_v19 = vadd.f32 %v5592_v15, %v3835_v5  ;;  %v5632_v46 = vadd.f32 %v5631_v53, %v5630_v31  ;;  %v5633_v59 = vpop.f32.mrb[94].mxu1  ;;  %v5595_v32 = vadd.f32 %v5594_v7, %v5593_v28 }
 0x25b   : > { %v5634_v27 = vpop.f32.mrb[95].mxu1 }
 0x25c   : > { %v7108_v29 = vadd.f32 %v5595_v32, %v3838_v61  ;;  %v5635_v57 = vadd.f32 %v5634_v27, %v5633_v59  ;;  %v4061_v38 = vadd.f32 %v5632_v46, %v7015_v23 }
 0x25e   : > { %v5750_v21 = vpop.f32.mrb[112].mxu0  ;;  %v4064_v54 = vadd.f32 %v5635_v57, %v7019_v62 }
 0x25f   : > { %v7112_v17 = vadd.f32 %v5750_v21, %v4045_v44  ;;  %v4197_v50 = vpop.f32.mrb[113].mxu0 }
 0x260   : > { %v5636_v37 = vpop.f32.mrb[96].mxu1  ;;  %v7115_v45 = vadd.f32 %v4197_v50, %v4037_v58  ;;  %v5751_v5 = vpop.f32.mrb[114].mxu0 }
 0x261   : > { %v5637_v47 = vpop.f32.mrb[97].mxu1  ;;  %v7117_v42 = vadd.f32 %v5751_v5, %v4048_v36  ;;  %v4200_v20 = vpop.f32.mrb[115].mxu0 }
 0x262   : > { %v5638_v61 = vadd.f32 %v5637_v47, %v5636_v37  ;;  %v5639_v60 = vpop.f32.mrb[98].mxu1  ;;  %v7124_v23 = vadd.f32 %v4200_v20, %v4040_v9 }
 0x263   : > { %v5173_v62 = vpack.c.bf16 %v7117_v42, %v7112_v17  ;;  %v5640_v58 = vpop.f32.mrb[99].mxu1 }
 0x264   : > { %v5641_v44 = vadd.f32 %v5640_v58, %v5639_v60  ;;  %v5168_v36 = vpack.c.bf16 %v7124_v23, %v7115_v45  ;;  %v4484_v39 = vadd.f32 %v7124_v23, %v7115_v45  ;;  %v4069_v34 = vadd.f32 %v5638_v61, %v7024_v33 }
 0x265   : > { %5245 = vst [vmem:[%s7122_s17 + $0x8] sm:$0xff] %v5173_v62  }
 0x266   : > { %5169 = vst [vmem:[%s7122_s17] sm:$0xff] %v5168_v36   ;;  %v4485_v0 = vadd.f32 %v4484_v39, %v7112_v17  ;;  %v5754_v52 = vpop.f32.mrb[116].mxu0  ;;  %v4072_v9 = vadd.f32 %v5641_v44, %v7028_v10 }
 0x267   : > { %v7137_v49 = vadd.f32 %v5754_v52, %v4061_v38  ;;  %v4213_v56 = vpop.f32.mrb[117].mxu0 }
 0x268   : > { %v5642_v30 = vpop.f32.mrb[100].mxu1  ;;  %v7139_v18 = vadd.f32 %v4213_v56, %v4053_v11  ;;  %v4486_v22 = vadd.f32 %v4485_v0, %v7117_v42  ;;  %v5755_v31 = vpop.f32.mrb[118].mxu0 }
 0x269   : > { %v5643_v15 = vpop.f32.mrb[101].mxu1  ;;  %v7142_v33 = vadd.f32 %v5755_v31, %v4064_v54  ;;  %v4216_v28 = vpop.f32.mrb[119].mxu0 }
 0x26a   : > { %v5644_v53 = vadd.f32 %v5643_v15, %v5642_v30  ;;  %v4487_v7 = vadd.f32 %v4486_v22, %v7139_v18  ;;  %v5645_v46 = vpop.f32.mrb[102].mxu1  ;;  %v7145_v10 = vadd.f32 %v4216_v28, %v4056_v51 }
 0x26b   : > { %v5183_v59 = vpack.c.bf16 %v7142_v33, %v7137_v49  ;;  %v5646_v11 = vpop.f32.mrb[103].mxu1 }
 0x26c   : > { %v5647_v32 = vadd.f32 %v5646_v11, %v5645_v46  ;;  %v5178_v27 = vpack.c.bf16 %v7145_v10, %v7139_v18  ;;  %v4488_v57 = vadd.f32 %v4487_v7, %v7145_v10  ;;  %v4077_v38 = vadd.f32 %v5644_v53, %v7033_v1 }
 0x26d   : > { %5247 = vst [vmem:[%s7122_s17 + $0x18] sm:$0xff] %v5183_v59  }
 0x26e   : > { %5246 = vst [vmem:[%s7122_s17 + $0x10] sm:$0xff] %v5178_v27   ;;  %v4489_v21 = vadd.f32 %v4488_v57, %v7137_v49  ;;  %v5758_v54 = vpop.f32.mrb[120].mxu0  ;;  %v4080_v51 = vadd.f32 %v5647_v32, %v7037_v48 }
 0x26f   : > { %v7157_v50 = vadd.f32 %v5758_v54, %v4077_v38  ;;  %v4229_v37 = vpop.f32.mrb[121].mxu0 }
 0x270   : > { %v5648_v5 = vpop.f32.mrb[104].mxu1  ;;  %v7159_v47 = vadd.f32 %v4229_v37, %v4069_v34  ;;  %v4490_v20 = vadd.f32 %v4489_v21, %v7142_v33  ;;  %v5759_v61 = vpop.f32.mrb[122].mxu0 }
 0x271   : > { %v5649_v60 = vpop.f32.mrb[105].mxu1  ;;  %v7162_v1 = vadd.f32 %v5759_v61, %v4080_v51  ;;  %v4232_v62 = vpop.f32.mrb[123].mxu0 }
 0x272   : > { %v5650_v58 = vadd.f32 %v5649_v60, %v5648_v5  ;;  %v4491_v44 = vadd.f32 %v4490_v20, %v7159_v47  ;;  %v5651_v36 = vpop.f32.mrb[106].mxu1  ;;  %v7165_v48 = vadd.f32 %v4232_v62, %v4072_v9 }
 0x273   : > { %v5193_v39 = vpack.c.bf16 %v7162_v1, %v7157_v50  ;;  %v5652_v34 = vpop.f32.mrb[107].mxu1 }
 0x274   : > { %v5653_v0 = vadd.f32 %v5652_v34, %v5651_v36  ;;  %v5188_v52 = vpack.c.bf16 %v7165_v48, %v7159_v47  ;;  %v4492_v56 = vadd.f32 %v4491_v44, %v7165_v48  ;;  %v4085_v30 = vadd.f32 %v5650_v58, %v7042_v14 }
 0x275   : > { %5249 = vst [vmem:[%s7122_s17 + $0x28] sm:$0xff] %v5193_v39  }
 0x276   : > { %5248 = vst [vmem:[%s7122_s17 + $0x20] sm:$0xff] %v5188_v52   ;;  %v4493_v22 = vadd.f32 %v4492_v56, %v7157_v50  ;;  %v5762_v31 = vpop.f32.mrb[124].mxu0  ;;  %v4088_v9 = vadd.f32 %v5653_v0, %v7046_v41 }
 0x277   : > { %v4245_v15 = vpop.f32.mrb[125].mxu0 }
 0x278   : > { %v5654_v28 = vpop.f32.mrb[108].mxu1  ;;  %v7177_v53 = vadd.f32 %v4245_v15, %v4085_v30  ;;  %v5763_v7 = vpop.f32.mrb[126].mxu0  ;;  %v4494_v32 = vadd.f32 %v4493_v22, %v7162_v1 }
 0x279   : > { %v5655_v46 = vpop.f32.mrb[109].mxu1  ;;  %v4248_v59 = vpop.f32.mrb[127].mxu0 }
 0x27a   : > { %v5656_v11 = vadd.f32 %v5655_v46, %v5654_v28  ;;  %v5657_v27 = vpop.f32.mrb[110].mxu1  ;;  %v7180_v14 = vadd.f32 %v4248_v59, %v4088_v9  ;;  %v4495_v51 = vadd.f32 %v4494_v32, %v7177_v53 }
 0x27b   : > { %v5658_v57 = vpop.f32.mrb[111].mxu1 }
 0x27c   : > { %v4093_v38 = vadd.f32 %v5656_v11, %v7051_v63  ;;  %v5659_v21 = vadd.f32 %v5658_v57, %v5657_v27  ;;  %v5198_v41 = vpack.c.bf16 %v7180_v14, %v7177_v53  ;;  %v4496_v36 = vadd.f32 %v4495_v51, %v7180_v14 }
 0x27e   : > { %v7185_v54 = vadd.f32 %v5762_v31, %v4093_v38  ;;  %v4096_v37 = vadd.f32 %v5659_v21, %v7055_v8  ;;  %5250 = vst [vmem:[%s7122_s17 + $0x30] sm:$0xff] %v5198_v41   ;;  %v5766_v5 = vpop.f32.mrb[128].mxu0 }
 0x27f   : > { %v4261_v20 = vpop.f32.mrb[129].mxu0 }
 0x280   : > { %v7190_v61 = vadd.f32 %v5763_v7, %v4096_v37  ;;  %v5660_v60 = vpop.f32.mrb[112].mxu1  ;;  %v5767_v62 = vpop.f32.mrb[130].mxu0  ;;  %v4497_v56 = vadd.f32 %v4496_v36, %v7185_v54 }
 0x281   : > { %v5661_v58 = vpop.f32.mrb[113].mxu1  ;;  %v4264_v63 = vpop.f32.mrb[131].mxu0 }
 0x282   : > { %v5203_v44 = vpack.c.bf16 %v7190_v61, %v7185_v54  ;;  %v5662_v39 = vadd.f32 %v5661_v58, %v5660_v60  ;;  %v5663_v34 = vpop.f32.mrb[114].mxu1  ;;  %v4498_v11 = vadd.f32 %v4497_v56, %v7190_v61 }
 0x283   : > { %v5664_v0 = vpop.f32.mrb[115].mxu1 }
 0x284   : > { %5251 = vst [vmem:[%s7122_s17 + $0x38] sm:$0xff] %v5203_v44   ;;  %v4101_v8 = vadd.f32 %v5662_v39, %v7060_v25  ;;  %v5665_v52 = vadd.f32 %v5664_v0, %v5663_v34 }
 0x286   : > { %v7198_v30 = vadd.f32 %v4261_v20, %v4101_v8  ;;  %v4104_v22 = vadd.f32 %v5665_v52, %v7064_v13  ;;  %v5770_v31 = vpop.f32.mrb[132].mxu0 }
 0x287   : > { %v4277_v9 = vpop.f32.mrb[133].mxu0 }
 0x288   : > { %v7201_v15 = vadd.f32 %v4264_v63, %v4104_v22  ;;  %v5666_v28 = vpop.f32.mrb[116].mxu1  ;;  %v5771_v7 = vpop.f32.mrb[134].mxu0  ;;  %v4499_v38 = vadd.f32 %v4498_v11, %v7198_v30 }
 0x289   : > { %v5667_v46 = vpop.f32.mrb[117].mxu1  ;;  %v4280_v59 = vpop.f32.mrb[135].mxu0 }
 0x28a   : > { %v5208_v25 = vpack.c.bf16 %v7201_v15, %v7198_v30  ;;  %v5668_v32 = vadd.f32 %v5667_v46, %v5666_v28  ;;  %v5669_v27 = vpop.f32.mrb[118].mxu1  ;;  %v4500_v60 = vadd.f32 %v4499_v38, %v7201_v15 }
 0x28b   : > { %v5670_v57 = vpop.f32.mrb[119].mxu1 }
 0x28c   : > { %5252 = vst [vmem:[%s7122_s17 + $0x40] sm:$0xff] %v5208_v25   ;;  %v4109_v13 = vadd.f32 %v5668_v32, %v7067_v40  ;;  %v5671_v21 = vadd.f32 %v5670_v57, %v5669_v27 }
 0x28e   : > { %v7209_v41 = vadd.f32 %v5766_v5, %v4109_v13  ;;  %v4112_v51 = vadd.f32 %v5671_v21, %v7071_v2  ;;  %v7212_v37 = vpop.f32.mrb[136].mxu0 }
 0x28f   : > { %v4293_v20 = vpop.f32.mrb[137].mxu0 }
 0x290   : > { %v7215_v58 = vadd.f32 %v5767_v62, %v4112_v51  ;;  %v5672_v63 = vpop.f32.mrb[120].mxu1  ;;  %v5775_v44 = vpop.f32.mrb[138].mxu0  ;;  %v4501_v34 = vadd.f32 %v4500_v60, %v7209_v41 }
 0x291   : > { %v5673_v36 = vpop.f32.mrb[121].mxu1  ;;  %v4296_v39 = vpop.f32.mrb[139].mxu0 }
 0x292   : > { %v5213_v40 = vpack.c.bf16 %v7215_v58, %v7209_v41  ;;  %v5674_v5 = vadd.f32 %v5673_v36, %v5672_v63  ;;  %v5675_v0 = vpop.f32.mrb[122].mxu1  ;;  %v4502_v56 = vadd.f32 %v4501_v34, %v7215_v58 }
 0x293   : > { %v5676_v8 = vpop.f32.mrb[123].mxu1 }
 0x294   : > { %5253 = vst [vmem:[%s7122_s17 + $0x48] sm:$0xff] %v5213_v40   ;;  %v4117_v2 = vadd.f32 %v5674_v5, %v7074_v12  ;;  %v5677_v52 = vadd.f32 %v5676_v8, %v5675_v0 }
 0x296   : > { %v7223_v62 = vadd.f32 %v4277_v9, %v4117_v2  ;;  %v4120_v22 = vadd.f32 %v5677_v52, %v7078_v35  ;;  %v7226_v28 = vpop.f32.mrb[140].mxu0 }
 0x297   : > { %v4309_v46 = vpop.f32.mrb[141].mxu0 }
 0x298   : > { %v4503_v11 = vadd.f32 %v4502_v56, %v7223_v62  ;;  %v7229_v25 = vadd.f32 %v4280_v59, %v4120_v22  ;;  %v5678_v32 = vpop.f32.mrb[124].mxu1  ;;  %v7231_v27 = vpop.f32.mrb[142].mxu0 }
 0x299   : > { %v5679_v57 = vpop.f32.mrb[125].mxu1  ;;  %v4312_v12 = vpop.f32.mrb[143].mxu0 }
 0x29a   : > { %v5218_v38 = vpack.c.bf16 %v7229_v25, %v7223_v62  ;;  %v4504_v9 = vadd.f32 %v4503_v11, %v7229_v25  ;;  %v5680_v13 = vadd.f32 %v5679_v57, %v5678_v32  ;;  %v5681_v21 = vpop.f32.mrb[126].mxu1 }
 0x29b   : > { %v5682_v35 = vpop.f32.mrb[127].mxu1 }
 0x29c   : > { %5254 = vst [vmem:[%s7122_s17 + $0x50] sm:$0xff] %v5218_v38   ;;  %v4125_v51 = vadd.f32 %v5680_v13, %v7081_v6  ;;  %v5683_v60 = vadd.f32 %v5682_v35, %v5681_v21 }
 0x29e   : > { %v7238_v59 = vadd.f32 %v5770_v31, %v4125_v51  ;;  %v4128_v63 = vadd.f32 %v5683_v60, %v7085_v26 }
 0x2a0   : > { %v4505_v36 = vadd.f32 %v4504_v9, %v7238_v59  ;;  %v7242_v34 = vadd.f32 %v5771_v7, %v4128_v63  ;;  %v5684_v40 = vpop.f32.mrb[128].mxu1 }
 0x2a1   : > { %v5685_v5 = vpop.f32.mrb[129].mxu1 }
 0x2a2   : > { %v5223_v0 = vpack.c.bf16 %v7242_v34, %v7238_v59  ;;  %v4506_v8 = vadd.f32 %v4505_v36, %v7242_v34  ;;  %v5686_v2 = vadd.f32 %v5685_v5, %v5684_v40  ;;  %v5687_v52 = vpop.f32.mrb[130].mxu1 }
 0x2a3   : > { %v5688_v6 = vpop.f32.mrb[131].mxu1 }
 0x2a4   : > { %5255 = vst [vmem:[%s7122_s17 + $0x58] sm:$0xff] %v5223_v0   ;;  %v4133_v31 = vadd.f32 %v5686_v2, %v7088_v3  ;;  %v5689_v56 = vadd.f32 %v5688_v6, %v5687_v52 }
 0x2a6   : > { %v7249_v26 = vadd.f32 %v4293_v20, %v4133_v31  ;;  %v4136_v7 = vadd.f32 %v5689_v56, %v7090_v55 }
 0x2a8   : > { %v4507_v22 = vadd.f32 %v4506_v8, %v7249_v26  ;;  %v4297_v11 = vadd.f32 %v4296_v39, %v4136_v7  ;;  %v5690_v32 = vpop.f32.mrb[132].mxu1 }
 0x2a9   : > { %v5691_v57 = vpop.f32.mrb[133].mxu1 }
 0x2aa   : > { %v5228_v38 = vpack.c.bf16 %v4297_v11, %v7249_v26  ;;  %v4508_v9 = vadd.f32 %v4507_v22, %v4297_v11  ;;  %v5692_v13 = vadd.f32 %v5691_v57, %v5690_v32  ;;  %v5693_v21 = vpop.f32.mrb[134].mxu1 }
 0x2ab   : > { %v5694_v35 = vpop.f32.mrb[135].mxu1 }
 0x2ac   : > { %5256 = vst [vmem:[%s7122_s17 + $0x60] sm:$0xff] %v5228_v38   ;;  %v4141_v3 = vadd.f32 %v5692_v13, %v7094_v16  ;;  %v5695_v51 = vadd.f32 %v5694_v35, %v5693_v21 }
 0x2ae   : > { %v4302_v20 = vadd.f32 %v7212_v37, %v4141_v3  ;;  %v4144_v55 = vadd.f32 %v5695_v51, %v7096_v24 }
 0x2b0   : > { %v4305_v60 = vadd.f32 %v5775_v44, %v4144_v55  ;;  %v5696_v63 = vpop.f32.mrb[136].mxu1  ;;  %v4509_v39 = vadd.f32 %v4508_v9, %v4302_v20 }
 0x2b1   : > { %v5697_v36 = vpop.f32.mrb[137].mxu1 }
 0x2b2   : > { %v5233_v40 = vpack.c.bf16 %v4305_v60, %v4302_v20  ;;  %v5698_v5 = vadd.f32 %v5697_v36, %v5696_v63  ;;  %v5699_v0 = vpop.f32.mrb[138].mxu1  ;;  %v4510_v8 = vadd.f32 %v4509_v39, %v4305_v60 }
 0x2b3   : > { %v5700_v2 = vpop.f32.mrb[139].mxu1 }
 0x2b4   : > { %5257 = vst [vmem:[%s7122_s17 + $0x68] sm:$0xff] %v5233_v40   ;;  %v5701_v52 = vadd.f32 %v5700_v2, %v5699_v0  ;;  %v4149_v6 = vadd.f32 %v5698_v5, %v7100_v43 }
 0x2b6   : > { %v4310_v16 = vadd.f32 %v4309_v46, %v4149_v6  ;;  %v4152_v31 = vadd.f32 %v5701_v52, %v7102_v4 }
 0x2b8   : > { %v4511_v37 = vadd.f32 %v4510_v8, %v4310_v16  ;;  %v4313_v56 = vadd.f32 %v4312_v12, %v4152_v31  ;;  %v5702_v24 = vpop.f32.mrb[140].mxu1 }
 0x2b9   : > { %v5703_v44 = vpop.f32.mrb[141].mxu1 }
 0x2ba   : > { %v5238_v7 = vpack.c.bf16 %v4313_v56, %v4310_v16  ;;  %v4512_v22 = vadd.f32 %v4511_v37, %v4313_v56  ;;  %v5704_v32 = vadd.f32 %v5703_v44, %v5702_v24  ;;  %v5705_v57 = vpop.f32.mrb[142].mxu1 }
 0x2bb   : > { %v5706_v38 = vpop.f32.mrb[143].mxu1 }
 0x2bc   : > { %5258 = vst [vmem:[%s7122_s17 + $0x70] sm:$0xff] %v5238_v7   ;;  %v4157_v9 = vadd.f32 %v5704_v32, %v7106_v19  ;;  %v5707_v13 = vadd.f32 %v5706_v38, %v5705_v57 }
 0x2be   : > { %v4318_v43 = vadd.f32 %v7226_v28, %v4157_v9  ;;  %v4160_v46 = vadd.f32 %v5707_v13, %v7108_v29 }
 0x2c0   : > { %v4513_v4 = vadd.f32 %v4512_v22, %v4318_v43  ;;  %v4321_v12 = vadd.f32 %v7231_v27, %v4160_v46 }
 0x2c2   : > { %v5243_v21 = vpack.c.bf16 %v4321_v12, %v4318_v43  ;;  %v4514_v35 = vadd.f32 %v4513_v4, %v4321_v12 }
 0x2c4   : > { %5259 = vst [vmem:[%s7122_s17 + $0x78] sm:$0xff] %v5243_v21   ;;  %v4515_v3 = vrot.slane %v4514_v35, 4 }
 0x2c6   : > { %v4516_v51 = vadd.f32 %v4515_v3, %v4514_v35 }
 0x2c8   : > { %v4517_v55 = vrot.slane %v4516_v51, 2 }
 0x2ca   : > { %v4518_v63 = vadd.f32 %v4517_v55, %v4516_v51 }
 0x2cc   : > { %v4519_v39 = vrot.slane %v4518_v63, 1 }
 0x2ce   : > { %v4520_v19 = vadd.f32 %v4519_v39, %v4518_v63 }
 0x2d0   : > { %4554 = vst [vmem:[%s7271_s21] sm:$0x1] %v4520_v19  ;;  %v7274_v29 = vmul.f32 0.00390625, %v4520_v19 }
 0x2d2   : > { %v7278_v28 = vsub.f32 %v7223_v62, %v7274_v29  ;;  %v7282_v27 = vsub.f32 %v7229_v25, %v7274_v29  ;;  %v7286_v36 = vsub.f32 %v7238_v59, %v7274_v29  ;;  %v7290_v40 = vsub.f32 %v7242_v34, %v7274_v29 }
 0x2d3   : > { %v7294_v5 = vsub.f32 %v7249_v26, %v7274_v29  ;;  %v7297_v0 = vsub.f32 %v4297_v11, %v7274_v29  ;;  %v7300_v62 = vsub.f32 %v4302_v20, %v7274_v29  ;;  %v7303_v25 = vsub.f32 %v4305_v60, %v7274_v29 }
 0x2d4   : > { %v7306_v59 = vsub.f32 %v4310_v16, %v7274_v29  ;;  %v7309_v8 = vsub.f32 %v4313_v56, %v7274_v29  ;;  %v7312_v34 = vsub.f32 %v4318_v43, %v7274_v29  ;;  %v7315_v26 = vsub.f32 %v4321_v12, %v7274_v29 }
 0x2d5   : > { %v4522_v11 = vsub.f32 %v7115_v45, %v7274_v29  ;;  %v4523_v20 = vsub.f32 %v7124_v23, %v7274_v29  ;;  %v4524_v60 = vsub.f32 %v7112_v17, %v7274_v29  ;;  %v4525_v6 = vsub.f32 %v7117_v42, %v7274_v29 }
 0x2d6   : > { %v4526_v16 = vsub.f32 %v7139_v18, %v7274_v29  ;;  %v4527_v56 = vsub.f32 %v7145_v10, %v7274_v29  ;;  %v4528_v23 = vsub.f32 %v7137_v49, %v7274_v29  ;;  %v4529_v7 = vsub.f32 %v7142_v33, %v7274_v29 }
 0x2d7   : > { %v4555_v2 = vmul.f32 %v4522_v11, %v4522_v11  ;;  %v4556_v52 = vmul.f32 %v4523_v20, %v4523_v20  ;;  %v4557_v31 = vmul.f32 %v4524_v60, %v4524_v60  ;;  %v4558_v45 = vmul.f32 %v4525_v6, %v4525_v6 }
 0x2d8   : > { %v4559_v44 = vmul.f32 %v4526_v16, %v4526_v16  ;;  %v4560_v22 = vmul.f32 %v4527_v56, %v4527_v56  ;;  %v4530_v18 = vsub.f32 %v7159_v47, %v7274_v29  ;;  %v4561_v32 = vmul.f32 %v4528_v23, %v4528_v23 }
 0x2d9   : > { %v4587_v37 = vadd.f32 %v4556_v52, %v4555_v2  ;;  %v4531_v10 = vsub.f32 %v7165_v48, %v7274_v29  ;;  %v4562_v38 = vmul.f32 %v4529_v7, %v4529_v7  ;;  %v4532_v49 = vsub.f32 %v7157_v50, %v7274_v29 }
 0x2da   : > { %v4563_v13 = vmul.f32 %v4530_v18, %v4530_v18  ;;  %v4533_v33 = vsub.f32 %v7162_v1, %v7274_v29  ;;  %v4534_v47 = vsub.f32 %v7177_v53, %v7274_v29  ;;  %v4535_v48 = vsub.f32 %v7180_v14, %v7274_v29 }
 0x2db   : > { %v4588_v24 = vadd.f32 %v4587_v37, %v4557_v31  ;;  %v4564_v46 = vmul.f32 %v4531_v10, %v4531_v10  ;;  %v4565_v12 = vmul.f32 %v4532_v49, %v4532_v49  ;;  %v4536_v50 = vsub.f32 %v7185_v54, %v7274_v29 }
 0x2dc   : > { %v4566_v35 = vmul.f32 %v4533_v33, %v4533_v33  ;;  %v4567_v51 = vmul.f32 %v4534_v47, %v4534_v47  ;;  %v4537_v1 = vsub.f32 %v7190_v61, %v7274_v29  ;;  %v4568_v63 = vmul.f32 %v4535_v48, %v4535_v48 }
 0x2dd   : > { %v4589_v17 = vadd.f32 %v4588_v24, %v4558_v45  ;;  %v4538_v53 = vsub.f32 %v7198_v30, %v7274_v29  ;;  %v4569_v19 = vmul.f32 %v4536_v50, %v4536_v50  ;;  %v4539_v14 = vsub.f32 %v7201_v15, %v7274_v29 }
 0x2de   : > { %v4570_v20 = vmul.f32 %v4537_v1, %v4537_v1  ;;  %v4540_v54 = vsub.f32 %v7209_v41, %v7274_v29  ;;  %v4541_v61 = vsub.f32 %v7215_v58, %v7274_v29  ;;  %v4575_v45 = vmul.f32 %v7278_v28, %v7278_v28 }
 0x2df   : > { %v4590_v42 = vadd.f32 %v4589_v17, %v4559_v44  ;;  %v4571_v2 = vmul.f32 %v4538_v53, %v4538_v53  ;;  %v4572_v6 = vmul.f32 %v4539_v14, %v4539_v14  ;;  %v4576_v24 = vmul.f32 %v7282_v27, %v7282_v27 }
 0x2e0   : > { %v4573_v31 = vmul.f32 %v4540_v54, %v4540_v54  ;;  %v4574_v30 = vmul.f32 %v4541_v61, %v4541_v61  ;;  %v4577_v41 = vmul.f32 %v7286_v36, %v7286_v36  ;;  %v4578_v58 = vmul.f32 %v7290_v40, %v7290_v40 }
 0x2e1   : > { %v4591_v57 = vadd.f32 %v4590_v42, %v4560_v22  ;;  %v4579_v17 = vmul.f32 %v7294_v5, %v7294_v5  ;;  %v4580_v28 = vmul.f32 %v7297_v0, %v7297_v0  ;;  %v4581_v27 = vmul.f32 %v7300_v62, %v7300_v62 }
 0x2e2   : > { %v4582_v36 = vmul.f32 %v7303_v25, %v7303_v25  ;;  %v4583_v40 = vmul.f32 %v7306_v59, %v7306_v59  ;;  %v4584_v5 = vmul.f32 %v7309_v8, %v7309_v8  ;;  %v4585_v0 = vmul.f32 %v7312_v34, %v7312_v34 }
 0x2e3   : > { %v4592_v9 = vadd.f32 %v4591_v57, %v4561_v32  ;;  %v4586_v62 = vmul.f32 %v7315_v26, %v7315_v26 }
 0x2e5   : > { %v4593_v43 = vadd.f32 %v4592_v9, %v4562_v38 }
 0x2e7   : > { %v4594_v4 = vadd.f32 %v4593_v43, %v4563_v13 }
 0x2e9   : > { %v4595_v21 = vadd.f32 %v4594_v4, %v4564_v46 }
 0x2eb   : > { %v4596_v3 = vadd.f32 %v4595_v21, %v4565_v12 }
 0x2ed   : > { %v4597_v55 = vadd.f32 %v4596_v3, %v4566_v35 }
 0x2ef   : > { %v4598_v39 = vadd.f32 %v4597_v55, %v4567_v51 }
 0x2f1   : > { %v4599_v11 = vadd.f32 %v4598_v39, %v4568_v63 }
 0x2f3   : > { %v4600_v60 = vadd.f32 %v4599_v11, %v4569_v19 }
 0x2f5   : > { %v4601_v52 = vadd.f32 %v4600_v60, %v4570_v20 }
 0x2f7   : > { %v4602_v16 = vadd.f32 %v4601_v52, %v4571_v2 }
 0x2f9   : > { %v4603_v37 = vadd.f32 %v4602_v16, %v4572_v6 }
 0x2fb   : > { %v4604_v56 = vadd.f32 %v4603_v37, %v4573_v31 }
 0x2fd   : > { %v4605_v15 = vadd.f32 %v4604_v56, %v4574_v30 }
 0x2ff   : > { %v4606_v23 = vadd.f32 %v4605_v15, %v4575_v45 }
 0x301   : > { %v4607_v44 = vadd.f32 %v4606_v23, %v4576_v24 }
 0x303   : > { %v4608_v29 = vadd.f32 %v4607_v44, %v4577_v41 }
 0x305   : > { %v4609_v7 = vadd.f32 %v4608_v29, %v4578_v58 }
 0x307   : > { %v4610_v22 = vadd.f32 %v4609_v7, %v4579_v17 }
 0x309   : > { %v4611_v42 = vadd.f32 %v4610_v22, %v4580_v28 }
 0x30b   : > { %v4612_v18 = vadd.f32 %v4611_v42, %v4581_v27 }
 0x30d   : > { %v4613_v32 = vadd.f32 %v4612_v18, %v4582_v36 }
 0x30f   : > { %v4614_v57 = vadd.f32 %v4613_v32, %v4583_v40 }
 0x311   : > { %v4615_v10 = vadd.f32 %v4614_v57, %v4584_v5 }
 0x313   : > { %v4616_v38 = vadd.f32 %v4615_v10, %v4585_v0 }
 0x315   : > { %v4617_v9 = vadd.f32 %v4616_v38, %v4586_v62 }
 0x317   : > { %v4618_v25 = vrot.slane %v4617_v9, 4 }
 0x319   : > { %v4619_v49 = vadd.f32 %v4618_v25, %v4617_v9 }
 0x31b   : > { %v4620_v13 = vrot.slane %v4619_v49, 2 }
 0x31d   : > { %v4621_v43 = vadd.f32 %v4620_v13, %v4619_v49 }
 0x31f   : > { %v4622_v33 = vrot.slane %v4621_v43, 1 }
 0x321   : > { %v4623_v59 = vadd.f32 %v4622_v33, %v4621_v43 }
 0x323   : > { %4624 = vst [vmem:[%s7271_s21 + $0x1] sm:$0x1] %v4623_v59 }
 0x324 PF: > { %s14_s12 = sadd.s32 1, %s6044_s12  }
 0x325   : > { %p11_p4 = scmp.ge.s32.totalorder %s14_s12, 4  }
 0x327   :  { %13 = sbr.rel (!%p11_p4) target bundleno = 1 (0x1), region = 73 }

</bundles_post_ra>
